<compile_context>
chip_gen: v5e
topology: v5e:2x2
jax: 0.10.0
libtpu: 0.0.40
codegen_flags: <defaults>
</compile_context>

<pallas_src>
import numpy as np
import jax
import jax.numpy as jnp
from jax.experimental import pallas as pl
from jax.experimental.pallas import tpu as pltpu

# ----------------------- model config (small, forward-consistent) ------------
IMAGE_SIZE = 16
PATCH_SIZE = 4
CHANNELS = 3
DIM = 32
HEADS = 4
DIM_HEAD = 8
MLP_DIM = 64
NO_OF_BLOCKS = 2
BATCH = 2

NUM_PATCHES = (IMAGE_SIZE // PATCH_SIZE) ** 2          # 16
PATCH_DIM = CHANNELS * PATCH_SIZE ** 2                 # 48
INNER_DIM = HEADS * DIM_HEAD                           # 32
N_TOKENS = NUM_PATCHES + 1                             # 17 (cls + patches)
SCALE = DIM_HEAD ** -0.5
LN_EPS = 1e-5
NEG_BIG = -1e30


# ----------------------------- fused Pallas kernel ----------------------------
def _layer_norm(x, g, b):
    # LayerNorm over the last (feature) axis, eps = 1e-5 (PyTorch default), f32 stats.
    mean = jnp.mean(x, axis=-1, keepdims=True)
    var = jnp.mean((x - mean) ** 2, axis=-1, keepdims=True)
    return (x - mean) * jax.lax.rsqrt(var + LN_EPS) * g + b


def vit_fused_kernel(patches_ref,      # (B*N, PATCH_DIM) rows b*N zero-padded (cls)
                     pw_ref,           # (PATCH_DIM, DIM)
                     tokadd_ref,       # (B*N, DIM)  pos emb + patch bias (+ cls row)
                     wqkv_ref,         # (DIM, 3*INNER)  Q columns pre-scaled
                     wout_ref,         # (INNER, DIM)
                     bout_ref,         # (1, DIM)
                     hmask_ref,        # (HEADS, 1, INNER) 0/1 lane masks
                     abias_ref,        # (B*N, B*N) 0 same-batch, -1e30 cross-batch
                     ln1g_ref, ln1b_ref, ln2g_ref, ln2b_ref,   # (NB, 1, DIM) each
                     w1_ref, b1_ref, w2_ref, b2_ref,           # MLP stacks
                     o_ref):           # (B*N, DIM)
    f32 = jnp.float32

    # --- patch embedding + cls/pos add (batch folded into rows) --------------
    x = (jnp.dot(patches_ref[...], pw_ref[...], preferred_element_type=f32)
         + tokadd_ref[...])                                        # (B*N, DIM)

    wqkv = wqkv_ref[...]                                           # (DIM, 3*INNER)
    wout = wout_ref[...]                                           # (INNER, DIM)
    bout = bout_ref[...]                                           # (1, DIM)
    abias = abias_ref[...]                                         # (B*N, B*N)

    for l in range(NO_OF_BLOCKS):                                  # static unroll
        # ------------- attention sublayer (weights shared across blocks) -----
        xn = _layer_norm(x, ln1g_ref[l], ln1b_ref[l])              # (B*N, DIM)
        qkv = jnp.dot(xn, wqkv, preferred_element_type=f32)        # (B*N, 3*INNER)
        q = qkv[:, 0 * INNER_DIM:1 * INNER_DIM]                    # (B*N, INNER)
        k = qkv[:, 1 * INNER_DIM:2 * INNER_DIM]
        v = qkv[:, 2 * INNER_DIM:3 * INNER_DIM]

        out2 = None                                                # (B*N, INNER)
        for h in range(HEADS):                                     # static unroll
            m = hmask_ref[h]                                       # (1, INNER)
            # per-head scores via lane-masked Q; scale already folded into Wq
            dots = jax.lax.dot_general(q * m, k,
                                       dimension_numbers=(((1,), (1,)), ((), ())),
                                       preferred_element_type=f32)  # (B*N, B*N)
            dots = dots + abias                                    # block-diag batches
            dots = dots - jnp.max(dots, axis=-1, keepdims=True)
            e = jnp.exp(dots)
            attn = e * pl.reciprocal(jnp.sum(e, axis=-1, keepdims=True), approx=True)
            # masked V places this head's output directly in its lane range
            contrib = jnp.dot(attn, v * m, preferred_element_type=f32)  # (B*N, INNER)
            out2 = contrib if out2 is None else out2 + contrib

        x = x + jnp.dot(out2, wout, preferred_element_type=f32) + bout

        # ------------- MLP sublayer ------------------------------------------
        xn = _layer_norm(x, ln2g_ref[l], ln2b_ref[l])
        h1 = jnp.dot(xn, w1_ref[l], preferred_element_type=f32) + b1_ref[l]
        h1 = jax.nn.gelu(h1, approximate=True)
        x = x + jnp.dot(h1, w2_ref[l], preferred_element_type=f32) + b2_ref[l]

    o_ref[...] = x.astype(o_ref.dtype)


# ------------------------------ glue (plain JAX) -------------------------------
def patchify(img):
    # 'b c (h p1) (w p2) -> b (h w) (p1 p2 c)'
    b, c, H, W = img.shape
    p = PATCH_SIZE
    h, w = H // p, W // p
    x = img.reshape(b, c, h, p, w, p)
    x = x.transpose(0, 2, 4, 3, 5, 1)            # b h w p1 p2 c
    return x.reshape(b, h * w, p * p * c)


def pack_params(params, batch):
    """One-time (outside jit) re-packing of weights into kernel-ready layout."""
    # Fold cls token, positional embedding and patch bias into one additive slab.
    pos = params["pos_emb"].reshape(N_TOKENS, DIM)
    cls_row = params["cls_token"].reshape(1, DIM)
    tok_add = pos + params["patch_b"]
    tok_add = tok_add.at[0:1].set(pos[0:1] + cls_row)              # (N, DIM)
    tok_add = jnp.tile(tok_add, (batch, 1))                        # (B*N, DIM)

    # Single dense QKV weight; softmax scale folded into the Q columns.
    wqkv = params["attn_wqkv"]                                     # (DIM, 3*INNER)
    wqkv = jnp.concatenate([wqkv[:, :INNER_DIM] * SCALE, wqkv[:, INNER_DIM:]], axis=1)

    # Per-head lane masks (0/1) and block-diagonal batch-isolation bias.
    hmask = np.zeros((HEADS, 1, INNER_DIM), np.float32)
    for h in range(HEADS):
        hmask[h, 0, h * DIM_HEAD:(h + 1) * DIM_HEAD] = 1.0
    same = np.kron(np.eye(batch, dtype=np.float32),
                   np.ones((N_TOKENS, N_TOKENS), np.float32))
    abias = np.where(same > 0.0, 0.0, NEG_BIG).astype(np.float32)  # (B*N, B*N)

    stack = lambda key: jnp.stack([blk[key] for blk in params["blocks"]], axis=0)
    return {
        "patch_w": params["patch_w"],
        "tok_add": tok_add,
        "wqkv": wqkv,
        "wout": params["attn_wout"],
        "bout": params["attn_bout"],
        "hmask": jnp.asarray(hmask),
        "abias": jnp.asarray(abias),
        "ln1_g": stack("ln1_g"), "ln1_b": stack("ln1_b"),
        "ln2_g": stack("ln2_g"), "ln2_b": stack("ln2_b"),
        "w1": stack("w1"), "b1": stack("b1"),
        "w2": stack("w2"), "b2": stack("b2"),
    }


def vit_forward(packed, img):
    """Jitted forward: patchify + one grid-free pallas_call."""
    b = img.shape[0]
    # Row 0 of each batch is a zero "virtual patch" for the cls token.
    patches = jnp.pad(patchify(img), ((0, 0), (1, 0), (0, 0)))     # (b, N, PATCH_DIM)
    patches = patches.reshape(b * N_TOKENS, PATCH_DIM)             # batch folded

    R = b * N_TOKENS
    flops = 2 * R * PATCH_DIM * DIM + NO_OF_BLOCKS * (
        2 * R * DIM * 3 * INNER_DIM
        + HEADS * 2 * R * R * DIM
        + HEADS * 2 * R * R * INNER_DIM
        + 2 * R * INNER_DIM * DIM
        + 2 * (2 * R * DIM * MLP_DIM))
    param_elems = sum(int(v.size) for v in packed.values())
    cost = pl.CostEstimate(
        flops=int(flops),
        transcendentals=int(NO_OF_BLOCKS * (HEADS * R * R + R * MLP_DIM)),
        bytes_accessed=int(4 * (R * PATCH_DIM + R * DIM + param_elems)),
    )

    vmem = pl.BlockSpec(memory_space=pltpu.MemorySpace.VMEM)       # whole-array, resident
    out = pl.pallas_call(
        vit_fused_kernel,
        out_shape=jax.ShapeDtypeStruct((R, DIM), jnp.float32),
        in_specs=[vmem] * 16,
        out_specs=vmem,
        cost_estimate=cost,
    )(patches, packed["patch_w"], packed["tok_add"], packed["wqkv"],
      packed["wout"], packed["bout"], packed["hmask"], packed["abias"],
      packed["ln1_g"], packed["ln1_b"], packed["ln2_g"], packed["ln2_b"],
      packed["w1"], packed["b1"], packed["w2"], packed["b2"])
    return out.reshape(b, N_TOKENS, DIM)


# --------------------------- pure-JAX reference -------------------------------
def vit_forward_ref(params, img):
    hi = jax.lax.Precision.HIGHEST
    b = img.shape[0]
    x = patchify(img)
    x = jnp.dot(x, params["patch_w"], precision=hi) + params["patch_b"]
    cls = jnp.broadcast_to(params["cls_token"], (b, 1, DIM))
    x = jnp.concatenate([cls, x], axis=1) + params["pos_emb"][:, :N_TOKENS]

    def ln(x, g, b_):
        m = jnp.mean(x, axis=-1, keepdims=True)
        v = jnp.mean((x - m) ** 2, axis=-1, keepdims=True)
        return (x - m) * jax.lax.rsqrt(v + LN_EPS) * g + b_

    def attn(x):
        qkv = jnp.dot(x, params["attn_wqkv"], precision=hi)
        q, k, v = jnp.split(qkv, 3, axis=-1)
        def sp(t):  # b n (h d) -> b h n d
            return t.reshape(b, N_TOKENS, HEADS, DIM_HEAD).transpose(0, 2, 1, 3)
        q, k, v = sp(q), sp(k), sp(v)
        dots = jnp.einsum("bhid,bhjd->bhij", q, k, precision=hi) * SCALE
        a = jax.nn.softmax(dots, axis=-1)
        o = jnp.einsum("bhij,bhjd->bhid", a, v, precision=hi)
        o = o.transpose(0, 2, 1, 3).reshape(b, N_TOKENS, INNER_DIM)
        return jnp.dot(o, params["attn_wout"], precision=hi) + params["attn_bout"]

    for blk in params["blocks"]:
        x = x + attn(ln(x, blk["ln1_g"], blk["ln1_b"]))
        h = jnp.dot(ln(x, blk["ln2_g"], blk["ln2_b"]), blk["w1"], precision=hi) + blk["b1"]
        h = jax.nn.gelu(h, approximate=True)
        x = x + jnp.dot(h, blk["w2"], precision=hi) + blk["b2"]
    return x


# ------------------------------- parameters -----------------------------------
def init_params(key):
    ks = iter(jax.random.split(key, 32))
    nrm = lambda shape, s=0.02: (s * jax.random.normal(next(ks), shape)).astype(jnp.float32)
    params = {
        "patch_w": nrm((PATCH_DIM, DIM)),
        "patch_b": jnp.zeros((1, DIM), jnp.float32),
        "pos_emb": jax.random.normal(next(ks), (1, N_TOKENS, DIM)).astype(jnp.float32),
        "cls_token": jax.random.normal(next(ks), (1, 1, DIM)).astype(jnp.float32),
        # single Attention instance shared across blocks (as in ViT.__init__)
        "attn_wqkv": nrm((DIM, 3 * INNER_DIM)),
        "attn_wout": nrm((INNER_DIM, DIM)),
        "attn_bout": jnp.zeros((1, DIM), jnp.float32),
        "blocks": [],
    }
    for _ in range(NO_OF_BLOCKS):
        params["blocks"].append({
            "ln1_g": jnp.ones((1, DIM), jnp.float32),
            "ln1_b": jnp.zeros((1, DIM), jnp.float32),
            "ln2_g": jnp.ones((1, DIM), jnp.float32),
            "ln2_b": jnp.zeros((1, DIM), jnp.float32),
            "w1": nrm((DIM, MLP_DIM)),
            "b1": jnp.zeros((1, MLP_DIM), jnp.float32),
            "w2": nrm((MLP_DIM, DIM)),
            "b2": jnp.zeros((1, DIM), jnp.float32),
        })
    return params


# ---------------------------------- main ---------------------------------------
if __name__ == "__main__":
    key = jax.random.PRNGKey(0)
    k_params, k_x = jax.random.split(key)
    params = init_params(k_params)
    x = jax.random.normal(k_x, (BATCH, CHANNELS, IMAGE_SIZE, IMAGE_SIZE), jnp.float32)

    packed = pack_params(params, BATCH)          # one-time repack, outside jit

    fwd = jax.jit(vit_forward)
    out = jax.block_until_ready(fwd(packed, x))

    ref = jax.block_until_ready(vit_forward_ref(params, x))
    assert out.shape == (BATCH, N_TOKENS, DIM), out.shape
    assert jnp.allclose(out, ref, atol=1e-2, rtol=1e-2), float(jnp.max(jnp.abs(out - ref)))

    print("KERNEL_OK")
</pallas_src>

<mosaic_0001>
module attributes {stable_mosaic.version = 11 : i64} {
  func.func @vit_fused_kernel(%arg0: memref<34x48xf32, #tpu.memory_space<vmem>>, %arg1: memref<48x32xf32, #tpu.memory_space<vmem>>, %arg2: memref<34x32xf32, #tpu.memory_space<vmem>>, %arg3: memref<32x96xf32, #tpu.memory_space<vmem>>, %arg4: memref<32x32xf32, #tpu.memory_space<vmem>>, %arg5: memref<1x32xf32, #tpu.memory_space<vmem>>, %arg6: memref<4x1x32xf32, #tpu.memory_space<vmem>>, %arg7: memref<34x34xf32, #tpu.memory_space<vmem>>, %arg8: memref<2x1x32xf32, #tpu.memory_space<vmem>>, %arg9: memref<2x1x32xf32, #tpu.memory_space<vmem>>, %arg10: memref<2x1x32xf32, #tpu.memory_space<vmem>>, %arg11: memref<2x1x32xf32, #tpu.memory_space<vmem>>, %arg12: memref<2x32x64xf32, #tpu.memory_space<vmem>>, %arg13: memref<2x1x64xf32, #tpu.memory_space<vmem>>, %arg14: memref<2x64x32xf32, #tpu.memory_space<vmem>>, %arg15: memref<2x1x32xf32, #tpu.memory_space<vmem>>, %arg16: memref<34x32xf32, #tpu.memory_space<vmem>>) attributes {dimension_semantics = [], scalar_prefetch = 0 : i64, scratch_operands = 0 : i64, tpu.core_type = #tpu.core_type<tc>} {
    %c0 = arith.constant 0 : index
    %c0_0 = arith.constant 0 : index
    %0 = vector.load %arg0[%c0, %c0_0] : memref<34x48xf32, #tpu.memory_space<vmem>>, vector<34x48xf32>
    %c0_1 = arith.constant 0 : index
    %c0_2 = arith.constant 0 : index
    %1 = vector.load %arg1[%c0_1, %c0_2] : memref<48x32xf32, #tpu.memory_space<vmem>>, vector<48x32xf32>
    %cst = arith.constant dense<0.000000e+00> : vector<34x32xf32>
    %2 = tpu.matmul %0, %1, %cst {dimension_numbers = #tpu.dot_dimension_numbers<[1], [0], [0], [1], [0, 0, 1, 1], [], []>} : vector<34x48xf32>, vector<48x32xf32>, vector<34x32xf32> -> vector<34x32xf32>
    %c0_3 = arith.constant 0 : index
    %c0_4 = arith.constant 0 : index
    %3 = vector.load %arg2[%c0_3, %c0_4] : memref<34x32xf32, #tpu.memory_space<vmem>>, vector<34x32xf32>
    %4 = arith.addf %2, %3 : vector<34x32xf32>
    %c0_5 = arith.constant 0 : index
    %c0_6 = arith.constant 0 : index
    %5 = vector.load %arg3[%c0_5, %c0_6] : memref<32x96xf32, #tpu.memory_space<vmem>>, vector<32x96xf32>
    %c0_7 = arith.constant 0 : index
    %c0_8 = arith.constant 0 : index
    %6 = vector.load %arg4[%c0_7, %c0_8] : memref<32x32xf32, #tpu.memory_space<vmem>>, vector<32x32xf32>
    %c0_9 = arith.constant 0 : index
    %c0_10 = arith.constant 0 : index
    %7 = vector.load %arg5[%c0_9, %c0_10] : memref<1x32xf32, #tpu.memory_space<vmem>>, vector<1x32xf32>
    %c0_11 = arith.constant 0 : index
    %c0_12 = arith.constant 0 : index
    %8 = vector.load %arg7[%c0_11, %c0_12] : memref<34x34xf32, #tpu.memory_space<vmem>>, vector<34x34xf32>
    %c0_13 = arith.constant 0 : index
    %c0_14 = arith.constant 0 : index
    %c0_15 = arith.constant 0 : index
    %9 = vector.load %arg8[%c0_13, %c0_14, %c0_15] : memref<2x1x32xf32, #tpu.memory_space<vmem>>, vector<1x1x32xf32>
    %10 = vector.shape_cast %9 : vector<1x1x32xf32> to vector<1x32xf32>
    %c0_16 = arith.constant 0 : index
    %c0_17 = arith.constant 0 : index
    %c0_18 = arith.constant 0 : index
    %11 = vector.load %arg9[%c0_16, %c0_17, %c0_18] : memref<2x1x32xf32, #tpu.memory_space<vmem>>, vector<1x1x32xf32>
    %12 = vector.shape_cast %11 : vector<1x1x32xf32> to vector<1x32xf32>
    %cst_19 = arith.constant dense<0.000000e+00> : vector<34xf32>
    %13 = vector.multi_reduction <add>, %4, %cst_19 [1] : vector<34x32xf32> to vector<34xf32>
    %14 = vector.shape_cast %13 : vector<34xf32> to vector<34x1xf32>
    %cst_20 = arith.constant 3.200000e+01 : f32
    %15 = vector.broadcast %cst_20 : f32 to vector<34x1xf32>
    %16 = arith.divf %14, %15 : vector<34x1xf32>
    %17 = vector.broadcast %16 : vector<34x1xf32> to vector<34x32xf32>
    %18 = arith.subf %4, %17 : vector<34x32xf32>
    %19 = arith.mulf %18, %18 : vector<34x32xf32>
    %cst_21 = arith.constant dense<0.000000e+00> : vector<34xf32>
    %20 = vector.multi_reduction <add>, %19, %cst_21 [1] : vector<34x32xf32> to vector<34xf32>
    %21 = vector.shape_cast %20 : vector<34xf32> to vector<34x1xf32>
    %cst_22 = arith.constant 3.200000e+01 : f32
    %22 = vector.broadcast %cst_22 : f32 to vector<34x1xf32>
    %23 = arith.divf %21, %22 : vector<34x1xf32>
    %24 = vector.broadcast %16 : vector<34x1xf32> to vector<34x32xf32>
    %25 = arith.subf %4, %24 : vector<34x32xf32>
    %cst_23 = arith.constant 9.99999974E-6 : f32
    %26 = vector.broadcast %cst_23 : f32 to vector<34x1xf32>
    %27 = arith.addf %23, %26 : vector<34x1xf32>
    %28 = math.rsqrt %27 : vector<34x1xf32>
    %29 = vector.broadcast %28 : vector<34x1xf32> to vector<34x32xf32>
    %30 = arith.mulf %25, %29 : vector<34x32xf32>
    %31 = vector.broadcast %10 : vector<1x32xf32> to vector<34x32xf32>
    %32 = arith.mulf %30, %31 : vector<34x32xf32>
    %33 = vector.broadcast %12 : vector<1x32xf32> to vector<34x32xf32>
    %34 = arith.addf %32, %33 : vector<34x32xf32>
    %cst_24 = arith.constant dense<0.000000e+00> : vector<34x96xf32>
    %35 = tpu.matmul %34, %5, %cst_24 {dimension_numbers = #tpu.dot_dimension_numbers<[1], [0], [0], [1], [0, 0, 1, 1], [], []>} : vector<34x32xf32>, vector<32x96xf32>, vector<34x96xf32> -> vector<34x96xf32>
    %36 = vector.extract_strided_slice %35 {offsets = [0, 0], sizes = [34, 32], strides = [1, 1]} : vector<34x96xf32> to vector<34x32xf32>
    %37 = vector.extract_strided_slice %35 {offsets = [0, 32], sizes = [34, 32], strides = [1, 1]} : vector<34x96xf32> to vector<34x32xf32>
    %38 = vector.extract_strided_slice %35 {offsets = [0, 64], sizes = [34, 32], strides = [1, 1]} : vector<34x96xf32> to vector<34x32xf32>
    %c0_25 = arith.constant 0 : index
    %c0_26 = arith.constant 0 : index
    %c0_27 = arith.constant 0 : index
    %39 = vector.load %arg6[%c0_25, %c0_26, %c0_27] : memref<4x1x32xf32, #tpu.memory_space<vmem>>, vector<1x1x32xf32>
    %40 = vector.shape_cast %39 : vector<1x1x32xf32> to vector<1x32xf32>
    %41 = vector.broadcast %40 : vector<1x32xf32> to vector<34x32xf32>
    %42 = arith.mulf %36, %41 : vector<34x32xf32>
    %cst_28 = arith.constant dense<0.000000e+00> : vector<34x34xf32>
    %43 = tpu.matmul %42, %37, %cst_28 {dimension_numbers = #tpu.dot_dimension_numbers<[1], [1], [0], [0], [0, 0, 1, 0], [], []>} : vector<34x32xf32>, vector<34x32xf32>, vector<34x34xf32> -> vector<34x34xf32>
    %44 = arith.addf %43, %8 : vector<34x34xf32>
    %cst_29 = arith.constant dense<0xFF800000> : vector<34xf32>
    %45 = vector.multi_reduction <maximumf>, %44, %cst_29 [1] : vector<34x34xf32> to vector<34xf32>
    %46 = vector.shape_cast %45 : vector<34xf32> to vector<34x1xf32>
    %47 = vector.broadcast %46 : vector<34x1xf32> to vector<34x34xf32>
    %48 = arith.subf %44, %47 : vector<34x34xf32>
    %49 = math.exp %48 : vector<34x34xf32>
    %cst_30 = arith.constant dense<0.000000e+00> : vector<34xf32>
    %50 = vector.multi_reduction <add>, %49, %cst_30 [1] : vector<34x34xf32> to vector<34xf32>
    %51 = vector.shape_cast %50 : vector<34xf32> to vector<34x1xf32>
    %52 = tpu.reciprocal %51 {approx = true} : vector<34x1xf32> -> vector<34x1xf32>
    %53 = vector.broadcast %52 : vector<34x1xf32> to vector<34x34xf32>
    %54 = arith.mulf %49, %53 : vector<34x34xf32>
    %55 = vector.broadcast %40 : vector<1x32xf32> to vector<34x32xf32>
    %56 = arith.mulf %38, %55 : vector<34x32xf32>
    %cst_31 = arith.constant dense<0.000000e+00> : vector<34x32xf32>
    %57 = tpu.matmul %54, %56, %cst_31 {dimension_numbers = #tpu.dot_dimension_numbers<[1], [0], [0], [1], [0, 0, 1, 1], [], []>} : vector<34x34xf32>, vector<34x32xf32>, vector<34x32xf32> -> vector<34x32xf32>
    %c1 = arith.constant 1 : index
    %c0_32 = arith.constant 0 : index
    %c0_33 = arith.constant 0 : index
    %58 = vector.load %arg6[%c1, %c0_32, %c0_33] : memref<4x1x32xf32, #tpu.memory_space<vmem>>, vector<1x1x32xf32>
    %59 = vector.shape_cast %58 : vector<1x1x32xf32> to vector<1x32xf32>
    %60 = vector.broadcast %59 : vector<1x32xf32> to vector<34x32xf32>
    %61 = arith.mulf %36, %60 : vector<34x32xf32>
    %cst_34 = arith.constant dense<0.000000e+00> : vector<34x34xf32>
    %62 = tpu.matmul %61, %37, %cst_34 {dimension_numbers = #tpu.dot_dimension_numbers<[1], [1], [0], [0], [0, 0, 1, 0], [], []>} : vector<34x32xf32>, vector<34x32xf32>, vector<34x34xf32> -> vector<34x34xf32>
    %63 = arith.addf %62, %8 : vector<34x34xf32>
    %cst_35 = arith.constant dense<0xFF800000> : vector<34xf32>
    %64 = vector.multi_reduction <maximumf>, %63, %cst_35 [1] : vector<34x34xf32> to vector<34xf32>
    %65 = vector.shape_cast %64 : vector<34xf32> to vector<34x1xf32>
    %66 = vector.broadcast %65 : vector<34x1xf32> to vector<34x34xf32>
    %67 = arith.subf %63, %66 : vector<34x34xf32>
    %68 = math.exp %67 : vector<34x34xf32>
    %cst_36 = arith.constant dense<0.000000e+00> : vector<34xf32>
    %69 = vector.multi_reduction <add>, %68, %cst_36 [1] : vector<34x34xf32> to vector<34xf32>
    %70 = vector.shape_cast %69 : vector<34xf32> to vector<34x1xf32>
    %71 = tpu.reciprocal %70 {approx = true} : vector<34x1xf32> -> vector<34x1xf32>
    %72 = vector.broadcast %71 : vector<34x1xf32> to vector<34x34xf32>
    %73 = arith.mulf %68, %72 : vector<34x34xf32>
    %74 = vector.broadcast %59 : vector<1x32xf32> to vector<34x32xf32>
    %75 = arith.mulf %38, %74 : vector<34x32xf32>
    %cst_37 = arith.constant dense<0.000000e+00> : vector<34x32xf32>
    %76 = tpu.matmul %73, %75, %cst_37 {dimension_numbers = #tpu.dot_dimension_numbers<[1], [0], [0], [1], [0, 0, 1, 1], [], []>} : vector<34x34xf32>, vector<34x32xf32>, vector<34x32xf32> -> vector<34x32xf32>
    %77 = arith.addf %57, %76 : vector<34x32xf32>
    %c2 = arith.constant 2 : index
    %c0_38 = arith.constant 0 : index
    %c0_39 = arith.constant 0 : index
    %78 = vector.load %arg6[%c2, %c0_38, %c0_39] : memref<4x1x32xf32, #tpu.memory_space<vmem>>, vector<1x1x32xf32>
    %79 = vector.shape_cast %78 : vector<1x1x32xf32> to vector<1x32xf32>
    %80 = vector.broadcast %79 : vector<1x32xf32> to vector<34x32xf32>
    %81 = arith.mulf %36, %80 : vector<34x32xf32>
    %cst_40 = arith.constant dense<0.000000e+00> : vector<34x34xf32>
    %82 = tpu.matmul %81, %37, %cst_40 {dimension_numbers = #tpu.dot_dimension_numbers<[1], [1], [0], [0], [0, 0, 1, 0], [], []>} : vector<34x32xf32>, vector<34x32xf32>, vector<34x34xf32> -> vector<34x34xf32>
    %83 = arith.addf %82, %8 : vector<34x34xf32>
    %cst_41 = arith.constant dense<0xFF800000> : vector<34xf32>
    %84 = vector.multi_reduction <maximumf>, %83, %cst_41 [1] : vector<34x34xf32> to vector<34xf32>
    %85 = vector.shape_cast %84 : vector<34xf32> to vector<34x1xf32>
    %86 = vector.broadcast %85 : vector<34x1xf32> to vector<34x34xf32>
    %87 = arith.subf %83, %86 : vector<34x34xf32>
    %88 = math.exp %87 : vector<34x34xf32>
    %cst_42 = arith.constant dense<0.000000e+00> : vector<34xf32>
    %89 = vector.multi_reduction <add>, %88, %cst_42 [1] : vector<34x34xf32> to vector<34xf32>
    %90 = vector.shape_cast %89 : vector<34xf32> to vector<34x1xf32>
    %91 = tpu.reciprocal %90 {approx = true} : vector<34x1xf32> -> vector<34x1xf32>
    %92 = vector.broadcast %91 : vector<34x1xf32> to vector<34x34xf32>
    %93 = arith.mulf %88, %92 : vector<34x34xf32>
    %94 = vector.broadcast %79 : vector<1x32xf32> to vector<34x32xf32>
    %95 = arith.mulf %38, %94 : vector<34x32xf32>
    %cst_43 = arith.constant dense<0.000000e+00> : vector<34x32xf32>
    %96 = tpu.matmul %93, %95, %cst_43 {dimension_numbers = #tpu.dot_dimension_numbers<[1], [0], [0], [1], [0, 0, 1, 1], [], []>} : vector<34x34xf32>, vector<34x32xf32>, vector<34x32xf32> -> vector<34x32xf32>
    %97 = arith.addf %77, %96 : vector<34x32xf32>
    %c3 = arith.constant 3 : index
    %c0_44 = arith.constant 0 : index
    %c0_45 = arith.constant 0 : index
    %98 = vector.load %arg6[%c3, %c0_44, %c0_45] : memref<4x1x32xf32, #tpu.memory_space<vmem>>, vector<1x1x32xf32>
    %99 = vector.shape_cast %98 : vector<1x1x32xf32> to vector<1x32xf32>
    %100 = vector.broadcast %99 : vector<1x32xf32> to vector<34x32xf32>
    %101 = arith.mulf %36, %100 : vector<34x32xf32>
    %cst_46 = arith.constant dense<0.000000e+00> : vector<34x34xf32>
    %102 = tpu.matmul %101, %37, %cst_46 {dimension_numbers = #tpu.dot_dimension_numbers<[1], [1], [0], [0], [0, 0, 1, 0], [], []>} : vector<34x32xf32>, vector<34x32xf32>, vector<34x34xf32> -> vector<34x34xf32>
    %103 = arith.addf %102, %8 : vector<34x34xf32>
    %cst_47 = arith.constant dense<0xFF800000> : vector<34xf32>
    %104 = vector.multi_reduction <maximumf>, %103, %cst_47 [1] : vector<34x34xf32> to vector<34xf32>
    %105 = vector.shape_cast %104 : vector<34xf32> to vector<34x1xf32>
    %106 = vector.broadcast %105 : vector<34x1xf32> to vector<34x34xf32>
    %107 = arith.subf %103, %106 : vector<34x34xf32>
    %108 = math.exp %107 : vector<34x34xf32>
    %cst_48 = arith.constant dense<0.000000e+00> : vector<34xf32>
    %109 = vector.multi_reduction <add>, %108, %cst_48 [1] : vector<34x34xf32> to vector<34xf32>
    %110 = vector.shape_cast %109 : vector<34xf32> to vector<34x1xf32>
    %111 = tpu.reciprocal %110 {approx = true} : vector<34x1xf32> -> vector<34x1xf32>
    %112 = vector.broadcast %111 : vector<34x1xf32> to vector<34x34xf32>
    %113 = arith.mulf %108, %112 : vector<34x34xf32>
    %114 = vector.broadcast %99 : vector<1x32xf32> to vector<34x32xf32>
    %115 = arith.mulf %38, %114 : vector<34x32xf32>
    %cst_49 = arith.constant dense<0.000000e+00> : vector<34x32xf32>
    %116 = tpu.matmul %113, %115, %cst_49 {dimension_numbers = #tpu.dot_dimension_numbers<[1], [0], [0], [1], [0, 0, 1, 1], [], []>} : vector<34x34xf32>, vector<34x32xf32>, vector<34x32xf32> -> vector<34x32xf32>
    %117 = arith.addf %97, %116 : vector<34x32xf32>
    %cst_50 = arith.constant dense<0.000000e+00> : vector<34x32xf32>
    %118 = tpu.matmul %117, %6, %cst_50 {dimension_numbers = #tpu.dot_dimension_numbers<[1], [0], [0], [1], [0, 0, 1, 1], [], []>} : vector<34x32xf32>, vector<32x32xf32>, vector<34x32xf32> -> vector<34x32xf32>
    %119 = arith.addf %4, %118 : vector<34x32xf32>
    %120 = vector.broadcast %7 : vector<1x32xf32> to vector<34x32xf32>
    %121 = arith.addf %119, %120 : vector<34x32xf32>
    %c0_51 = arith.constant 0 : index
    %c0_52 = arith.constant 0 : index
    %c0_53 = arith.constant 0 : index
    %122 = vector.load %arg10[%c0_51, %c0_52, %c0_53] : memref<2x1x32xf32, #tpu.memory_space<vmem>>, vector<1x1x32xf32>
    %123 = vector.shape_cast %122 : vector<1x1x32xf32> to vector<1x32xf32>
    %c0_54 = arith.constant 0 : index
    %c0_55 = arith.constant 0 : index
    %c0_56 = arith.constant 0 : index
    %124 = vector.load %arg11[%c0_54, %c0_55, %c0_56] : memref<2x1x32xf32, #tpu.memory_space<vmem>>, vector<1x1x32xf32>
    %125 = vector.shape_cast %124 : vector<1x1x32xf32> to vector<1x32xf32>
    %cst_57 = arith.constant dense<0.000000e+00> : vector<34xf32>
    %126 = vector.multi_reduction <add>, %121, %cst_57 [1] : vector<34x32xf32> to vector<34xf32>
    %127 = vector.shape_cast %126 : vector<34xf32> to vector<34x1xf32>
    %cst_58 = arith.constant 3.200000e+01 : f32
    %128 = vector.broadcast %cst_58 : f32 to vector<34x1xf32>
    %129 = arith.divf %127, %128 : vector<34x1xf32>
    %130 = vector.broadcast %129 : vector<34x1xf32> to vector<34x32xf32>
    %131 = arith.subf %121, %130 : vector<34x32xf32>
    %132 = arith.mulf %131, %131 : vector<34x32xf32>
    %cst_59 = arith.constant dense<0.000000e+00> : vector<34xf32>
    %133 = vector.multi_reduction <add>, %132, %cst_59 [1] : vector<34x32xf32> to vector<34xf32>
    %134 = vector.shape_cast %133 : vector<34xf32> to vector<34x1xf32>
    %cst_60 = arith.constant 3.200000e+01 : f32
    %135 = vector.broadcast %cst_60 : f32 to vector<34x1xf32>
    %136 = arith.divf %134, %135 : vector<34x1xf32>
    %137 = vector.broadcast %129 : vector<34x1xf32> to vector<34x32xf32>
    %138 = arith.subf %121, %137 : vector<34x32xf32>
    %cst_61 = arith.constant 9.99999974E-6 : f32
    %139 = vector.broadcast %cst_61 : f32 to vector<34x1xf32>
    %140 = arith.addf %136, %139 : vector<34x1xf32>
    %141 = math.rsqrt %140 : vector<34x1xf32>
    %142 = vector.broadcast %141 : vector<34x1xf32> to vector<34x32xf32>
    %143 = arith.mulf %138, %142 : vector<34x32xf32>
    %144 = vector.broadcast %123 : vector<1x32xf32> to vector<34x32xf32>
    %145 = arith.mulf %143, %144 : vector<34x32xf32>
    %146 = vector.broadcast %125 : vector<1x32xf32> to vector<34x32xf32>
    %147 = arith.addf %145, %146 : vector<34x32xf32>
    %c0_62 = arith.constant 0 : index
    %c0_63 = arith.constant 0 : index
    %c0_64 = arith.constant 0 : index
    %148 = vector.load %arg12[%c0_62, %c0_63, %c0_64] : memref<2x32x64xf32, #tpu.memory_space<vmem>>, vector<1x32x64xf32>
    %149 = vector.shape_cast %148 : vector<1x32x64xf32> to vector<32x64xf32>
    %cst_65 = arith.constant dense<0.000000e+00> : vector<34x64xf32>
    %150 = tpu.matmul %147, %149, %cst_65 {dimension_numbers = #tpu.dot_dimension_numbers<[1], [0], [0], [1], [0, 0, 1, 1], [], []>} : vector<34x32xf32>, vector<32x64xf32>, vector<34x64xf32> -> vector<34x64xf32>
    %c0_66 = arith.constant 0 : index
    %c0_67 = arith.constant 0 : index
    %c0_68 = arith.constant 0 : index
    %151 = vector.load %arg13[%c0_66, %c0_67, %c0_68] : memref<2x1x64xf32, #tpu.memory_space<vmem>>, vector<1x1x64xf32>
    %152 = vector.shape_cast %151 : vector<1x1x64xf32> to vector<1x64xf32>
    %153 = vector.broadcast %152 : vector<1x64xf32> to vector<34x64xf32>
    %154 = arith.addf %150, %153 : vector<34x64xf32>
    %155 = arith.mulf %154, %154 : vector<34x64xf32>
    %156 = arith.mulf %154, %155 : vector<34x64xf32>
    %cst_69 = arith.constant 4.471500e-02 : f32
    %157 = vector.broadcast %cst_69 : f32 to vector<34x64xf32>
    %158 = arith.mulf %157, %156 : vector<34x64xf32>
    %159 = arith.addf %154, %158 : vector<34x64xf32>
    %cst_70 = arith.constant 0.797884583 : f32
    %160 = vector.broadcast %cst_70 : f32 to vector<34x64xf32>
    %161 = arith.mulf %160, %159 : vector<34x64xf32>
    %162 = math.tanh %161 : vector<34x64xf32>
    %cst_71 = arith.constant 1.000000e+00 : f32
    %163 = vector.broadcast %cst_71 : f32 to vector<34x64xf32>
    %164 = arith.addf %163, %162 : vector<34x64xf32>
    %cst_72 = arith.constant 5.000000e-01 : f32
    %165 = vector.broadcast %cst_72 : f32 to vector<34x64xf32>
    %166 = arith.mulf %165, %164 : vector<34x64xf32>
    %167 = arith.mulf %154, %166 : vector<34x64xf32>
    %c0_73 = arith.constant 0 : index
    %c0_74 = arith.constant 0 : index
    %c0_75 = arith.constant 0 : index
    %168 = vector.load %arg14[%c0_73, %c0_74, %c0_75] : memref<2x64x32xf32, #tpu.memory_space<vmem>>, vector<1x64x32xf32>
    %169 = vector.shape_cast %168 : vector<1x64x32xf32> to vector<64x32xf32>
    %cst_76 = arith.constant dense<0.000000e+00> : vector<34x32xf32>
    %170 = tpu.matmul %167, %169, %cst_76 {dimension_numbers = #tpu.dot_dimension_numbers<[1], [0], [0], [1], [0, 0, 1, 1], [], []>} : vector<34x64xf32>, vector<64x32xf32>, vector<34x32xf32> -> vector<34x32xf32>
    %171 = arith.addf %121, %170 : vector<34x32xf32>
    %c0_77 = arith.constant 0 : index
    %c0_78 = arith.constant 0 : index
    %c0_79 = arith.constant 0 : index
    %172 = vector.load %arg15[%c0_77, %c0_78, %c0_79] : memref<2x1x32xf32, #tpu.memory_space<vmem>>, vector<1x1x32xf32>
    %173 = vector.shape_cast %172 : vector<1x1x32xf32> to vector<1x32xf32>
    %174 = vector.broadcast %173 : vector<1x32xf32> to vector<34x32xf32>
    %175 = arith.addf %171, %174 : vector<34x32xf32>
    %c1_80 = arith.constant 1 : index
    %c0_81 = arith.constant 0 : index
    %c0_82 = arith.constant 0 : index
    %176 = vector.load %arg8[%c1_80, %c0_81, %c0_82] : memref<2x1x32xf32, #tpu.memory_space<vmem>>, vector<1x1x32xf32>
    %177 = vector.shape_cast %176 : vector<1x1x32xf32> to vector<1x32xf32>
    %c1_83 = arith.constant 1 : index
    %c0_84 = arith.constant 0 : index
    %c0_85 = arith.constant 0 : index
    %178 = vector.load %arg9[%c1_83, %c0_84, %c0_85] : memref<2x1x32xf32, #tpu.memory_space<vmem>>, vector<1x1x32xf32>
    %179 = vector.shape_cast %178 : vector<1x1x32xf32> to vector<1x32xf32>
    %cst_86 = arith.constant dense<0.000000e+00> : vector<34xf32>
    %180 = vector.multi_reduction <add>, %175, %cst_86 [1] : vector<34x32xf32> to vector<34xf32>
    %181 = vector.shape_cast %180 : vector<34xf32> to vector<34x1xf32>
    %cst_87 = arith.constant 3.200000e+01 : f32
    %182 = vector.broadcast %cst_87 : f32 to vector<34x1xf32>
    %183 = arith.divf %181, %182 : vector<34x1xf32>
    %184 = vector.broadcast %183 : vector<34x1xf32> to vector<34x32xf32>
    %185 = arith.subf %175, %184 : vector<34x32xf32>
    %186 = arith.mulf %185, %185 : vector<34x32xf32>
    %cst_88 = arith.constant dense<0.000000e+00> : vector<34xf32>
    %187 = vector.multi_reduction <add>, %186, %cst_88 [1] : vector<34x32xf32> to vector<34xf32>
    %188 = vector.shape_cast %187 : vector<34xf32> to vector<34x1xf32>
    %cst_89 = arith.constant 3.200000e+01 : f32
    %189 = vector.broadcast %cst_89 : f32 to vector<34x1xf32>
    %190 = arith.divf %188, %189 : vector<34x1xf32>
    %191 = vector.broadcast %183 : vector<34x1xf32> to vector<34x32xf32>
    %192 = arith.subf %175, %191 : vector<34x32xf32>
    %cst_90 = arith.constant 9.99999974E-6 : f32
    %193 = vector.broadcast %cst_90 : f32 to vector<34x1xf32>
    %194 = arith.addf %190, %193 : vector<34x1xf32>
    %195 = math.rsqrt %194 : vector<34x1xf32>
    %196 = vector.broadcast %195 : vector<34x1xf32> to vector<34x32xf32>
    %197 = arith.mulf %192, %196 : vector<34x32xf32>
    %198 = vector.broadcast %177 : vector<1x32xf32> to vector<34x32xf32>
    %199 = arith.mulf %197, %198 : vector<34x32xf32>
    %200 = vector.broadcast %179 : vector<1x32xf32> to vector<34x32xf32>
    %201 = arith.addf %199, %200 : vector<34x32xf32>
    %cst_91 = arith.constant dense<0.000000e+00> : vector<34x96xf32>
    %202 = tpu.matmul %201, %5, %cst_91 {dimension_numbers = #tpu.dot_dimension_numbers<[1], [0], [0], [1], [0, 0, 1, 1], [], []>} : vector<34x32xf32>, vector<32x96xf32>, vector<34x96xf32> -> vector<34x96xf32>
    %203 = vector.extract_strided_slice %202 {offsets = [0, 0], sizes = [34, 32], strides = [1, 1]} : vector<34x96xf32> to vector<34x32xf32>
    %204 = vector.extract_strided_slice %202 {offsets = [0, 32], sizes = [34, 32], strides = [1, 1]} : vector<34x96xf32> to vector<34x32xf32>
    %205 = vector.extract_strided_slice %202 {offsets = [0, 64], sizes = [34, 32], strides = [1, 1]} : vector<34x96xf32> to vector<34x32xf32>
    %c0_92 = arith.constant 0 : index
    %c0_93 = arith.constant 0 : index
    %c0_94 = arith.constant 0 : index
    %206 = vector.load %arg6[%c0_92, %c0_93, %c0_94] : memref<4x1x32xf32, #tpu.memory_space<vmem>>, vector<1x1x32xf32>
    %207 = vector.shape_cast %206 : vector<1x1x32xf32> to vector<1x32xf32>
    %208 = vector.broadcast %207 : vector<1x32xf32> to vector<34x32xf32>
    %209 = arith.mulf %203, %208 : vector<34x32xf32>
    %cst_95 = arith.constant dense<0.000000e+00> : vector<34x34xf32>
    %210 = tpu.matmul %209, %204, %cst_95 {dimension_numbers = #tpu.dot_dimension_numbers<[1], [1], [0], [0], [0, 0, 1, 0], [], []>} : vector<34x32xf32>, vector<34x32xf32>, vector<34x34xf32> -> vector<34x34xf32>
    %211 = arith.addf %210, %8 : vector<34x34xf32>
    %cst_96 = arith.constant dense<0xFF800000> : vector<34xf32>
    %212 = vector.multi_reduction <maximumf>, %211, %cst_96 [1] : vector<34x34xf32> to vector<34xf32>
    %213 = vector.shape_cast %212 : vector<34xf32> to vector<34x1xf32>
    %214 = vector.broadcast %213 : vector<34x1xf32> to vector<34x34xf32>
    %215 = arith.subf %211, %214 : vector<34x34xf32>
    %216 = math.exp %215 : vector<34x34xf32>
    %cst_97 = arith.constant dense<0.000000e+00> : vector<34xf32>
    %217 = vector.multi_reduction <add>, %216, %cst_97 [1] : vector<34x34xf32> to vector<34xf32>
    %218 = vector.shape_cast %217 : vector<34xf32> to vector<34x1xf32>
    %219 = tpu.reciprocal %218 {approx = true} : vector<34x1xf32> -> vector<34x1xf32>
    %220 = vector.broadcast %219 : vector<34x1xf32> to vector<34x34xf32>
    %221 = arith.mulf %216, %220 : vector<34x34xf32>
    %222 = vector.broadcast %207 : vector<1x32xf32> to vector<34x32xf32>
    %223 = arith.mulf %205, %222 : vector<34x32xf32>
    %cst_98 = arith.constant dense<0.000000e+00> : vector<34x32xf32>
    %224 = tpu.matmul %221, %223, %cst_98 {dimension_numbers = #tpu.dot_dimension_numbers<[1], [0], [0], [1], [0, 0, 1, 1], [], []>} : vector<34x34xf32>, vector<34x32xf32>, vector<34x32xf32> -> vector<34x32xf32>
    %c1_99 = arith.constant 1 : index
    %c0_100 = arith.constant 0 : index
    %c0_101 = arith.constant 0 : index
    %225 = vector.load %arg6[%c1_99, %c0_100, %c0_101] : memref<4x1x32xf32, #tpu.memory_space<vmem>>, vector<1x1x32xf32>
    %226 = vector.shape_cast %225 : vector<1x1x32xf32> to vector<1x32xf32>
    %227 = vector.broadcast %226 : vector<1x32xf32> to vector<34x32xf32>
    %228 = arith.mulf %203, %227 : vector<34x32xf32>
    %cst_102 = arith.constant dense<0.000000e+00> : vector<34x34xf32>
    %229 = tpu.matmul %228, %204, %cst_102 {dimension_numbers = #tpu.dot_dimension_numbers<[1], [1], [0], [0], [0, 0, 1, 0], [], []>} : vector<34x32xf32>, vector<34x32xf32>, vector<34x34xf32> -> vector<34x34xf32>
    %230 = arith.addf %229, %8 : vector<34x34xf32>
    %cst_103 = arith.constant dense<0xFF800000> : vector<34xf32>
    %231 = vector.multi_reduction <maximumf>, %230, %cst_103 [1] : vector<34x34xf32> to vector<34xf32>
    %232 = vector.shape_cast %231 : vector<34xf32> to vector<34x1xf32>
    %233 = vector.broadcast %232 : vector<34x1xf32> to vector<34x34xf32>
    %234 = arith.subf %230, %233 : vector<34x34xf32>
    %235 = math.exp %234 : vector<34x34xf32>
    %cst_104 = arith.constant dense<0.000000e+00> : vector<34xf32>
    %236 = vector.multi_reduction <add>, %235, %cst_104 [1] : vector<34x34xf32> to vector<34xf32>
    %237 = vector.shape_cast %236 : vector<34xf32> to vector<34x1xf32>
    %238 = tpu.reciprocal %237 {approx = true} : vector<34x1xf32> -> vector<34x1xf32>
    %239 = vector.broadcast %238 : vector<34x1xf32> to vector<34x34xf32>
    %240 = arith.mulf %235, %239 : vector<34x34xf32>
    %241 = vector.broadcast %226 : vector<1x32xf32> to vector<34x32xf32>
    %242 = arith.mulf %205, %241 : vector<34x32xf32>
    %cst_105 = arith.constant dense<0.000000e+00> : vector<34x32xf32>
    %243 = tpu.matmul %240, %242, %cst_105 {dimension_numbers = #tpu.dot_dimension_numbers<[1], [0], [0], [1], [0, 0, 1, 1], [], []>} : vector<34x34xf32>, vector<34x32xf32>, vector<34x32xf32> -> vector<34x32xf32>
    %244 = arith.addf %224, %243 : vector<34x32xf32>
    %c2_106 = arith.constant 2 : index
    %c0_107 = arith.constant 0 : index
    %c0_108 = arith.constant 0 : index
    %245 = vector.load %arg6[%c2_106, %c0_107, %c0_108] : memref<4x1x32xf32, #tpu.memory_space<vmem>>, vector<1x1x32xf32>
    %246 = vector.shape_cast %245 : vector<1x1x32xf32> to vector<1x32xf32>
    %247 = vector.broadcast %246 : vector<1x32xf32> to vector<34x32xf32>
    %248 = arith.mulf %203, %247 : vector<34x32xf32>
    %cst_109 = arith.constant dense<0.000000e+00> : vector<34x34xf32>
    %249 = tpu.matmul %248, %204, %cst_109 {dimension_numbers = #tpu.dot_dimension_numbers<[1], [1], [0], [0], [0, 0, 1, 0], [], []>} : vector<34x32xf32>, vector<34x32xf32>, vector<34x34xf32> -> vector<34x34xf32>
    %250 = arith.addf %249, %8 : vector<34x34xf32>
    %cst_110 = arith.constant dense<0xFF800000> : vector<34xf32>
    %251 = vector.multi_reduction <maximumf>, %250, %cst_110 [1] : vector<34x34xf32> to vector<34xf32>
    %252 = vector.shape_cast %251 : vector<34xf32> to vector<34x1xf32>
    %253 = vector.broadcast %252 : vector<34x1xf32> to vector<34x34xf32>
    %254 = arith.subf %250, %253 : vector<34x34xf32>
    %255 = math.exp %254 : vector<34x34xf32>
    %cst_111 = arith.constant dense<0.000000e+00> : vector<34xf32>
    %256 = vector.multi_reduction <add>, %255, %cst_111 [1] : vector<34x34xf32> to vector<34xf32>
    %257 = vector.shape_cast %256 : vector<34xf32> to vector<34x1xf32>
    %258 = tpu.reciprocal %257 {approx = true} : vector<34x1xf32> -> vector<34x1xf32>
    %259 = vector.broadcast %258 : vector<34x1xf32> to vector<34x34xf32>
    %260 = arith.mulf %255, %259 : vector<34x34xf32>
    %261 = vector.broadcast %246 : vector<1x32xf32> to vector<34x32xf32>
    %262 = arith.mulf %205, %261 : vector<34x32xf32>
    %cst_112 = arith.constant dense<0.000000e+00> : vector<34x32xf32>
    %263 = tpu.matmul %260, %262, %cst_112 {dimension_numbers = #tpu.dot_dimension_numbers<[1], [0], [0], [1], [0, 0, 1, 1], [], []>} : vector<34x34xf32>, vector<34x32xf32>, vector<34x32xf32> -> vector<34x32xf32>
    %264 = arith.addf %244, %263 : vector<34x32xf32>
    %c3_113 = arith.constant 3 : index
    %c0_114 = arith.constant 0 : index
    %c0_115 = arith.constant 0 : index
    %265 = vector.load %arg6[%c3_113, %c0_114, %c0_115] : memref<4x1x32xf32, #tpu.memory_space<vmem>>, vector<1x1x32xf32>
    %266 = vector.shape_cast %265 : vector<1x1x32xf32> to vector<1x32xf32>
    %267 = vector.broadcast %266 : vector<1x32xf32> to vector<34x32xf32>
    %268 = arith.mulf %203, %267 : vector<34x32xf32>
    %cst_116 = arith.constant dense<0.000000e+00> : vector<34x34xf32>
    %269 = tpu.matmul %268, %204, %cst_116 {dimension_numbers = #tpu.dot_dimension_numbers<[1], [1], [0], [0], [0, 0, 1, 0], [], []>} : vector<34x32xf32>, vector<34x32xf32>, vector<34x34xf32> -> vector<34x34xf32>
    %270 = arith.addf %269, %8 : vector<34x34xf32>
    %cst_117 = arith.constant dense<0xFF800000> : vector<34xf32>
    %271 = vector.multi_reduction <maximumf>, %270, %cst_117 [1] : vector<34x34xf32> to vector<34xf32>
    %272 = vector.shape_cast %271 : vector<34xf32> to vector<34x1xf32>
    %273 = vector.broadcast %272 : vector<34x1xf32> to vector<34x34xf32>
    %274 = arith.subf %270, %273 : vector<34x34xf32>
    %275 = math.exp %274 : vector<34x34xf32>
    %cst_118 = arith.constant dense<0.000000e+00> : vector<34xf32>
    %276 = vector.multi_reduction <add>, %275, %cst_118 [1] : vector<34x34xf32> to vector<34xf32>
    %277 = vector.shape_cast %276 : vector<34xf32> to vector<34x1xf32>
    %278 = tpu.reciprocal %277 {approx = true} : vector<34x1xf32> -> vector<34x1xf32>
    %279 = vector.broadcast %278 : vector<34x1xf32> to vector<34x34xf32>
    %280 = arith.mulf %275, %279 : vector<34x34xf32>
    %281 = vector.broadcast %266 : vector<1x32xf32> to vector<34x32xf32>
    %282 = arith.mulf %205, %281 : vector<34x32xf32>
    %cst_119 = arith.constant dense<0.000000e+00> : vector<34x32xf32>
    %283 = tpu.matmul %280, %282, %cst_119 {dimension_numbers = #tpu.dot_dimension_numbers<[1], [0], [0], [1], [0, 0, 1, 1], [], []>} : vector<34x34xf32>, vector<34x32xf32>, vector<34x32xf32> -> vector<34x32xf32>
    %284 = arith.addf %264, %283 : vector<34x32xf32>
    %cst_120 = arith.constant dense<0.000000e+00> : vector<34x32xf32>
    %285 = tpu.matmul %284, %6, %cst_120 {dimension_numbers = #tpu.dot_dimension_numbers<[1], [0], [0], [1], [0, 0, 1, 1], [], []>} : vector<34x32xf32>, vector<32x32xf32>, vector<34x32xf32> -> vector<34x32xf32>
    %286 = arith.addf %175, %285 : vector<34x32xf32>
    %287 = vector.broadcast %7 : vector<1x32xf32> to vector<34x32xf32>
    %288 = arith.addf %286, %287 : vector<34x32xf32>
    %c1_121 = arith.constant 1 : index
    %c0_122 = arith.constant 0 : index
    %c0_123 = arith.constant 0 : index
    %289 = vector.load %arg10[%c1_121, %c0_122, %c0_123] : memref<2x1x32xf32, #tpu.memory_space<vmem>>, vector<1x1x32xf32>
    %290 = vector.shape_cast %289 : vector<1x1x32xf32> to vector<1x32xf32>
    %c1_124 = arith.constant 1 : index
    %c0_125 = arith.constant 0 : index
    %c0_126 = arith.constant 0 : index
    %291 = vector.load %arg11[%c1_124, %c0_125, %c0_126] : memref<2x1x32xf32, #tpu.memory_space<vmem>>, vector<1x1x32xf32>
    %292 = vector.shape_cast %291 : vector<1x1x32xf32> to vector<1x32xf32>
    %cst_127 = arith.constant dense<0.000000e+00> : vector<34xf32>
    %293 = vector.multi_reduction <add>, %288, %cst_127 [1] : vector<34x32xf32> to vector<34xf32>
    %294 = vector.shape_cast %293 : vector<34xf32> to vector<34x1xf32>
    %cst_128 = arith.constant 3.200000e+01 : f32
    %295 = vector.broadcast %cst_128 : f32 to vector<34x1xf32>
    %296 = arith.divf %294, %295 : vector<34x1xf32>
    %297 = vector.broadcast %296 : vector<34x1xf32> to vector<34x32xf32>
    %298 = arith.subf %288, %297 : vector<34x32xf32>
    %299 = arith.mulf %298, %298 : vector<34x32xf32>
    %cst_129 = arith.constant dense<0.000000e+00> : vector<34xf32>
    %300 = vector.multi_reduction <add>, %299, %cst_129 [1] : vector<34x32xf32> to vector<34xf32>
    %301 = vector.shape_cast %300 : vector<34xf32> to vector<34x1xf32>
    %cst_130 = arith.constant 3.200000e+01 : f32
    %302 = vector.broadcast %cst_130 : f32 to vector<34x1xf32>
    %303 = arith.divf %301, %302 : vector<34x1xf32>
    %304 = vector.broadcast %296 : vector<34x1xf32> to vector<34x32xf32>
    %305 = arith.subf %288, %304 : vector<34x32xf32>
    %cst_131 = arith.constant 9.99999974E-6 : f32
    %306 = vector.broadcast %cst_131 : f32 to vector<34x1xf32>
    %307 = arith.addf %303, %306 : vector<34x1xf32>
    %308 = math.rsqrt %307 : vector<34x1xf32>
    %309 = vector.broadcast %308 : vector<34x1xf32> to vector<34x32xf32>
    %310 = arith.mulf %305, %309 : vector<34x32xf32>
    %311 = vector.broadcast %290 : vector<1x32xf32> to vector<34x32xf32>
    %312 = arith.mulf %310, %311 : vector<34x32xf32>
    %313 = vector.broadcast %292 : vector<1x32xf32> to vector<34x32xf32>
    %314 = arith.addf %312, %313 : vector<34x32xf32>
    %c1_132 = arith.constant 1 : index
    %c0_133 = arith.constant 0 : index
    %c0_134 = arith.constant 0 : index
    %315 = vector.load %arg12[%c1_132, %c0_133, %c0_134] : memref<2x32x64xf32, #tpu.memory_space<vmem>>, vector<1x32x64xf32>
    %316 = vector.shape_cast %315 : vector<1x32x64xf32> to vector<32x64xf32>
    %cst_135 = arith.constant dense<0.000000e+00> : vector<34x64xf32>
    %317 = tpu.matmul %314, %316, %cst_135 {dimension_numbers = #tpu.dot_dimension_numbers<[1], [0], [0], [1], [0, 0, 1, 1], [], []>} : vector<34x32xf32>, vector<32x64xf32>, vector<34x64xf32> -> vector<34x64xf32>
    %c1_136 = arith.constant 1 : index
    %c0_137 = arith.constant 0 : index
    %c0_138 = arith.constant 0 : index
    %318 = vector.load %arg13[%c1_136, %c0_137, %c0_138] : memref<2x1x64xf32, #tpu.memory_space<vmem>>, vector<1x1x64xf32>
    %319 = vector.shape_cast %318 : vector<1x1x64xf32> to vector<1x64xf32>
    %320 = vector.broadcast %319 : vector<1x64xf32> to vector<34x64xf32>
    %321 = arith.addf %317, %320 : vector<34x64xf32>
    %322 = arith.mulf %321, %321 : vector<34x64xf32>
    %323 = arith.mulf %321, %322 : vector<34x64xf32>
    %cst_139 = arith.constant 4.471500e-02 : f32
    %324 = vector.broadcast %cst_139 : f32 to vector<34x64xf32>
    %325 = arith.mulf %324, %323 : vector<34x64xf32>
    %326 = arith.addf %321, %325 : vector<34x64xf32>
    %cst_140 = arith.constant 0.797884583 : f32
    %327 = vector.broadcast %cst_140 : f32 to vector<34x64xf32>
    %328 = arith.mulf %327, %326 : vector<34x64xf32>
    %329 = math.tanh %328 : vector<34x64xf32>
    %cst_141 = arith.constant 1.000000e+00 : f32
    %330 = vector.broadcast %cst_141 : f32 to vector<34x64xf32>
    %331 = arith.addf %330, %329 : vector<34x64xf32>
    %cst_142 = arith.constant 5.000000e-01 : f32
    %332 = vector.broadcast %cst_142 : f32 to vector<34x64xf32>
    %333 = arith.mulf %332, %331 : vector<34x64xf32>
    %334 = arith.mulf %321, %333 : vector<34x64xf32>
    %c1_143 = arith.constant 1 : index
    %c0_144 = arith.constant 0 : index
    %c0_145 = arith.constant 0 : index
    %335 = vector.load %arg14[%c1_143, %c0_144, %c0_145] : memref<2x64x32xf32, #tpu.memory_space<vmem>>, vector<1x64x32xf32>
    %336 = vector.shape_cast %335 : vector<1x64x32xf32> to vector<64x32xf32>
    %cst_146 = arith.constant dense<0.000000e+00> : vector<34x32xf32>
    %337 = tpu.matmul %334, %336, %cst_146 {dimension_numbers = #tpu.dot_dimension_numbers<[1], [0], [0], [1], [0, 0, 1, 1], [], []>} : vector<34x64xf32>, vector<64x32xf32>, vector<34x32xf32> -> vector<34x32xf32>
    %338 = arith.addf %288, %337 : vector<34x32xf32>
    %c1_147 = arith.constant 1 : index
    %c0_148 = arith.constant 0 : index
    %c0_149 = arith.constant 0 : index
    %339 = vector.load %arg15[%c1_147, %c0_148, %c0_149] : memref<2x1x32xf32, #tpu.memory_space<vmem>>, vector<1x1x32xf32>
    %340 = vector.shape_cast %339 : vector<1x1x32xf32> to vector<1x32xf32>
    %341 = vector.broadcast %340 : vector<1x32xf32> to vector<34x32xf32>
    %342 = arith.addf %338, %341 : vector<34x32xf32>
    %c0_150 = arith.constant 0 : index
    %c0_151 = arith.constant 0 : index
    %343 = vector.load %arg16[%c0_150, %c0_151] : memref<34x32xf32, #tpu.memory_space<vmem>>, vector<34x32xf32>
    tpu.vector_store %arg16[%c0_150, %c0_151], %342 {strides = array<i32>} : memref<34x32xf32, #tpu.memory_space<vmem>>, vector<34x32xf32>,
    return
  }
}

</mosaic_0001>

<bundles_post_ra>
// kernel: vit_forward.1
= control target key start
LH: loop header
LB: loop body
LE: loop exit
PB: predicated region body
PF: predicated region fallthrough
CT: control target
= control target key end

     0   :  { %vm69_vm0 = vcmask 392192   ;;  %vm133_vm1 = vcmask 261120   ;;  %vm146_vm2 = vcmask 254976   ;;  %v3297_v31 = vmov 32.0   ;;  %s3299_s20 = smov 64   ;;  %s4979_s1 = inlined_call_operand.vmem [shape: f32[48,32], index: 1, kind: input, shape index: {}]   ;;  %s4980_s0 = inlined_call_operand.vmem [shape: f32[34,48], index: 0, kind: input, shape index: {}]   ;;  %s4981_s2 = inlined_call_operand.vmem [shape: f32[34,32], index: 2, kind: input, shape index: {}]   ;;  %s4982_s8 = inlined_call_operand.vmem [shape: f32[2,1,32], index: 8, kind: input, shape index: {}]   ;;  %s4983_s9 = inlined_call_operand.vmem [shape: f32[2,1,32], index: 9, kind: input, shape index: {}]   ;;  %s4984_s3 = inlined_call_operand.vmem [shape: f32[32,96], index: 3, kind: input, shape index: {}]   ;;  %s4985_s6 = inlined_call_operand.vmem [shape: f32[4,1,32], index: 6, kind: input, shape index: {}]   ;;  %s4986_s7 = inlined_call_operand.vmem [shape: f32[34,34], index: 7, kind: input, shape index: {}]   ;;  %s4987_s5 = inlined_call_operand.vmem [shape: f32[1,32], index: 5, kind: input, shape index: {}]   ;;  %s4988_s4 = inlined_call_operand.vmem [shape: f32[32,32], index: 4, kind: input, shape index: {}]   ;;  %s4989_s10 = inlined_call_operand.vmem [shape: f32[2,1,32], index: 10, kind: input, shape index: {}]   ;;  %s4990_s11 = inlined_call_operand.vmem [shape: f32[2,1,32], index: 11, kind: input, shape index: {}]   ;;  %s4991_s13 = inlined_call_operand.vmem [shape: f32[2,1,64], index: 13, kind: input, shape index: {}]   ;;  %s4992_s12 = inlined_call_operand.vmem [shape: f32[2,32,64], index: 12, kind: input, shape index: {}]   ;;  %s4993_s15 = inlined_call_operand.vmem [shape: f32[2,1,32], index: 15, kind: input, shape index: {}]   ;;  %s4994_s14 = inlined_call_operand.vmem [shape: f32[2,64,32], index: 14, kind: input, shape index: {}]   ;;  %s4995_s16 = inlined_call_operand.vmem [shape: f32[34,32], index: 16, kind: output, shape index: {}]  }
   0x1   :  { %4997 = sst [smem:[#allocation2_spill]] %s4979_s1  ;;  %v53_v6 = vld [vmem:[%s4980_s0] sm:$0xff]  ;;  %v54_v7 = vld [vmem:[%s4980_s0 + $0x8] sm:$0xff]  ;;  %v55_v8 = vld [vmem:[%s4980_s0 + $0x10] sm:$0xff]  ;;  %3065 = vrcp.f32 %v3297_v31 }
   0x2   :  { %s4998_s23 = sld [smem:[#allocation2_spill]]  ;;  %v56_v9 = vld [vmem:[%s4980_s0 + $0x18] sm:$0xff]  ;;  %v57_v10 = vld [vmem:[%s4980_s0 + $0x20] sm:$0x3]  ;;  %v65_v15 = vld [vmem:[%s4981_s2 + $0x8] sm:$0xff]  ;;  %s3298_s0 = smov 96  }
   0x3   :  { %v64_v11 = vld [vmem:[%s4981_s2] sm:$0xff]  ;;  %v67_v20 = vld [vmem:[%s4981_s2 + $0x18] sm:$0xff]  ;;  %v66_v28 = vld [vmem:[%s4981_s2 + $0x10] sm:$0xff] }
   0x4   :  { %v68_v24 = vld [vmem:[%s4981_s2 + $0x20] sm:$0x3]  ;;  %v3493_v63 = vld [vmem:[%s4984_s3 + $0x18] sm:$0xff] }
   0x5   :  { %2958 = vmatpush.msra.mxu2 %v3493_v63  ;;  %2957 = vmatpush.msra.mxu1 %v3493_v63 }
   0x7   :  { %v3066_v32 = vpop.eup %3065 }
   0x8   :  { %v63_v0 = vld [vmem:[%s4998_s23 + $0x28] sm:$0xff]  ;;  %v62_v1 = vld [vmem:[%s4998_s23 + $0x20] sm:$0xff]  ;;  %v61_v2 = vld [vmem:[%s4998_s23 + $0x18] sm:$0xff]  ;;  %v151_v33 = vmul.f32 32.0, %v3066_v32  ;;  %vm155_vm3 = vweird.f32 %v3066_v32 }
   0x9   :  { %95 = vmatpush.msra.mxu0 %v63_v0  ;;  %v60_v3 = vld [vmem:[%s4998_s23 + $0x10] sm:$0xff]  ;;  %v59_v4 = vld [vmem:[%s4998_s23 + $0x8] sm:$0xff]  ;;  %v58_v5 = vld [vmem:[%s4998_s23] sm:$0xff] }
   0xa   :  { %v152_v34 = vsub.f32 1.0, %v151_v33  ;;  %v3500_v0 = vld [vmem:[%s4984_s3 + $0x10] sm:$0xff] }
   0xb   :  { %96 = vmatpush.msra.mxu0 %v62_v1  ;;  %v3505_v1 = vld [vmem:[%s4984_s3 + $0x8] sm:$0xff]  ;;  %2960 = vmatpush.msra.mxu2 %v3500_v0 }
   0xc   :  { %v153_v35 = vmul.f32 %v3066_v32, %v152_v34  ;;  %2959 = vmatpush.msra.mxu1 %v3500_v0 }
   0xd   :  { %97 = vmatpush.msra.mxu0 %v61_v2  ;;  %v3513_v2 = vld [vmem:[%s4984_s3] sm:$0xff]  ;;  %2962 = vmatpush.msra.mxu2 %v3505_v1 }
   0xe   :  { %v154_v36 = vadd.f32 %v3066_v32, %v153_v35  ;;  %2961 = vmatpush.msra.mxu1 %v3505_v1 }
   0xf   :  { %98 = vmatpush.msra.mxu0 %v60_v3  ;;  %2964 = vmatpush.msra.mxu2 %v3513_v2 }
  0x10   :  { %v3453_v37 = vsel %vm155_vm3, %v3066_v32, %v154_v36  ;;  %2963 = vmatpush.msra.mxu1 %v3513_v2 }
  0x11   :  { %99 = vmatpush.msra.mxu0 %v59_v4 }
  0x13   :  { %100 = vmatpush.msra.mxu0 %v58_v5 }
  0x14   :  { %2763 = vmatmul.msk.f32.vlgmr.msra.gmra.mxu0 %vm69_vm0, %v53_v6 }
  0x15   :  { %295 = vmatpush.msrb.mxu0 %v3493_v63 }
  0x17   :  { %296 = vmatpush.msrb.mxu0 %v3500_v0 }
  0x19   :  { %297 = vmatpush.msrb.mxu0 %v3505_v1 }
  0x1b   :  { %298 = vmatpush.msrb.mxu0 %v3513_v2 }
  0x1c   :  { %2764 = vmatmul.msk.f32.gmra.mxu0 %vm69_vm0, %v54_v7 }
  0x24   :  { %2765 = vmatmul.msk.f32.gmra.mxu0 %vm69_vm0, %v55_v8 }
  0x2c   :  { %2766 = vmatmul.msk.f32.gmra.mxu0 %vm69_vm0, %v56_v9 }
  0x34   :  { %2767 = vmatmul.msk.f32.gmra.mxu0 %vm69_vm0, %v57_v10 }
  0x91   :  { %v102_v12 = vpop.f32.mrf.mxu0 }
  0x92   :  { %v3421_v13 = vadd.f32 %v102_v12, %v64_v11  ;;  %v3526_v12 = vld [vmem:[%s4982_s8] ss:$0 sm:$0xff] }
  0x94   :  { %v134_v14 = vsel %vm133_vm1, %v3421_v13, 0.0 }
  0x95   :  { %135 = vadd.xlane.f32.xlu1 %v134_v14 }
  0x99   :  { %v105_v16 = vpop.f32.mrf.mxu0 }
  0x9a   :  { %v3428_v17 = vadd.f32 %v105_v16, %v65_v15  ;;  %v3532_v16 = vld [vmem:[%s4983_s9] ss:$0 sm:$0xff] }
  0x9c   :  { %v137_v18 = vsel %vm133_vm1, %v3428_v17, 0.0 }
  0x9d   :  { %138 = vadd.xlane.f32.xlu2 %v137_v18 }
  0xa1   :  { %v108_v19 = vpop.f32.mrf.mxu0 }
  0xa2   :  { %v3449_v29 = vadd.f32 %v108_v19, %v66_v28 }
  0xa4   :  { %v140_v30 = vsel %vm133_vm1, %v3449_v29, 0.0 }
  0xa9   :  { %v111_v21 = vpop.f32.mrf.mxu0 }
  0xaa   :  { %v3435_v22 = vadd.f32 %v111_v21, %v67_v20 }
  0xac   :  { %v143_v23 = vsel %vm133_vm1, %v3435_v22, 0.0 }
  0xad   :  { %144 = vadd.xlane.f32.xlu1 %v143_v23 }
  0xb1   :  { %v114_v25 = vpop.f32.mrf.mxu0 }
  0xb2   :  { %v3442_v26 = vadd.f32 %v114_v25, %v68_v24 }
  0xb4   :  { %v147_v27 = vsel %vm146_vm2, %v3442_v26, 0.0 }
  0xb5   :  { %148 = vadd.xlane.f32.xlu0 %v147_v27 }
  0xbd   :  { %141 = vadd.xlane.f32.xlu0 %v140_v30 }
 0x108   :  { %v136_v38 = vpop.xlane.xlu1 %135 }
 0x109   :  { %v157_v39 = vmul.f32 %v3453_v37, %v136_v38 }
 0x10b   :  { %v3457_v40 = vsub.f32 %v3421_v13, %v157_v39 }
 0x10d   :  { %v167_v41 = vmul.f32 %v3457_v40, %v3457_v40 }
 0x10f   :  { %v172_v42 = vsel %vm133_vm1, %v167_v41, 0.0 }
 0x110   :  { %173 = vadd.xlane.f32.xlu1 %v172_v42  ;;  %v139_v51 = vpop.xlane.xlu2 %138 }
 0x111   :  { %v158_v54 = vmul.f32 %v3453_v37, %v139_v51 }
 0x113   :  { %v3483_v58 = vsub.f32 %v3428_v17, %v158_v54 }
 0x115   :  { %v168_v61 = vmul.f32 %v3483_v58, %v3483_v58 }
 0x117   :  { %v175_v62 = vsel %vm133_vm1, %v168_v61, 0.0 }
 0x120   :  { %v145_v43 = vpop.xlane.xlu1 %144 }
 0x121   :  { %v160_v46 = vmul.f32 %v3453_v37, %v145_v43 }
 0x123   :  { %v3470_v49 = vsub.f32 %v3435_v22, %v160_v46 }
 0x125   :  { %v170_v56 = vmul.f32 %v3470_v49, %v3470_v49 }
 0x127   :  { %v181_v60 = vsel %vm133_vm1, %v170_v56, 0.0 }
 0x128   :  { %v149_v44 = vpop.xlane.xlu0 %148 }
 0x129   :  { %v161_v45 = vmul.f32 %v3453_v37, %v149_v44 }
 0x12b   :  { %v3465_v47 = vsub.f32 %v3442_v26, %v161_v45 }
 0x12d   :  { %v171_v48 = vmul.f32 %v3465_v47, %v3465_v47 }
 0x12f   :  { %v184_v50 = vsel %vm146_vm2, %v171_v48, 0.0 }
 0x130   :  { %v142_v52 = vpop.xlane.xlu0 %141  ;;  %185 = vadd.xlane.f32.xlu2 %v184_v50 }
 0x131   :  { %v159_v53 = vmul.f32 %v3453_v37, %v142_v52 }
 0x133   :  { %v3476_v55 = vsub.f32 %v3449_v29, %v159_v53 }
 0x135   :  { %v169_v57 = vmul.f32 %v3476_v55, %v3476_v55 }
 0x137   :  { %v178_v59 = vsel %vm133_vm1, %v169_v57, 0.0 }
 0x138   :  { %179 = vadd.xlane.f32.xlu0 %v178_v59  ;;  %182 = vadd.xlane.f32.xlu2 %v181_v60 }
 0x140   :  { %176 = vadd.xlane.f32.xlu0 %v175_v62 }
 0x183   :  { %v174_v3 = vpop.xlane.xlu1 %173 }
 0x184   :  { %v187_v4 = vmul.f32 %v174_v3, %v3453_v37 }
 0x186   :  { %v192_v5 = vadd.f32 1e-05, %v187_v4 }
 0x188   :  { %3067 = vrsqrt.f32 %v192_v5  ;;  %vm203_vm5 = vweird.f32 %v192_v5 }
 0x18e   :  { %v3068_v6 = vpop.eup %3067 }
 0x18f   :  { %v198_v7 = vmul.f32 %v3068_v6, %v192_v5  ;;  %vm204_vm4 = vweird.f32 %v3068_v6 }
 0x190   :  { %vm205_vm6 = vmor %vm203_vm5, %vm204_vm4  ;;  %vm396_vm5 = vcmask 277504  }
 0x191   :  { %v199_v8 = vmul.f32 %v3068_v6, %v198_v7 }
 0x193   :  { %v200_v9 = vmul.f32 0.5, %v199_v8 }
 0x195   :  { %v201_v10 = vsub.f32 1.5, %v200_v9 }
 0x197   :  { %v202_v11 = vmul.f32 %v3068_v6, %v201_v10 }
 0x199   :  { %v206_v14 = vsel %vm205_vm6, %v3068_v6, %v202_v11  ;;  %vm409_vm6 = vcmask 271360  }
 0x19a   :  { %v247_v15 = vmul.f32 %v206_v14, %v3457_v40 }
 0x19c   :  { %v255_v18 = vmul.f32 %v3526_v12, %v247_v15 }
 0x19e   :  { %v263_v19 = vadd.f32 %v3532_v16, %v255_v18 }
 0x1a0   :  { %2768 = vmatmul.msk.f32.vlgmr.msrb.gmra.mxu0 %vm133_vm1, %v263_v19 }
 0x1a3   :  { %v186_v20 = vpop.xlane.xlu2 %185 }
 0x1a4   :  { %v191_v21 = vmul.f32 %v186_v20, %v3453_v37 }
 0x1a6   :  { %v196_v23 = vadd.f32 1e-05, %v191_v21 }
 0x1a8   :  { %3069 = vrsqrt.f32 %v196_v23  ;;  %vm243_vm8 = vweird.f32 %v196_v23 }
 0x1ab   :  { %v180_v24 = vpop.xlane.xlu0 %179  ;;  %v183_v25 = vpop.xlane.xlu2 %182 }
 0x1ac   :  { %v189_v27 = vmul.f32 %v180_v24, %v3453_v37  ;;  %v190_v28 = vmul.f32 %v183_v25, %v3453_v37 }
 0x1ae   :  { %v3070_v30 = vpop.eup %3069  ;;  %v194_v31 = vadd.f32 1e-05, %v189_v27  ;;  %v195_v32 = vadd.f32 1e-05, %v190_v28 }
 0x1af   :  { %v238_v33 = vmul.f32 %v3070_v30, %v196_v23  ;;  %vm244_vm7 = vweird.f32 %v3070_v30 }
 0x1b0   :  { %3071 = vrsqrt.f32 %v194_v31  ;;  %vm245_vm9 = vmor %vm243_vm8, %vm244_vm7  ;;  %vm223_vm11 = vweird.f32 %v194_v31  ;;  %vm233_vm14 = vweird.f32 %v195_v32  ;;  %vm615_vm7 = vcmask 1041408  }
 0x1b1   :  { %v239_v34 = vmul.f32 %v3070_v30, %v238_v33  ;;  %3073 = vrsqrt.f32 %v195_v32 }
 0x1b3   :  { %v240_v35 = vmul.f32 0.5, %v239_v34  ;;  %v177_v36 = vpop.xlane.xlu0 %176 }
 0x1b4   :  { %v188_v38 = vmul.f32 %v177_v36, %v3453_v37 }
 0x1b5   :  { %v241_v39 = vsub.f32 1.5, %v240_v35 }
 0x1b6   :  { %v3072_v40 = vpop.eup %3071  ;;  %v193_v41 = vadd.f32 1e-05, %v188_v38 }
 0x1b7   :  { %v3074_v42 = vpop.eup %3073  ;;  %v242_v43 = vmul.f32 %v3070_v30, %v241_v39  ;;  %v218_v44 = vmul.f32 %v3072_v40, %v194_v31  ;;  %vm224_vm10 = vweird.f32 %v3072_v40  ;;  %v3608_v31 = vld [vmem:[%s4985_s6] ss:$0 sm:$0xff] }
 0x1b8   :  { %v228_v45 = vmul.f32 %v3074_v42, %v195_v32  ;;  %3075 = vrsqrt.f32 %v193_v41  ;;  %vm234_vm12 = vweird.f32 %v3074_v42  ;;  %vm225_vm13 = vmor %vm223_vm11, %vm224_vm10  ;;  %vm213_vm3 = vweird.f32 %v193_v41 }
 0x1b9   :  { %v246_v46 = vsel %vm245_vm9, %v3070_v30, %v242_v43  ;;  %v219_v48 = vmul.f32 %v3072_v40, %v218_v44  ;;  %vm235_vm15 = vmor %vm233_vm14, %vm234_vm12  ;;  %v3654_v44 = vld [vmem:[%s4985_s6 + $0x2] ss:$0 sm:$0xff] }
 0x1ba   :  { %v229_v50 = vmul.f32 %v3074_v42, %v228_v45  ;;  %v251_v51 = vmul.f32 %v246_v46, %v3465_v47 }
 0x1bb   :  { %v220_v52 = vmul.f32 0.5, %v219_v48 }
 0x1bc   :  { %v230_v53 = vmul.f32 0.5, %v229_v50  ;;  %v259_v54 = vmul.f32 %v3526_v12, %v251_v51 }
 0x1bd   :  { %v221_v56 = vsub.f32 1.5, %v220_v52  ;;  %v3674_v52 = vld [vmem:[%s4986_s7] sm:$0xff] }
 0x1be   :  { %v3076_v57 = vpop.eup %3075  ;;  %v231_v59 = vsub.f32 1.5, %v230_v53  ;;  %v267_v60 = vadd.f32 %v3532_v16, %v259_v54 }
 0x1bf   :  { %v222_v61 = vmul.f32 %v3072_v40, %v221_v56  ;;  %v208_v62 = vmul.f32 %v3076_v57, %v193_v41  ;;  %vm214_vm0 = vweird.f32 %v3076_v57 }
 0x1c0   :  { %v232_v3 = vmul.f32 %v3074_v42, %v231_v59  ;;  %2772 = vmatmul.msk.f32.vlgmr.msra.gmra.mxu2 %vm133_vm1, %v267_v60  ;;  %vm215_vm4 = vmor %vm213_vm3, %vm214_vm0 }
 0x1c1   :  { %v209_v47 = vmul.f32 %v3076_v57, %v208_v62  ;;  %v226_v4 = vsel %vm225_vm13, %v3072_v40, %v222_v61  ;;  %v3688_v62 = vld [vmem:[%s4986_s7 + $0x10] sm:$0xff] }
 0x1c2   :  { %v249_v5 = vmul.f32 %v226_v4, %v3476_v55  ;;  %v236_v6 = vsel %vm235_vm15, %v3074_v42, %v232_v3 }
 0x1c3   :  { %v210_v7 = vmul.f32 0.5, %v209_v47  ;;  %v250_v11 = vmul.f32 %v236_v6, %v3470_v49 }
 0x1c4   :  { %v257_v8 = vmul.f32 %v3526_v12, %v249_v5  ;;  %v3698_v5 = vld [vmem:[%s4986_s7 + $0x18] sm:$0xff] }
 0x1c5   :  { %v211_v9 = vsub.f32 1.5, %v210_v7  ;;  %v258_v55 = vmul.f32 %v3526_v12, %v250_v11 }
 0x1c6   :  { %v265_v10 = vadd.f32 %v3532_v16, %v257_v8 }
 0x1c7   :  { %v212_v14 = vmul.f32 %v3076_v57, %v211_v9  ;;  %v266_v21 = vadd.f32 %v3532_v16, %v258_v55  ;;  %v3705_v9 = vld [vmem:[%s4986_s7 + $0x20] sm:$0x3] }
 0x1c8   :  { %2770 = vmatmul.msk.f32.vlgmr.msra.gmra.mxu1 %vm133_vm1, %v265_v10 }
 0x1c9   :  { %v216_v15 = vsel %vm215_vm4, %v3076_v57, %v212_v14  ;;  %v3681_v57 = vld [vmem:[%s4986_s7 + $0x8] sm:$0xff] }
 0x1ca   :  { %v248_v18 = vmul.f32 %v216_v15, %v3483_v58 }
 0x1cc   :  { %v256_v19 = vmul.f32 %v3526_v12, %v248_v18 }
 0x1ce   :  { %v264_v20 = vadd.f32 %v3532_v16, %v256_v19  ;;  %v3051_v16 = vld [vmem:[%s4985_s6 + $0x1] ss:$0 sm:$0xff] }
 0x1d0   :  { %2769 = vmatmul.msk.f32.gmra.mxu0 %vm133_vm1, %v264_v20  ;;  %2771 = vmatmul.msk.f32.gmra.mxu1 %vm133_vm1, %v266_v21 }
 0x21d   :  { %v3565_v58 = vpop.f32.mrf.mxu0 }
 0x21e   :  { %v319_v33 = vmul.f32 %v3608_v31, %v3565_v58  ;;  %v466_v34 = vmul.f32 %v3051_v16, %v3565_v58  ;;  %v723_v45 = vmul.f32 %v3654_v44, %v3565_v58 }
 0x243   :  { %v3557_v49 = vpop.f32.mrf.mxu2 }
 0x244   :  { %337 = vrot.lane.b32.xlu1 %v3557_v49, %s3298_s0  ;;  %v323_v42 = vmul.f32 %v3608_v31, %v3557_v49  ;;  %v470_v43 = vmul.f32 %v3051_v16, %v3557_v49  ;;  %v727_v51 = vmul.f32 %v3654_v44, %v3557_v49 }
 0x245   :  { %v3561_v23 = vpop.f32.mrf.mxu1 }
 0x246   :  { %333 = vrot.lane.b32.xlu0 %v3561_v23, %s3298_s0  ;;  %v321_v38 = vmul.f32 %v3608_v31, %v3561_v23  ;;  %v468_v39 = vmul.f32 %v3051_v16, %v3561_v23  ;;  %v725_v48 = vmul.f32 %v3654_v44, %v3561_v23 }
 0x24c   :  { %329 = vrot.lane.b32.xlu1 %v3565_v58, %s3298_s0 }
 0x24d   :  { %v3569_v12 = vpop.f32.mrf.mxu1  ;;  %v3577_v24 = vpop.f32.mrf.mxu0 }
 0x24e   :  { %335 = vrot.lane.b32.xlu2 %v3569_v12, %s3298_s0  ;;  %v320_v35 = vmul.f32 %v3608_v31, %v3577_v24  ;;  %v467_v36 = vmul.f32 %v3051_v16, %v3577_v24  ;;  %v322_v40 = vmul.f32 %v3608_v31, %v3569_v12  ;;  %v469_v41 = vmul.f32 %v3051_v16, %v3569_v12 }
 0x24f   :  { %v724_v46 = vmul.f32 %v3654_v44, %v3577_v24  ;;  %v726_v50 = vmul.f32 %v3654_v44, %v3569_v12 }
 0x254   :  { %573 = vrot.lane.b32.xlu1 %v3051_v16, %s3299_s20 }
 0x256   :  { %331 = vrot.lane.b32.xlu2 %v3577_v24, %s3298_s0 }
 0x2a8   :  { %v3587_v27 = vpop.permute.xlu2 %335 }
 0x2b0   :  { %v3599_v30 = vpop.permute.xlu2 %331 }
 0x2b6   :  { %v3581_v25 = vpop.permute.xlu1 %337 }
 0x2b7   :  { %2773 = vmatpush.xpose.msk.msrb.mxu2 %vm133_vm1, %v3581_v25  ;;  %2784 = vmatpush.xpose.msk.msra.mxu3 %vm133_vm1, %v3581_v25 }
 0x2b8   :  { %v3593_v28 = vpop.permute.xlu0 %333 }
 0x2bb   :  { %2774 = vmatpush.xpose.msk.msrb.mxu2 %vm133_vm1, %v3587_v27  ;;  %2785 = vmatpush.xpose.msk.msra.mxu3 %vm133_vm1, %v3587_v27 }
 0x2be   :  { %v3610_v32 = vpop.permute.xlu1 %329 }
 0x2bf   :  { %2775 = vmatpush.xpose.msk.msrb.mxu2 %vm133_vm1, %v3593_v28  ;;  %2786 = vmatpush.xpose.msk.msra.mxu3 %vm133_vm1, %v3593_v28 }
 0x2c3   :  { %2776 = vmatpush.xpose.msk.msrb.mxu2 %vm133_vm1, %v3599_v30  ;;  %2787 = vmatpush.xpose.msk.msra.mxu3 %vm133_vm1, %v3599_v30 }
 0x2c6   :  { %v3709_v15 = vpop.permute.xlu1 %573 }
 0x2c7   :  { %2777 = vmatpush.xpose.msk.msrb.mxu2 %vm133_vm1, %v3610_v32  ;;  %2788 = vmatpush.xpose.msk.msra.mxu3 %vm133_vm1, %v3610_v32  ;;  %v578_v18 = vmul.f32 %v3709_v15, %v3561_v23  ;;  %v579_v55 = vmul.f32 %v3709_v15, %v3569_v12  ;;  %v580_v20 = vmul.f32 %v3709_v15, %v3557_v49 }
 0x2c9   :  { %v2968_v19 = vpack.i.bf16 %v578_v18, %v579_v55 }
 0x2ca   :  { %2778 = vmatmul.msk.f32.vlgmr.msrb.gmra.mxu2 %vm133_vm1, %v319_v33  ;;  %2789 = vmatmul.msk.f32.vlgmr.msra.gmra.mxu3 %vm133_vm1, %v466_v34 }
 0x2cb   :  { %2807 = vmatpush.xpose.msk.msra.mxu2 %vm133_vm1, %v3581_v25 }
 0x2cf   :  { %2808 = vmatpush.xpose.msk.msra.mxu2 %vm133_vm1, %v3587_v27 }
 0x2d2   :  { %2779 = vmatmul.msk.f32.gmra.mxu2 %vm133_vm1, %v320_v35  ;;  %2790 = vmatmul.msk.f32.gmra.mxu3 %vm133_vm1, %v467_v36 }
 0x2d3   :  { %2809 = vmatpush.xpose.msk.msra.mxu2 %vm133_vm1, %v3593_v28 }
 0x2d7   :  { %2810 = vmatpush.xpose.msk.msra.mxu2 %vm133_vm1, %v3599_v30 }
 0x2da   :  { %2780 = vmatmul.msk.f32.gmra.mxu2 %vm133_vm1, %v321_v38  ;;  %2791 = vmatmul.msk.f32.gmra.mxu3 %vm133_vm1, %v468_v39 }
 0x2db   :  { %2811 = vmatpush.xpose.msk.msra.mxu2 %vm133_vm1, %v3610_v32 }
 0x2e2   :  { %2781 = vmatmul.msk.f32.gmra.mxu2 %vm133_vm1, %v322_v40  ;;  %2792 = vmatmul.msk.f32.gmra.mxu3 %vm133_vm1, %v469_v41 }
 0x2ea   :  { %2782 = vmatmul.msk.f32.gmra.mxu2 %vm133_vm1, %v323_v42  ;;  %2793 = vmatmul.msk.f32.gmra.mxu3 %vm133_vm1, %v470_v43 }
 0x2f2   :  { %2812 = vmatmul.msk.f32.vlgmr.msra.gmra.mxu2 %vm133_vm1, %v723_v45 }
 0x2fa   :  { %2813 = vmatmul.msk.f32.gmra.mxu2 %vm133_vm1, %v724_v46 }
 0x302   :  { %2814 = vmatmul.msk.f32.gmra.mxu2 %vm133_vm1, %v725_v48 }
 0x30a   :  { %2815 = vmatmul.msk.f32.gmra.mxu2 %vm133_vm1, %v726_v50 }
 0x312   :  { %2816 = vmatmul.msk.f32.gmra.mxu2 %vm133_vm1, %v727_v51  ;;  %v576_v51 = vmul.f32 %v3709_v15, %v3565_v58 }
 0x34d   :  { %v503_v53 = vpop.f32.mrf.mxu3  ;;  %v381_v33 = vpop.f32.mrf.mxu2 }
 0x34e   :  { %v504_v54 = vadd.f32 %v503_v53, %v3674_v52  ;;  %v577_v53 = vmul.f32 %v3709_v15, %v3577_v24 }
 0x350   :  { %v518_v56 = vsel %vm396_vm5, %v504_v54, -inf }
 0x351   :  { %519 = vmax.xlane.f32.xlu0 %v518_v56 }
 0x355   :  { %v506_v59 = vpop.f32.mrf.mxu3  ;;  %v384_v41 = vpop.f32.mrf.mxu2 }
 0x356   :  { %v507_v60 = vadd.f32 %v506_v59, %v3681_v57 }
 0x358   :  { %v521_v61 = vsel %vm396_vm5, %v507_v60, -inf }
 0x359   :  { %522 = vmax.xlane.f32.xlu2 %v521_v61 }
 0x35d   :  { %v509_v3 = vpop.f32.mrf.mxu3  ;;  %v387_v45 = vpop.f32.mrf.mxu2 }
 0x35e   :  { %v3691_v47 = vadd.f32 %v509_v3, %v3688_v62 }
 0x360   :  { %v524_v4 = vsel %vm396_vm5, %v3691_v47, -inf }
 0x361   :  { %525 = vmax.xlane.f32.xlu1 %v524_v4 }
 0x365   :  { %v512_v6 = vpop.f32.mrf.mxu3 }
 0x366   :  { %v513_v7 = vadd.f32 %v512_v6, %v3698_v5 }
 0x368   :  { %v527_v8 = vsel %vm396_vm5, %v513_v7, -inf }
 0x369   :  { %528 = vmax.xlane.f32.xlu0 %v527_v8 }
 0x36d   :  { %v515_v10 = vpop.f32.mrf.mxu3 }
 0x36e   :  { %v516_v11 = vadd.f32 %v515_v10, %v3705_v9 }
 0x370   :  { %v530_v14 = vsel %vm409_vm6, %v516_v11, -inf }
 0x371   :  { %531 = vmax.xlane.f32.xlu2 %v530_v14 }
 0x37a   :  { %2969 = vrot.lane.b32.xlu1 %v2968_v19, %s3299_s20 }
 0x389   :  { %594 = vrot.lane.b32.xlu2 %v580_v20, %s3299_s20 }
 0x3c4   :  { %v520_v21 = vpop.xlane.xlu0 %519 }
 0x3c5   :  { %v533_v16 = vsub.f32 %v504_v54, %v520_v21  ;;  %v2973_v54 = vpack.i.bf16 %v576_v51, %v577_v53 }
 0x3c7   :  { %v538_v34 = vmul.f32 1.442695, %v533_v16 }
 0x3c9   :  { %3077 = vpow2.f32 %v538_v34 }
 0x3cc   :  { %v523_v35 = vpop.xlane.xlu2 %522 }
 0x3cd   :  { %v534_v36 = vsub.f32 %v507_v60, %v523_v35  ;;  %v390_v60 = vpop.f32.mrf.mxu2 }
 0x3ce   :  { %v3747_v21 = vadd.f32 %v390_v60, %v3698_v5 }
 0x3cf   :  { %v3719_v38 = vpop.eup %3077  ;;  %v540_v39 = vmul.f32 1.442695, %v534_v36 }
 0x3d0   :  { %v548_v40 = vsel %vm396_vm5, %v3719_v38, 0.0  ;;  %v406_v16 = vsel %vm396_vm5, %v3747_v21, -inf }
 0x3d1   :  { %3079 = vpow2.f32 %v540_v39  ;;  %549 = vadd.xlane.f32.xlu0 %v548_v40 }
 0x3d4   :  { %v526_v56 = vpop.xlane.xlu1 %525 }
 0x3d5   :  { %v393_v18 = vpop.f32.mrf.mxu2  ;;  %v535_v36 = vsub.f32 %v3691_v47, %v526_v56 }
 0x3d7   :  { %v3723_v42 = vpop.eup %3079  ;;  %v542_v40 = vmul.f32 1.442695, %v535_v36 }
 0x3d8   :  { %v551_v43 = vsel %vm396_vm5, %v3723_v42, 0.0 }
 0x3d9   :  { %552 = vadd.xlane.f32.xlu2 %v551_v43 }
 0x3dc   :  { %v529_v46 = vpop.xlane.xlu0 %528 }
 0x3dd   :  { %v536_v48 = vsub.f32 %v513_v7, %v529_v46  ;;  %v3737_v7 = vadd.f32 %v384_v41, %v3681_v57  ;;  %v760_v34 = vpop.f32.mrf.mxu2  ;;  %v382_v46 = vadd.f32 %v381_v33, %v3674_v52 }
 0x3de   :  { %v3752_v35 = vadd.f32 %v760_v34, %v3674_v52 }
 0x3df   :  { %v544_v50 = vmul.f32 1.442695, %v536_v48  ;;  %v400_v19 = vsel %vm396_vm5, %v3737_v7, -inf  ;;  %v397_v47 = vsel %vm396_vm5, %v382_v46, -inf  ;;  %v3765_v48 = vadd.f32 %v387_v45, %v3688_v62 }
 0x3e0   :  { %v775_v39 = vsel %vm396_vm5, %v3752_v35, -inf }
 0x3e1   :  { %3081 = vpow2.f32 %v544_v50  ;;  %v403_v50 = vsel %vm396_vm5, %v3765_v48, -inf }
 0x3e4   :  { %v532_v59 = vpop.xlane.xlu2 %531 }
 0x3e5   :  { %v537_v61 = vsub.f32 %v516_v11, %v532_v59  ;;  %2974 = vrot.lane.b32.xlu0 %v2973_v54, %s3299_s20  ;;  %v763_v51 = vpop.f32.mrf.mxu2  ;;  %v3787_v59 = vld [vmem:[%s4985_s6 + $0x3] ss:$0 sm:$0xff] }
 0x3e7   :  { %v3732_v3 = vpop.eup %3081  ;;  %v546_v4 = vmul.f32 1.442695, %v537_v61 }
 0x3e8   :  { %v557_v6 = vsel %vm396_vm5, %v3732_v3, 0.0 }
 0x3e9   :  { %3083 = vpow2.f32 %v546_v4  ;;  %558 = vadd.xlane.f32.xlu1 %v557_v6 }
 0x3ea   :  { %3085 = vpow2.f32 %v542_v40 }
 0x3ec   :  { %v595_v8 = vpop.permute.xlu2 %594  ;;  %v2970_v10 = vpop.permute.xlu1 %2969 }
 0x3ed   :  { %2794 = vmatpush.msk.msrb.mxu1 %vm615_vm7, %v595_v8  ;;  %v2971_v14 = vunpack.i.l.bf16 %v2970_v10  ;;  %v2972_v20 = vunpack.i.h.bf16 %v2970_v10  ;;  %v766_v45 = vpop.f32.mrf.mxu2 }
 0x3ee   :  { %v3780_v54 = vadd.f32 %v766_v45, %v3688_v62 }
 0x3ef   :  { %v3740_v11 = vpop.eup %3083  ;;  %630 = vmatpush.msrb.mxu1 %v2971_v14 }
 0x3f0   :  { %v560_v55 = vsel %vm409_vm6, %v3740_v11, 0.0  ;;  %v3086_v41 = vpop.eup %3085  ;;  %v781_v56 = vsel %vm396_vm5, %v3780_v54, -inf }
 0x3f1   :  { %561 = vadd.xlane.f32.xlu2 %v560_v55  ;;  %401 = vmax.xlane.f32.xlu1 %v400_v19  ;;  %v554_v43 = vsel %vm396_vm5, %v3086_v41, 0.0 }
 0x3f2   :  { %631 = vmatpush.msrb.mxu1 %v2972_v20 }
 0x3f9   :  { %407 = vmax.xlane.f32.xlu1 %v406_v16 }
 0x401   :  { %776 = vmax.xlane.f32.xlu1 %v775_v39 }
 0x409   :  { %453 = vrot.lane.b32.xlu2 %v3608_v31, %s3299_s20  ;;  %v3770_v31 = vadd.f32 %v393_v18, %v3705_v9 }
 0x40b   :  { %v410_v53 = vsel %vm409_vm6, %v3770_v31, -inf }
 0x40f   :  { %555 = vadd.xlane.f32.xlu0 %v554_v43 }
 0x411   :  { %830 = vrot.lane.b32.xlu2 %v3654_v44, %s3299_s20  ;;  %v3775_v44 = vadd.f32 %v763_v51, %v3681_v57 }
 0x413   :  { %v778_v33 = vsel %vm396_vm5, %v3775_v44, -inf }
 0x417   :  { %398 = vmax.xlane.f32.xlu0 %v397_v47  ;;  %v769_v47 = vpop.f32.mrf.mxu2 }
 0x41f   :  { %404 = vmax.xlane.f32.xlu0 %v403_v50 }
 0x427   :  { %411 = vmax.xlane.f32.xlu0 %v410_v53  ;;  %v3818_v53 = vadd.f32 %v769_v47, %v3698_v5  ;;  %v919_v47 = vmul.f32 %v3787_v59, %v3569_v12 }
 0x42f   :  { %779 = vmax.xlane.f32.xlu0 %v778_v33 }
 0x437   :  { %782 = vmax.xlane.f32.xlu0 %v781_v56  ;;  %v784_v56 = vsel %vm396_vm5, %v3818_v53, -inf }
 0x444   :  { %v550_v60 = vpop.xlane.xlu0 %549 }
 0x445   :  { %3087 = vrcp.f32 %v550_v60  ;;  %v772_v60 = vpop.f32.mrf.mxu2 }
 0x44b   :  { %1023 = vrot.lane.b32.xlu0 %v3787_v59, %s3299_s20  ;;  %v3088_v6 = vpop.eup %3087 }
 0x44c   :  { %v553_v61 = vpop.xlane.xlu2 %552  ;;  %v568_v14 = vmul.f32 %v3088_v6, %v3719_v38 }
 0x44d   :  { %3089 = vrcp.f32 %v553_v61 }
 0x453   :  { %v3090_v18 = vpop.eup %3089 }
 0x454   :  { %v569_v55 = vmul.f32 %v3090_v18, %v3723_v42 }
 0x457   :  { %v2975_v4 = vpop.permute.xlu0 %2974 }
 0x458   :  { %v2976_v8 = vunpack.i.l.bf16 %v2975_v4  ;;  %v2977_v10 = vunpack.i.h.bf16 %v2975_v4 }
 0x45a   :  { %632 = vmatpush.msrb.mxu1 %v2976_v8 }
 0x45c   :  { %633 = vmatpush.msrb.mxu1 %v2977_v10  ;;  %v559_v42 = vpop.xlane.xlu1 %558  ;;  %v3831_v10 = vadd.f32 %v772_v60, %v3705_v9 }
 0x45d   :  { %2795 = vmatmul.msk.f32.vlgmr.msrb.gmra.mxu1 %vm396_vm5, %v568_v14 }
 0x45e   :  { %2824 = vmatpush.xpose.msk.msra.mxu1 %vm133_vm1, %v3581_v25  ;;  %v787_v18 = vsel %vm409_vm6, %v3831_v10, -inf }
 0x462   :  { %2825 = vmatpush.xpose.msk.msra.mxu1 %vm133_vm1, %v3587_v27 }
 0x464   :  { %v562_v19 = vpop.xlane.xlu2 %561 }
 0x465   :  { %2796 = vmatmul.msk.f32.gmra.mxu1 %vm396_vm5, %v569_v55  ;;  %v916_v55 = vmul.f32 %v3787_v59, %v3565_v58 }
 0x466   :  { %2826 = vmatpush.xpose.msk.msra.mxu1 %vm133_vm1, %v3593_v28 }
 0x46a   :  { %2827 = vmatpush.xpose.msk.msra.mxu1 %vm133_vm1, %v3599_v30 }
 0x46c   :  { %v3803_v38 = vpop.permute.xlu2 %453 }
 0x46d   :  { %v460_v25 = vmul.f32 %v3803_v38, %v3557_v49  ;;  %v458_v20 = vmul.f32 %v3803_v38, %v3561_v23  ;;  %v459_v27 = vmul.f32 %v3803_v38, %v3569_v12 }
 0x46e   :  { %2828 = vmatpush.xpose.msk.msra.mxu1 %vm133_vm1, %v3610_v32  ;;  %v402_v32 = vpop.xlane.xlu1 %401 }
 0x46f   :  { %663 = vrot.lane.b32.xlu1 %v460_v25, %s3299_s20  ;;  %v2978_v28 = vpack.i.bf16 %v458_v20, %v459_v27 }
 0x471   :  { %2979 = vrot.lane.b32.xlu0 %v2978_v28, %s3299_s20  ;;  %v456_v28 = vmul.f32 %v3803_v38, %v3565_v58 }
 0x482   :  { %v556_v30 = vpop.xlane.xlu0 %555 }
 0x483   :  { %3091 = vrcp.f32 %v556_v30  ;;  %v457_v30 = vmul.f32 %v3803_v38, %v3577_v24 }
 0x484   :  { %3093 = vrcp.f32 %v559_v42  ;;  %v917_v42 = vmul.f32 %v3787_v59, %v3577_v24 }
 0x489   :  { %v3092_v16 = vpop.eup %3091 }
 0x48a   :  { %v399_v34 = vpop.xlane.xlu0 %398  ;;  %v570_v36 = vmul.f32 %v3092_v16, %v3086_v41  ;;  %v3094_v43 = vpop.eup %3093 }
 0x48b   :  { %v413_v39 = vsub.f32 %v382_v46, %v399_v34  ;;  %v571_v51 = vmul.f32 %v3094_v43, %v3732_v3  ;;  %v408_v3 = vpop.xlane.xlu1 %407 }
 0x48c   :  { %2797 = vmatmul.msk.f32.gmra.mxu1 %vm396_vm5, %v570_v36  ;;  %v416_v14 = vsub.f32 %v3747_v21, %v408_v3 }
 0x48d   :  { %v418_v40 = vmul.f32 1.442695, %v413_v39  ;;  %v918_v39 = vmul.f32 %v3787_v59, %v3561_v23 }
 0x48f   :  { %3095 = vpow2.f32 %v418_v40 }
 0x490   :  { %3097 = vrcp.f32 %v562_v19 }
 0x492   :  { %v405_v50 = vpop.xlane.xlu0 %404 }
 0x493   :  { %v415_v41 = vsub.f32 %v3765_v48, %v405_v50  ;;  %v920_v50 = vmul.f32 %v3787_v59, %v3557_v49 }
 0x494   :  { %2798 = vmatmul.msk.f32.gmra.mxu1 %vm396_vm5, %v571_v51  ;;  %v414_v51 = vsub.f32 %v3737_v7, %v402_v32  ;;  %v3884_v7 = vpop.permute.xlu2 %830 }
 0x495   :  { %v3821_v33 = vpop.eup %3095  ;;  %v422_v61 = vmul.f32 1.442695, %v415_v41  ;;  %v833_v32 = vmul.f32 %v3884_v7, %v3565_v58 }
 0x496   :  { %v428_v46 = vsel %vm396_vm5, %v3821_v33, 0.0  ;;  %v3098_v45 = vpop.eup %3097 }
 0x497   :  { %429 = vadd.xlane.f32.xlu2 %v428_v46  ;;  %v572_v6 = vmul.f32 %v3098_v45, %v3740_v11  ;;  %3099 = vpow2.f32 %v422_v61  ;;  %v424_v11 = vmul.f32 1.442695, %v416_v14  ;;  %v420_v46 = vmul.f32 1.442695, %v414_v51 }
 0x499   :  { %785 = vmax.xlane.f32.xlu1 %v784_v56 }
 0x49a   :  { %v412_v4 = vpop.xlane.xlu0 %411 }
 0x49b   :  { %v417_v8 = vsub.f32 %v3770_v31, %v412_v4  ;;  %v777_v31 = vpop.xlane.xlu1 %776 }
 0x49c   :  { %2799 = vmatmul.msk.f32.gmra.mxu1 %vm396_vm5, %v572_v6  ;;  %v790_v21 = vsub.f32 %v3752_v35, %v777_v31  ;;  %v2983_v35 = vpack.i.bf16 %v456_v28, %v457_v30 }
 0x49d   :  { %v426_v48 = vmul.f32 1.442695, %v417_v8  ;;  %v3839_v19 = vpop.eup %3099  ;;  %v834_v8 = vmul.f32 %v3884_v7, %v3577_v24 }
 0x49e   :  { %v434_v27 = vsel %vm396_vm5, %v3839_v19, 0.0  ;;  %v795_v16 = vmul.f32 1.442695, %v790_v21 }
 0x49f   :  { %3101 = vpow2.f32 %v426_v48  ;;  %v2993_v48 = vpack.i.bf16 %v833_v32, %v834_v8 }
 0x4a0   :  { %3103 = vpow2.f32 %v424_v11 }
 0x4a1   :  { %788 = vmax.xlane.f32.xlu1 %v787_v18  ;;  %3105 = vpow2.f32 %v795_v16 }
 0x4a2   :  { %v3875_v41 = vpop.xlane.xlu0 %779  ;;  %3107 = vpow2.f32 %v420_v46 }
 0x4a4   :  { %2829 = vmatmul.msk.f32.vlgmr.msra.gmra.mxu1 %vm133_vm1, %v916_v55 }
 0x4a5   :  { %v3842_v25 = vpop.eup %3101 }
 0x4a6   :  { %v440_v20 = vsel %vm409_vm6, %v3842_v25, 0.0  ;;  %v3856_v34 = vpop.eup %3103 }
 0x4a7   :  { %441 = vadd.xlane.f32.xlu0 %v440_v20  ;;  %v437_v36 = vsel %vm396_vm5, %v3856_v34, 0.0  ;;  %v3864_v40 = vpop.eup %3105 }
 0x4a8   :  { %v805_v43 = vsel %vm396_vm5, %v3864_v40, 0.0  ;;  %v3877_v56 = vpop.eup %3107 }
 0x4a9   :  { %435 = vadd.xlane.f32.xlu1 %v434_v27  ;;  %v431_v60 = vsel %vm396_vm5, %v3877_v56, 0.0 }
 0x4aa   :  { %v783_v45 = vpop.xlane.xlu0 %782 }
 0x4ac   :  { %2830 = vmatmul.msk.f32.gmra.mxu1 %vm133_vm1, %v917_v42 }
 0x4af   :  { %2984 = vrot.lane.b32.xlu2 %v2983_v35, %s3299_s20 }
 0x4b1   :  { %438 = vadd.xlane.f32.xlu1 %v437_v36 }
 0x4b4   :  { %2831 = vmatmul.msk.f32.gmra.mxu1 %vm133_vm1, %v918_v39 }
 0x4b9   :  { %806 = vadd.xlane.f32.xlu1 %v805_v43 }
 0x4bc   :  { %2832 = vmatmul.msk.f32.gmra.mxu1 %vm133_vm1, %v919_v47 }
 0x4bd   :  { %v3881_v3 = vpop.permute.xlu0 %1023 }
 0x4be   :  { %v1030_v14 = vmul.f32 %v3881_v3, %v3557_v49  ;;  %v1028_v55 = vmul.f32 %v3881_v3, %v3561_v23  ;;  %v1029_v11 = vmul.f32 %v3881_v3, %v3569_v12  ;;  %v1026_v21 = vmul.f32 %v3881_v3, %v3565_v58 }
 0x4bf   :  { %v1027_v27 = vmul.f32 %v3881_v3, %v3577_v24  ;;  %v792_v24 = vsub.f32 %v3780_v54, %v783_v45 }
 0x4c0   :  { %v2998_v31 = vpack.i.bf16 %v1028_v55, %v1029_v11 }
 0x4c1   :  { %v3003_v28 = vpack.i.bf16 %v1026_v21, %v1027_v27  ;;  %v799_v46 = vmul.f32 1.442695, %v792_v24 }
 0x4c4   :  { %2833 = vmatmul.msk.f32.gmra.mxu1 %vm133_vm1, %v920_v50 }
 0x4d8   :  { %432 = vadd.xlane.f32.xlu2 %v431_v60 }
 0x4da   :  { %v3893_v18 = vpop.f32.mrf.mxu1 }
 0x4e1   :  { %v664_v61 = vpop.permute.xlu1 %663 }
 0x4e2   :  { %2800 = vmatpush.msk.msra.mxu0 %vm615_vm7, %v664_v61  ;;  %v3901_v20 = vpop.f32.mrf.mxu1 }
 0x4e3   :  { %v2980_v59 = vpop.permute.xlu0 %2979 }
 0x4e4   :  { %v2981_v4 = vunpack.i.l.bf16 %v2980_v59  ;;  %v2982_v6 = vunpack.i.h.bf16 %v2980_v59 }
 0x4e6   :  { %698 = vmatpush.msra.mxu0 %v2981_v4 }
 0x4e8   :  { %699 = vmatpush.msra.mxu0 %v2982_v6 }
 0x4f0   :  { %2994 = vrot.lane.b32.xlu2 %v2993_v48, %s3299_s20 }
 0x4f8   :  { %1044 = vrot.lane.b32.xlu2 %v1030_v14, %s3299_s20  ;;  %v835_v14 = vmul.f32 %v3884_v7, %v3561_v23 }
 0x500   :  { %2999 = vrot.lane.b32.xlu2 %v2998_v31, %s3299_s20 }
 0x508   :  { %3004 = vrot.lane.b32.xlu2 %v3003_v28, %s3299_s20 }
 0x509   :  { %v3908_v30 = vpop.f32.mrf.mxu1 }
 0x50a   :  { %v430_v42 = vpop.xlane.xlu2 %429 }
 0x50b   :  { %3109 = vrcp.f32 %v430_v42 }
 0x50c   :  { %3111 = vpow2.f32 %v799_v46 }
 0x511   :  { %v3910_v16 = vpop.f32.mrf.mxu1  ;;  %v3110_v36 = vpop.eup %3109 }
 0x512   :  { %v2985_v35 = vpop.permute.xlu2 %2984  ;;  %v448_v47 = vmul.f32 %v3110_v36, %v3821_v33  ;;  %v3927_v4 = vpop.eup %3111 }
 0x513   :  { %v2986_v39 = vunpack.i.l.bf16 %v2985_v35  ;;  %v2987_v43 = vunpack.i.h.bf16 %v2985_v35  ;;  %v837_v35 = vmul.f32 %v3884_v7, %v3557_v49 }
 0x515   :  { %700 = vmatpush.msra.mxu0 %v2986_v39 }
 0x517   :  { %701 = vmatpush.msra.mxu0 %v2987_v43 }
 0x518   :  { %2801 = vmatmul.msk.f32.vlgmr.msra.gmra.mxu0 %vm396_vm5, %v448_v47 }
 0x519   :  { %v3914_v58 = vpop.f32.mrf.mxu1 }
 0x51a   :  { %v442_v47 = vpop.xlane.xlu0 %441 }
 0x521   :  { %v953_v50 = vpop.f32.mrf.mxu1 }
 0x522   :  { %v3918_v51 = vadd.f32 %v953_v50, %v3674_v52  ;;  %v811_v52 = vsel %vm396_vm5, %v3927_v4, 0.0 }
 0x524   :  { %v968_v60 = vsel %vm396_vm5, %v3918_v51, -inf }
 0x525   :  { %969 = vmax.xlane.f32.xlu1 %v968_v60 }
 0x529   :  { %v956_v61 = vpop.f32.mrf.mxu1 }
 0x52a   :  { %v3923_v33 = vadd.f32 %v956_v61, %v3681_v57  ;;  %v3936_v57 = vpop.xlane.xlu1 %785 }
 0x52c   :  { %v971_v59 = vsel %vm396_vm5, %v3923_v33, -inf }
 0x52d   :  { %972 = vmax.xlane.f32.xlu1 %v971_v59 }
 0x531   :  { %812 = vadd.xlane.f32.xlu2 %v811_v52  ;;  %v959_v54 = vpop.f32.mrf.mxu1 }
 0x532   :  { %v3932_v45 = vadd.f32 %v959_v54, %v3688_v62  ;;  %v836_v62 = vmul.f32 %v3884_v7, %v3569_v12  ;;  %v3950_v31 = vpop.xlane.xlu1 %788  ;;  %v791_v54 = vsub.f32 %v3775_v44, %v3875_v41 }
 0x534   :  { %v974_v6 = vsel %vm396_vm5, %v3932_v45, -inf  ;;  %v2988_v21 = vpack.i.bf16 %v835_v14, %v836_v62 }
 0x535   :  { %975 = vmax.xlane.f32.xlu0 %v974_v6 }
 0x539   :  { %v962_v32 = vpop.f32.mrf.mxu1 }
 0x53a   :  { %v3939_v8 = vadd.f32 %v962_v32, %v3698_v5  ;;  %v436_v28 = vpop.xlane.xlu1 %435 }
 0x53c   :  { %v977_v48 = vsel %vm396_vm5, %v3939_v8, -inf }
 0x53d   :  { %978 = vmax.xlane.f32.xlu0 %v977_v48 }
 0x541   :  { %v965_v55 = vpop.f32.mrf.mxu1 }
 0x542   :  { %v3948_v11 = vadd.f32 %v965_v55, %v3705_v9  ;;  %v439_v9 = vpop.xlane.xlu1 %438 }
 0x544   :  { %v980_v5 = vsel %vm409_vm6, %v3948_v11, -inf }
 0x545   :  { %981 = vmax.xlane.f32.xlu0 %v980_v5 }
 0x546   :  { %2989 = vrot.lane.b32.xlu1 %v2988_v21, %s3299_s20 }
 0x54a   :  { %v807_v32 = vpop.xlane.xlu1 %806 }
 0x54b   :  { %v433_v27 = vpop.xlane.xlu2 %432 }
 0x54c   :  { %3113 = vrcp.f32 %v433_v27 }
 0x54d   :  { %3115 = vrcp.f32 %v436_v28 }
 0x54e   :  { %3117 = vrcp.f32 %v439_v9 }
 0x54f   :  { %3119 = vrcp.f32 %v442_v47 }
 0x552   :  { %v3114_v23 = vpop.eup %3113 }
 0x553   :  { %v3955_v42 = vpop.permute.xlu2 %2994  ;;  %v449_v12 = vmul.f32 %v3114_v23, %v3877_v56  ;;  %v3116_v36 = vpop.eup %3115 }
 0x554   :  { %v450_v43 = vmul.f32 %v3116_v36, %v3839_v19  ;;  %v3118_v24 = vpop.eup %3117 }
 0x555   :  { %2802 = vmatmul.msk.f32.gmra.mxu0 %vm396_vm5, %v449_v12  ;;  %v451_v50 = vmul.f32 %v3118_v24, %v3856_v34  ;;  %v3120_v60 = vpop.eup %3119  ;;  %v797_v34 = vmul.f32 1.442695, %v791_v54 }
 0x556   :  { %v452_v19 = vmul.f32 %v3120_v60, %v3842_v25 }
 0x557   :  { %3121 = vpow2.f32 %v797_v34 }
 0x559   :  { %851 = vrot.lane.b32.xlu0 %v837_v35, %s3299_s20 }
 0x55b   :  { %v1045_v39 = vpop.permute.xlu2 %1044 }
 0x55c   :  { %2834 = vmatpush.msk.msrb.mxu0 %vm615_vm7, %v1045_v39 }
 0x55d   :  { %2803 = vmatmul.msk.f32.gmra.mxu0 %vm396_vm5, %v450_v43  ;;  %v3975_v25 = vpop.eup %3121 }
 0x55e   :  { %v808_v6 = vsel %vm396_vm5, %v3975_v25, 0.0 }
 0x563   :  { %v3000_v56 = vpop.permute.xlu2 %2999 }
 0x564   :  { %v3001_v46 = vunpack.i.l.bf16 %v3000_v56  ;;  %v3002_v49 = vunpack.i.h.bf16 %v3000_v56 }
 0x565   :  { %2804 = vmatmul.msk.f32.gmra.mxu0 %vm396_vm5, %v451_v50 }
 0x566   :  { %1079 = vmatpush.msrb.mxu0 %v3001_v46 }
 0x568   :  { %1080 = vmatpush.msrb.mxu0 %v3002_v49 }
 0x56b   :  { %v3005_v61 = vpop.permute.xlu2 %3004 }
 0x56c   :  { %v3006_v59 = vunpack.i.l.bf16 %v3005_v61  ;;  %v3007_v52 = vunpack.i.h.bf16 %v3005_v61 }
 0x56d   :  { %2805 = vmatmul.msk.f32.gmra.mxu0 %vm396_vm5, %v452_v19  ;;  %v2996_v19 = vunpack.i.l.bf16 %v3955_v42 }
 0x56e   :  { %1081 = vmatpush.msrb.mxu0 %v3006_v59  ;;  %v2997_v59 = vunpack.i.h.bf16 %v3955_v42 }
 0x570   :  { %1082 = vmatpush.msrb.mxu0 %v3007_v52 }
 0x572   :  { %1619 = vmatpush.msra.mxu0 %v3493_v63 }
 0x574   :  { %1620 = vmatpush.msra.mxu0 %v3500_v0 }
 0x576   :  { %1621 = vmatpush.msra.mxu0 %v3505_v1  ;;  %v793_v1 = vsub.f32 %v3818_v53, %v3936_v57 }
 0x578   :  { %1622 = vmatpush.msra.mxu0 %v3513_v2  ;;  %v801_v55 = vmul.f32 1.442695, %v793_v1 }
 0x583   :  { %809 = vadd.xlane.f32.xlu0 %v808_v6 }
 0x598   :  { %v970_v48 = vpop.xlane.xlu1 %969 }
 0x599   :  { %v983_v44 = vsub.f32 %v3918_v51, %v970_v48 }
 0x59b   :  { %v988_v41 = vmul.f32 1.442695, %v983_v44 }
 0x59d   :  { %3123 = vpow2.f32 %v988_v41 }
 0x5a0   :  { %v973_v63 = vpop.xlane.xlu1 %972 }
 0x5a1   :  { %v984_v0 = vsub.f32 %v3923_v33, %v973_v63  ;;  %v794_v33 = vsub.f32 %v3831_v10, %v3950_v31 }
 0x5a3   :  { %v3981_v14 = vpop.eup %3123  ;;  %v990_v2 = vmul.f32 1.442695, %v984_v0  ;;  %v803_v57 = vmul.f32 1.442695, %v794_v33 }
 0x5a4   :  { %v998_v62 = vsel %vm396_vm5, %v3981_v14, 0.0  ;;  %v813_v34 = vpop.xlane.xlu2 %812 }
 0x5a5   :  { %3125 = vpow2.f32 %v990_v2  ;;  %999 = vadd.xlane.f32.xlu1 %v998_v62 }
 0x5a6   :  { %3127 = vpow2.f32 %v801_v55 }
 0x5a8   :  { %v976_v5 = vpop.xlane.xlu0 %975 }
 0x5a9   :  { %v985_v51 = vsub.f32 %v3932_v45, %v976_v5 }
 0x5ab   :  { %v3988_v21 = vpop.eup %3125  ;;  %v992_v27 = vmul.f32 1.442695, %v985_v51 }
 0x5ac   :  { %v1001_v53 = vsel %vm396_vm5, %v3988_v21, 0.0  ;;  %v3994_v23 = vpop.eup %3127 }
 0x5ad   :  { %3129 = vpow2.f32 %v992_v27  ;;  %1002 = vadd.xlane.f32.xlu0 %v1001_v53  ;;  %v814_v10 = vsel %vm396_vm5, %v3994_v23, 0.0 }
 0x5ae   :  { %3131 = vpow2.f32 %v803_v57 }
 0x5b0   :  { %v979_v28 = vpop.xlane.xlu0 %978 }
 0x5b1   :  { %v986_v12 = vsub.f32 %v3939_v8, %v979_v28 }
 0x5b3   :  { %v3997_v9 = vpop.eup %3129  ;;  %v994_v45 = vmul.f32 1.442695, %v986_v12  ;;  %v4038_v12 = vld [vmem:[%s4988_s4 + $0x18] sm:$0xff] }
 0x5b4   :  { %v1004_v35 = vsel %vm396_vm5, %v3997_v9, 0.0  ;;  %v4003_v36 = vpop.eup %3131  ;;  %1131 = vmatpush.msrb.mxu2 %v4038_v12 }
 0x5b5   :  { %3133 = vpow2.f32 %v994_v45  ;;  %1005 = vadd.xlane.f32.xlu1 %v1004_v35  ;;  %815 = vadd.xlane.f32.xlu0 %v814_v10  ;;  %v817_v24 = vsel %vm409_vm6, %v4003_v36, 0.0  ;;  %v703_v45 = vpop.f32.mrf.mxu0  ;;  %v4050_v10 = vld [vmem:[%s4988_s4 + $0x8] sm:$0xff] }
 0x5b8   :  { %v982_v31 = vpop.xlane.xlu0 %981  ;;  %v2990_v46 = vpop.permute.xlu1 %2989 }
 0x5b9   :  { %v987_v39 = vsub.f32 %v3948_v11, %v982_v31  ;;  %v2991_v11 = vunpack.i.l.bf16 %v2990_v46  ;;  %v2992_v60 = vunpack.i.h.bf16 %v2990_v46  ;;  %v4056_v31 = vld [vmem:[%s4988_s4] sm:$0xff] }
 0x5bb   :  { %v4006_v43 = vpop.eup %3133  ;;  %v996_v8 = vmul.f32 1.442695, %v987_v39 }
 0x5bc   :  { %v1007_v47 = vsel %vm396_vm5, %v4006_v43, 0.0 }
 0x5bd   :  { %3135 = vpow2.f32 %v996_v8  ;;  %1008 = vadd.xlane.f32.xlu1 %v1007_v47  ;;  %818 = vadd.xlane.f32.xlu0 %v817_v24  ;;  %v704_v47 = vadd.f32 %v703_v45, %v3893_v18 }
 0x5be   :  { %3137 = vrcp.f32 %v807_v32 }
 0x5c3   :  { %v3136_v56 = vpop.eup %3135 }
 0x5c4   :  { %v1010_v50 = vsel %vm409_vm6, %v3136_v56, 0.0  ;;  %v3138_v61 = vpop.eup %3137 }
 0x5c5   :  { %1011 = vadd.xlane.f32.xlu0 %v1010_v50  ;;  %v825_v52 = vmul.f32 %v3138_v61, %v3864_v40 }
 0x5cb   :  { %v852_v49 = vpop.permute.xlu0 %851 }
 0x5cc   :  { %2817 = vmatpush.msk.msrb.mxu3 %vm615_vm7, %v852_v49 }
 0x5ce   :  { %886 = vmatpush.msrb.mxu3 %v2991_v11 }
 0x5d0   :  { %887 = vmatpush.msrb.mxu3 %v2992_v60 }
 0x5d2   :  { %888 = vmatpush.msrb.mxu3 %v2996_v19  ;;  %v706_v35 = vpop.f32.mrf.mxu0 }
 0x5d3   :  { %v707_v49 = vadd.f32 %v706_v35, %v3901_v20 }
 0x5d4   :  { %889 = vmatpush.msrb.mxu3 %v2997_v59 }
 0x5d5   :  { %2818 = vmatmul.msk.f32.vlgmr.msrb.gmra.mxu3 %vm396_vm5, %v825_v52 }
 0x5f6   :  { %v810_v54 = vpop.xlane.xlu0 %809 }
 0x5f7   :  { %3139 = vrcp.f32 %v810_v54 }
 0x5f8   :  { %3141 = vrcp.f32 %v813_v34 }
 0x5fd   :  { %v3140_v6 = vpop.eup %3139 }
 0x5fe   :  { %v826_v32 = vmul.f32 %v3140_v6, %v3975_v25  ;;  %v3142_v48 = vpop.eup %3141 }
 0x5ff   :  { %v827_v44 = vmul.f32 %v3142_v48, %v3927_v4 }
 0x600   :  { %2819 = vmatmul.msk.f32.gmra.mxu3 %vm396_vm5, %v826_v32 }
 0x608   :  { %2820 = vmatmul.msk.f32.gmra.mxu3 %vm396_vm5, %v827_v44 }
 0x618   :  { %v1000_v42 = vpop.xlane.xlu1 %999 }
 0x619   :  { %3143 = vrcp.f32 %v1000_v42 }
 0x61f   :  { %v3144_v40 = vpop.eup %3143 }
 0x620   :  { %v1018_v41 = vmul.f32 %v3144_v40, %v3981_v14  ;;  %v1003_v63 = vpop.xlane.xlu0 %1002 }
 0x621   :  { %3145 = vrcp.f32 %v1003_v63 }
 0x622   :  { %2835 = vmatmul.msk.f32.vlgmr.msrb.gmra.mxu0 %vm396_vm5, %v1018_v41 }
 0x627   :  { %v3146_v0 = vpop.eup %3145 }
 0x628   :  { %v816_v1 = vpop.xlane.xlu0 %815  ;;  %v1006_v2 = vpop.xlane.xlu1 %1005  ;;  %v1019_v25 = vmul.f32 %v3146_v0, %v3988_v21 }
 0x629   :  { %3147 = vrcp.f32 %v816_v1 }
 0x62a   :  { %3149 = vrcp.f32 %v1006_v2  ;;  %2836 = vmatmul.msk.f32.gmra.mxu0 %vm396_vm5, %v1019_v25 }
 0x62f   :  { %v3148_v4 = vpop.eup %3147 }
 0x630   :  { %v3150_v62 = vpop.eup %3149  ;;  %v819_v55 = vpop.xlane.xlu0 %818  ;;  %v828_v51 = vmul.f32 %v3148_v4, %v3994_v23 }
 0x631   :  { %v1009_v5 = vpop.xlane.xlu1 %1008  ;;  %3151 = vrcp.f32 %v819_v55  ;;  %v1020_v14 = vmul.f32 %v3150_v62, %v3997_v9  ;;  %v4043_v9 = vld [vmem:[%s4988_s4 + $0x10] sm:$0xff] }
 0x632   :  { %3153 = vrcp.f32 %v1009_v5  ;;  %2821 = vmatmul.msk.f32.gmra.mxu3 %vm396_vm5, %v828_v51  ;;  %1132 = vmatpush.msrb.mxu2 %v4043_v9 }
 0x633   :  { %2837 = vmatmul.msk.f32.gmra.mxu0 %vm396_vm5, %v1020_v14 }
 0x634   :  { %1133 = vmatpush.msrb.mxu2 %v4050_v10 }
 0x636   :  { %1134 = vmatpush.msrb.mxu2 %v4056_v31 }
 0x637   :  { %v3152_v33 = vpop.eup %3151 }
 0x638   :  { %v3154_v21 = vpop.eup %3153  ;;  %v1012_v27 = vpop.xlane.xlu0 %1011  ;;  %v829_v53 = vmul.f32 %v3152_v33, %v4003_v36 }
 0x639   :  { %3155 = vrcp.f32 %v1012_v27  ;;  %v1021_v57 = vmul.f32 %v3154_v21, %v4006_v43  ;;  %v709_v36 = vpop.f32.mrf.mxu0 }
 0x63a   :  { %2822 = vmatmul.msk.f32.gmra.mxu3 %vm396_vm5, %v829_v53  ;;  %v710_v59 = vadd.f32 %v709_v36, %v3908_v30  ;;  %v3055_v30 = vld [vmem:[%s4987_s5] ss:$0 sm:$0xff] }
 0x63b   :  { %2838 = vmatmul.msk.f32.gmra.mxu0 %vm396_vm5, %v1021_v57 }
 0x63f   :  { %v3156_v28 = vpop.eup %3155 }
 0x640   :  { %v1022_v23 = vmul.f32 %v3156_v28, %v3136_v56 }
 0x641   :  { %v712_v39 = vpop.f32.mrf.mxu0 }
 0x642   :  { %v713_v18 = vadd.f32 %v712_v39, %v3910_v16 }
 0x643   :  { %2839 = vmatmul.msk.f32.gmra.mxu0 %vm396_vm5, %v1022_v23 }
 0x649   :  { %v715_v43 = vpop.f32.mrf.mxu0 }
 0x64a   :  { %v716_v20 = vadd.f32 %v715_v43, %v3914_v58 }
 0x658   :  { %v891_v8 = vpop.f32.mrf.mxu3 }
 0x659   :  { %v906_v24 = vadd.f32 %v891_v8, %v704_v47 }
 0x683   :  { %v894_v46 = vpop.f32.mrf.mxu3 }
 0x684   :  { %v907_v11 = vadd.f32 %v894_v46, %v707_v49 }
 0x68b   :  { %v897_v19 = vpop.f32.mrf.mxu3 }
 0x68c   :  { %v908_v52 = vadd.f32 %v897_v19, %v710_v59 }
 0x69f   :  { %v1084_v56 = vpop.f32.mrf.mxu0 }
 0x6a0   :  { %v1099_v50 = vadd.f32 %v1084_v56, %v906_v24 }
 0x6a2   :  { %2840 = vmatmul.msk.f32.vlgmr.msrb.gmra.mxu2 %vm133_vm1, %v1099_v50 }
 0x6a7   :  { %v1087_v60 = vpop.f32.mrf.mxu0 }
 0x6a8   :  { %v1100_v61 = vadd.f32 %v1087_v60, %v907_v11 }
 0x6aa   :  { %2841 = vmatmul.msk.f32.gmra.mxu2 %vm133_vm1, %v1100_v61 }
 0x6b0   :  { %v1090_v54 = vpop.f32.mrf.mxu0 }
 0x6b1   :  { %v1101_v34 = vadd.f32 %v1090_v54, %v908_v52 }
 0x6b3   :  { %2842 = vmatmul.msk.f32.gmra.mxu2 %vm133_vm1, %v1101_v34 }
 0x6b5   :  { %v900_v6 = vpop.f32.mrf.mxu3 }
 0x6b6   :  { %v909_v32 = vadd.f32 %v900_v6, %v713_v18  ;;  %v1295_v6 = vld [vmem:[%s4992_s12 + $0x18] sm:$0xff] }
 0x6b7   :  { %1327 = vmatpush.msra.mxu3 %v1295_v6 }
 0x6b8   :  { %v1093_v48 = vpop.f32.mrf.mxu0 }
 0x6b9   :  { %v1102_v44 = vadd.f32 %v1093_v48, %v909_v32  ;;  %v1294_v32 = vld [vmem:[%s4992_s12 + $0x10] sm:$0xff]  ;;  %v1293_v48 = vld [vmem:[%s4992_s12 + $0x8] sm:$0xff] }
 0x6ba   :  { %1328 = vmatpush.msra.mxu3 %v1294_v32 }
 0x6bb   :  { %2843 = vmatmul.msk.f32.gmra.mxu2 %vm133_vm1, %v1102_v44  ;;  %v1292_v44 = vld [vmem:[%s4992_s12] sm:$0xff] }
 0x6bc   :  { %1329 = vmatpush.msra.mxu3 %v1293_v48 }
 0x6bd   :  { %v903_v42 = vpop.f32.mrf.mxu3 }
 0x6be   :  { %v910_v40 = vadd.f32 %v903_v42, %v716_v20  ;;  %1330 = vmatpush.msra.mxu3 %v1292_v44 }
 0x6c0   :  { %v1096_v41 = vpop.f32.mrf.mxu0 }
 0x6c1   :  { %v1103_v63 = vadd.f32 %v1096_v41, %v910_v40 }
 0x6c3   :  { %2844 = vmatmul.msk.f32.gmra.mxu2 %vm133_vm1, %v1103_v63 }
 0x725   :  { %v1136_v0 = vpop.f32.mrf.mxu2 }
 0x726   :  { %v1151_v16 = vadd.f32 %v1136_v0, %v3421_v13 }
 0x728   :  { %v4073_v1 = vadd.f32 %v3055_v30, %v1151_v16 }
 0x72a   :  { %v1166_v2 = vsel %vm133_vm1, %v4073_v1, 0.0 }
 0x72b   :  { %1167 = vadd.xlane.f32.xlu1 %v1166_v2 }
 0x72d   :  { %v1139_v58 = vpop.f32.mrf.mxu2 }
 0x72e   :  { %v1152_v25 = vadd.f32 %v1139_v58, %v3428_v17 }
 0x730   :  { %v4078_v4 = vadd.f32 %v3055_v30, %v1152_v25 }
 0x732   :  { %v1169_v62 = vsel %vm133_vm1, %v4078_v4, 0.0 }
 0x733   :  { %1170 = vadd.xlane.f32.xlu0 %v1169_v62 }
 0x736   :  { %v1142_v55 = vpop.f32.mrf.mxu2 }
 0x737   :  { %v1153_v5 = vadd.f32 %v1142_v55, %v3449_v29 }
 0x739   :  { %v4083_v51 = vadd.f32 %v3055_v30, %v1153_v5 }
 0x73b   :  { %v1172_v13 = vsel %vm133_vm1, %v4083_v51, 0.0 }
 0x73c   :  { %1173 = vadd.xlane.f32.xlu1 %v1172_v13 }
 0x73e   :  { %v1145_v14 = vpop.f32.mrf.mxu2 }
 0x73f   :  { %v1154_v33 = vadd.f32 %v1145_v14, %v3435_v22 }
 0x741   :  { %v4088_v21 = vadd.f32 %v3055_v30, %v1154_v33 }
 0x743   :  { %v1175_v17 = vsel %vm133_vm1, %v4088_v21, 0.0 }
 0x744   :  { %1176 = vadd.xlane.f32.xlu2 %v1175_v17  ;;  %v4150_v17 = vld [vmem:[%s4989_s10] ss:$0 sm:$0xff] }
 0x746   :  { %v1148_v27 = vpop.f32.mrf.mxu2 }
 0x747   :  { %v1155_v53 = vadd.f32 %v1148_v27, %v3442_v26 }
 0x749   :  { %v4093_v57 = vadd.f32 %v3055_v30, %v1155_v53 }
 0x74b   :  { %v1178_v29 = vsel %vm146_vm2, %v4093_v57, 0.0 }
 0x74c   :  { %1179 = vadd.xlane.f32.xlu0 %v1178_v29 }
 0x79e   :  { %v1168_v28 = vpop.xlane.xlu1 %1167 }
 0x79f   :  { %v1181_v23 = vmul.f32 %v1168_v28, %v3453_v37  ;;  %v4156_v28 = vld [vmem:[%s4990_s11] ss:$0 sm:$0xff] }
 0x7a1   :  { %v4099_v22 = vsub.f32 %v4073_v1, %v1181_v23 }
 0x7a3   :  { %v1191_v45 = vmul.f32 %v4099_v22, %v4099_v22 }
 0x7a5   :  { %v1196_v35 = vsel %vm133_vm1, %v1191_v45, 0.0 }
 0x7a6   :  { %v1171_v36 = vpop.xlane.xlu0 %1170  ;;  %1197 = vadd.xlane.f32.xlu1 %v1196_v35 }
 0x7a7   :  { %v1182_v26 = vmul.f32 %v1171_v36, %v3453_v37 }
 0x7a9   :  { %v4106_v39 = vsub.f32 %v4078_v4, %v1182_v26 }
 0x7ab   :  { %v1192_v43 = vmul.f32 %v4106_v39, %v4106_v39 }
 0x7ad   :  { %v1199_v8 = vsel %vm133_vm1, %v1192_v43, 0.0 }
 0x7ae   :  { %1200 = vadd.xlane.f32.xlu2 %v1199_v8 }
 0x7af   :  { %v1174_v47 = vpop.xlane.xlu1 %1173 }
 0x7b0   :  { %v1183_v24 = vmul.f32 %v1174_v47, %v3453_v37 }
 0x7b2   :  { %v4113_v56 = vsub.f32 %v4083_v51, %v1183_v24 }
 0x7b4   :  { %v1193_v50 = vmul.f32 %v4113_v56, %v4113_v56 }
 0x7b6   :  { %v1202_v46 = vsel %vm133_vm1, %v1193_v50, 0.0 }
 0x7b7   :  { %v1177_v49 = vpop.xlane.xlu2 %1176  ;;  %1203 = vadd.xlane.f32.xlu0 %v1202_v46 }
 0x7b8   :  { %v1184_v11 = vmul.f32 %v1177_v49, %v3453_v37 }
 0x7ba   :  { %v4120_v60 = vsub.f32 %v4088_v21, %v1184_v11 }
 0x7bc   :  { %v1194_v61 = vmul.f32 %v4120_v60, %v4120_v60 }
 0x7be   :  { %v1205_v19 = vsel %vm133_vm1, %v1194_v61, 0.0 }
 0x7bf   :  { %1206 = vadd.xlane.f32.xlu1 %v1205_v19  ;;  %v1180_v59 = vpop.xlane.xlu0 %1179 }
 0x7c0   :  { %v1185_v52 = vmul.f32 %v1180_v59, %v3453_v37 }
 0x7c2   :  { %v4127_v54 = vsub.f32 %v4093_v57, %v1185_v52 }
 0x7c4   :  { %v1195_v34 = vmul.f32 %v4127_v54, %v4127_v54 }
 0x7c6   :  { %v1208_v18 = vsel %vm146_vm2, %v1195_v34, 0.0 }
 0x7c7   :  { %1209 = vadd.xlane.f32.xlu2 %v1208_v18 }
 0x819   :  { %v1198_v20 = vpop.xlane.xlu1 %1197 }
 0x81a   :  { %v1211_v42 = vmul.f32 %v1198_v20, %v3453_v37 }
 0x81c   :  { %v1216_v40 = vadd.f32 1e-05, %v1211_v42 }
 0x81e   :  { %3157 = vrsqrt.f32 %v1216_v40  ;;  %vm1227_vm9 = vweird.f32 %v1216_v40 }
 0x821   :  { %v1201_v41 = vpop.xlane.xlu2 %1200 }
 0x822   :  { %v1212_v63 = vmul.f32 %v1201_v41, %v3453_v37 }
 0x824   :  { %v3158_v30 = vpop.eup %3157  ;;  %v1217_v0 = vadd.f32 1e-05, %v1212_v63 }
 0x825   :  { %v1222_v16 = vmul.f32 %v3158_v30, %v1216_v40  ;;  %vm1228_vm8 = vweird.f32 %v3158_v30 }
 0x826   :  { %3159 = vrsqrt.f32 %v1217_v0  ;;  %vm1229_vm10 = vmor %vm1227_vm9, %vm1228_vm8  ;;  %vm1237_vm12 = vweird.f32 %v1217_v0 }
 0x827   :  { %v1223_v2 = vmul.f32 %v3158_v30, %v1222_v16 }
 0x829   :  { %v1224_v58 = vmul.f32 0.5, %v1223_v2 }
 0x82a   :  { %v1204_v25 = vpop.xlane.xlu0 %1203 }
 0x82b   :  { %v1225_v62 = vsub.f32 1.5, %v1224_v58  ;;  %v1213_v55 = vmul.f32 %v1204_v25, %v3453_v37 }
 0x82c   :  { %v3160_v5 = vpop.eup %3159 }
 0x82d   :  { %v1226_v13 = vmul.f32 %v3158_v30, %v1225_v62  ;;  %v1232_v14 = vmul.f32 %v3160_v5, %v1217_v0  ;;  %v1218_v33 = vadd.f32 1e-05, %v1213_v55  ;;  %vm1238_vm11 = vweird.f32 %v3160_v5 }
 0x82e   :  { %vm1239_vm13 = vmor %vm1237_vm12, %vm1238_vm11  ;;  %vm1400_vm12 = vcmask 523264  }
 0x82f   :  { %v1230_v27 = vsel %vm1229_vm10, %v3158_v30, %v1226_v13  ;;  %v1233_v53 = vmul.f32 %v3160_v5, %v1232_v14  ;;  %3161 = vrsqrt.f32 %v1218_v33  ;;  %vm1247_vm15 = vweird.f32 %v1218_v33 }
 0x830   :  { %v1271_v29 = vmul.f32 %v1230_v27, %v4099_v22 }
 0x831   :  { %v1234_v23 = vmul.f32 0.5, %v1233_v53 }
 0x832   :  { %v1279_v45 = vmul.f32 %v4150_v17, %v1271_v29  ;;  %v1207_v35 = vpop.xlane.xlu1 %1206  ;;  %v1398_v29 = vld [vmem:[%s4994_s14 + $0x30] sm:$0xff] }
 0x833   :  { %v1235_v36 = vsub.f32 1.5, %v1234_v23  ;;  %v1214_v26 = vmul.f32 %v1207_v35, %v3453_v37  ;;  %v1394_v23 = vld [vmem:[%s4994_s14 + $0x10] sm:$0xff]  ;;  %v1392_v35 = vld [vmem:[%s4994_s14] sm:$0xff] }
 0x834   :  { %v1287_v43 = vadd.f32 %v4156_v28, %v1279_v45  ;;  %v1393_v45 = vld [vmem:[%s4994_s14 + $0x8] sm:$0xff] }
 0x835   :  { %v3162_v8 = vpop.eup %3161  ;;  %v1236_v47 = vmul.f32 %v3160_v5, %v1235_v36  ;;  %v1219_v24 = vadd.f32 1e-05, %v1214_v26  ;;  %v3058_v36 = vld [vmem:[%s4991_s13] ss:$0 sm:$0xff] }
 0x836   :  { %v1242_v22 = vmul.f32 %v3162_v8, %v1218_v33  ;;  %2845 = vmatmul.msk.f32.vlgmr.msra.gmra.mxu3 %vm133_vm1, %v1287_v43  ;;  %vm1248_vm14 = vweird.f32 %v3162_v8 }
 0x837   :  { %v1240_v50 = vsel %vm1239_vm13, %v3160_v5, %v1236_v47  ;;  %3163 = vrsqrt.f32 %v1219_v24  ;;  %vm1249_vm0 = vmor %vm1247_vm15, %vm1248_vm14  ;;  %vm1257_vm4 = vweird.f32 %v1219_v24 }
 0x838   :  { %v1243_v46 = vmul.f32 %v3162_v8, %v1242_v22  ;;  %v1272_v49 = vmul.f32 %v1240_v50, %v4106_v39 }
 0x83a   :  { %v1244_v11 = vmul.f32 0.5, %v1243_v46  ;;  %v1210_v61 = vpop.xlane.xlu2 %1209  ;;  %v1280_v19 = vmul.f32 %v4150_v17, %v1272_v49 }
 0x83b   :  { %v1215_v59 = vmul.f32 %v1210_v61, %v3453_v37 }
 0x83c   :  { %v1245_v52 = vsub.f32 1.5, %v1244_v11  ;;  %v1288_v34 = vadd.f32 %v4156_v28, %v1280_v19 }
 0x83d   :  { %v3164_v18 = vpop.eup %3163  ;;  %v1220_v6 = vadd.f32 1e-05, %v1215_v59 }
 0x83e   :  { %v1246_v32 = vmul.f32 %v3162_v8, %v1245_v52  ;;  %v1252_v48 = vmul.f32 %v3164_v18, %v1219_v24  ;;  %2846 = vmatmul.msk.f32.gmra.mxu3 %vm133_vm1, %v1288_v34  ;;  %vm1258_vm3 = vweird.f32 %v3164_v18 }
 0x83f   :  { %3165 = vrsqrt.f32 %v1220_v6  ;;  %vm1259_vm8 = vmor %vm1257_vm4, %vm1258_vm3  ;;  %vm1267_vm10 = vweird.f32 %v1220_v6 }
 0x840   :  { %v1250_v39 = vsel %vm1249_vm0, %v3162_v8, %v1246_v32  ;;  %v1253_v44 = vmul.f32 %v3164_v18, %v1252_v48 }
 0x841   :  { %v1273_v20 = vmul.f32 %v1250_v39, %v4113_v56 }
 0x842   :  { %v1254_v42 = vmul.f32 0.5, %v1253_v44 }
 0x843   :  { %v1281_v40 = vmul.f32 %v4150_v17, %v1273_v20 }
 0x844   :  { %v1255_v41 = vsub.f32 1.5, %v1254_v42 }
 0x845   :  { %v3166_v63 = vpop.eup %3165  ;;  %v1289_v30 = vadd.f32 %v4156_v28, %v1281_v40 }
 0x846   :  { %v1256_v0 = vmul.f32 %v3164_v18, %v1255_v41  ;;  %v1262_v16 = vmul.f32 %v3166_v63, %v1220_v6  ;;  %vm1268_vm9 = vweird.f32 %v3166_v63 }
 0x847   :  { %2847 = vmatmul.msk.f32.gmra.mxu3 %vm133_vm1, %v1289_v30  ;;  %vm1269_vm11 = vmor %vm1267_vm10, %vm1268_vm9 }
 0x848   :  { %v1260_v2 = vsel %vm1259_vm8, %v3164_v18, %v1256_v0  ;;  %v1263_v58 = vmul.f32 %v3166_v63, %v1262_v16 }
 0x849   :  { %v1274_v25 = vmul.f32 %v1260_v2, %v4120_v60  ;;  %v1399_v60 = vld [vmem:[%s4994_s14 + $0x38] sm:$0xff] }
 0x84a   :  { %v1264_v62 = vmul.f32 0.5, %v1263_v58  ;;  %1424 = vmatpush.msrb.mxu1 %v1399_v60 }
 0x84b   :  { %v1282_v56 = vmul.f32 %v4150_v17, %v1274_v25 }
 0x84c   :  { %v1265_v55 = vsub.f32 1.5, %v1264_v62  ;;  %1425 = vmatpush.msrb.mxu1 %v1398_v29 }
 0x84d   :  { %v1290_v5 = vadd.f32 %v4156_v28, %v1282_v56 }
 0x84e   :  { %v1266_v13 = vmul.f32 %v3166_v63, %v1265_v55 }
 0x84f   :  { %2848 = vmatmul.msk.f32.gmra.mxu3 %vm133_vm1, %v1290_v5 }
 0x850   :  { %v1270_v14 = vsel %vm1269_vm11, %v3166_v63, %v1266_v13 }
 0x851   :  { %v1275_v33 = vmul.f32 %v1270_v14, %v4127_v54  ;;  %v1397_v54 = vld [vmem:[%s4994_s14 + $0x28] sm:$0xff] }
 0x852   :  { %1426 = vmatpush.msrb.mxu1 %v1397_v54 }
 0x853   :  { %v1283_v27 = vmul.f32 %v4150_v17, %v1275_v33  ;;  %v1396_v17 = vld [vmem:[%s4994_s14 + $0x20] sm:$0xff] }
 0x854   :  { %1427 = vmatpush.msrb.mxu1 %v1396_v17 }
 0x855   :  { %v1291_v53 = vadd.f32 %v4156_v28, %v1283_v27  ;;  %v1395_v28 = vld [vmem:[%s4994_s14 + $0x18] sm:$0xff] }
 0x856   :  { %1428 = vmatpush.msrb.mxu1 %v1395_v28 }
 0x857   :  { %2849 = vmatmul.msk.f32.gmra.mxu3 %vm133_vm1, %v1291_v53 }
 0x858   :  { %1429 = vmatpush.msrb.mxu1 %v1394_v23 }
 0x85a   :  { %1430 = vmatpush.msrb.mxu1 %v1393_v45 }
 0x85c   :  { %1431 = vmatpush.msrb.mxu1 %v1392_v35 }
 0x8b9   :  { %v1332_v26 = vpop.f32.mrf.mxu3 }
 0x8ba   :  { %v1333_v43 = vadd.f32 %v3058_v36, %v1332_v26 }
 0x8bc   :  { %v1347_v8 = vmul.f32 %v1333_v43, %v1333_v43 }
 0x8be   :  { %v1352_v47 = vmul.f32 %v1347_v8, %v1333_v43 }
 0x8c0   :  { %v1357_v24 = vmul.f32 0.044715, %v1352_v47 }
 0x8c1   :  { %v1335_v22 = vpop.f32.mrf.mxu3 }
 0x8c2   :  { %v1362_v50 = vadd.f32 %v1357_v24, %v1333_v43  ;;  %v1336_v46 = vadd.f32 %v3058_v36, %v1335_v22  ;;  %v3059_v22 = vld [vmem:[%s4993_s15] ss:$0 sm:$0xff] }
 0x8c4   :  { %v1367_v49 = vmul.f32 0.7978846, %v1362_v50  ;;  %v1348_v11 = vmul.f32 %v1336_v46, %v1336_v46 }
 0x8c6   :  { %3167 = vtanh.f32 %v1367_v49  ;;  %v1353_v61 = vmul.f32 %v1348_v11, %v1336_v46 }
 0x8c8   :  { %v1358_v19 = vmul.f32 0.044715, %v1353_v61 }
 0x8ca   :  { %v1363_v59 = vadd.f32 %v1358_v19, %v1336_v46  ;;  %v1338_v52 = vpop.f32.mrf.mxu3 }
 0x8cb   :  { %v1339_v34 = vadd.f32 %v3058_v36, %v1338_v52 }
 0x8cc   :  { %v3168_v18 = vpop.eup %3167  ;;  %v1368_v6 = vmul.f32 0.7978846, %v1363_v59 }
 0x8cd   :  { %v1377_v32 = vadd.f32 1.0, %v3168_v18  ;;  %v1349_v48 = vmul.f32 %v1339_v34, %v1339_v34 }
 0x8ce   :  { %3169 = vtanh.f32 %v1368_v6 }
 0x8cf   :  { %v1382_v39 = vmul.f32 0.5, %v1377_v32  ;;  %v1354_v44 = vmul.f32 %v1349_v48, %v1339_v34 }
 0x8d1   :  { %v1387_v20 = vmul.f32 %v1382_v39, %v1333_v43  ;;  %v1359_v42 = vmul.f32 0.044715, %v1354_v44 }
 0x8d2   :  { %v1341_v40 = vpop.f32.mrf.mxu3 }
 0x8d3   :  { %v1364_v41 = vadd.f32 %v1359_v42, %v1339_v34  ;;  %v1342_v63 = vadd.f32 %v3058_v36, %v1341_v40  ;;  %2850 = vmatmul.msk.f32.vlgmr.msrb.gmra.mxu1 %vm1400_vm12, %v1387_v20 }
 0x8d4   :  { %v3170_v30 = vpop.eup %3169 }
 0x8d5   :  { %v1350_v0 = vmul.f32 %v1342_v63, %v1342_v63  ;;  %v1378_v16 = vadd.f32 1.0, %v3170_v30  ;;  %v1369_v2 = vmul.f32 0.7978846, %v1364_v41 }
 0x8d7   :  { %v1355_v58 = vmul.f32 %v1350_v0, %v1342_v63  ;;  %v1383_v25 = vmul.f32 0.5, %v1378_v16  ;;  %3171 = vtanh.f32 %v1369_v2 }
 0x8d9   :  { %v1360_v62 = vmul.f32 0.044715, %v1355_v58  ;;  %v1388_v56 = vmul.f32 %v1383_v25, %v1336_v46 }
 0x8da   :  { %v1344_v55 = vpop.f32.mrf.mxu3 }
 0x8db   :  { %v1365_v5 = vadd.f32 %v1360_v62, %v1342_v63  ;;  %v1345_v13 = vadd.f32 %v3058_v36, %v1344_v55  ;;  %2851 = vmatmul.msk.f32.gmra.mxu1 %vm1400_vm12, %v1388_v56 }
 0x8dd   :  { %v3172_v14 = vpop.eup %3171  ;;  %v1351_v33 = vmul.f32 %v1345_v13, %v1345_v13  ;;  %v1370_v27 = vmul.f32 0.7978846, %v1365_v5 }
 0x8de   :  { %v1379_v53 = vadd.f32 1.0, %v3172_v14 }
 0x8df   :  { %v1356_v60 = vmul.f32 %v1351_v33, %v1345_v13  ;;  %3173 = vtanh.f32 %v1370_v27 }
 0x8e0   :  { %v1384_v29 = vmul.f32 0.5, %v1379_v53 }
 0x8e1   :  { %v1361_v54 = vmul.f32 0.044715, %v1356_v60 }
 0x8e2   :  { %v1389_v17 = vmul.f32 %v1384_v29, %v1339_v34 }
 0x8e3   :  { %v1366_v28 = vadd.f32 %v1361_v54, %v1345_v13 }
 0x8e4   :  { %2852 = vmatmul.msk.f32.gmra.mxu1 %vm1400_vm12, %v1389_v17 }
 0x8e5   :  { %v3174_v23 = vpop.eup %3173  ;;  %v1371_v45 = vmul.f32 0.7978846, %v1366_v28 }
 0x8e6   :  { %v1380_v35 = vadd.f32 1.0, %v3174_v23 }
 0x8e7   :  { %3175 = vtanh.f32 %v1371_v45 }
 0x8e8   :  { %v1385_v26 = vmul.f32 0.5, %v1380_v35 }
 0x8ea   :  { %v1390_v36 = vmul.f32 %v1385_v26, %v1342_v63 }
 0x8ec   :  { %2853 = vmatmul.msk.f32.gmra.mxu1 %vm1400_vm12, %v1390_v36 }
 0x8ed   :  { %v3176_v43 = vpop.eup %3175 }
 0x8ee   :  { %v1381_v8 = vadd.f32 1.0, %v3176_v43 }
 0x8f0   :  { %v1386_v47 = vmul.f32 0.5, %v1381_v8 }
 0x8f2   :  { %v1391_v24 = vmul.f32 %v1386_v47, %v1345_v13 }
 0x8f4   :  { %2854 = vmatmul.msk.f32.gmra.mxu1 %vm1400_vm12, %v1391_v24 }
 0x950   :  { %v1433_v50 = vpop.f32.mrf.mxu1 }
 0x951   :  { %v1448_v46 = vadd.f32 %v1433_v50, %v4073_v1 }
 0x953   :  { %v4215_v49 = vadd.f32 %v3059_v22, %v1448_v46 }
 0x955   :  { %v1466_v11 = vsel %vm133_vm1, %v4215_v49, 0.0 }
 0x956   :  { %1467 = vadd.xlane.f32.xlu0 %v1466_v11 }
 0x958   :  { %v1436_v61 = vpop.f32.mrf.mxu1 }
 0x959   :  { %v1449_v19 = vadd.f32 %v1436_v61, %v4078_v4 }
 0x95b   :  { %v4220_v59 = vadd.f32 %v3059_v22, %v1449_v19 }
 0x95d   :  { %v1469_v52 = vsel %vm133_vm1, %v4220_v59, 0.0 }
 0x95e   :  { %1470 = vadd.xlane.f32.xlu1 %v1469_v52 }
 0x961   :  { %v1439_v34 = vpop.f32.mrf.mxu1 }
 0x962   :  { %v1450_v18 = vadd.f32 %v1439_v34, %v4083_v51 }
 0x964   :  { %v4225_v6 = vadd.f32 %v3059_v22, %v1450_v18  ;;  %v4276_v18 = vld [vmem:[%s4982_s8 + $0x1] ss:$0 sm:$0xff] }
 0x966   :  { %v1472_v1 = vsel %vm133_vm1, %v4225_v6, 0.0 }
 0x967   :  { %1473 = vadd.xlane.f32.xlu2 %v1472_v1 }
 0x969   :  { %v1442_v32 = vpop.f32.mrf.mxu1 }
 0x96a   :  { %v1451_v48 = vadd.f32 %v1442_v32, %v4088_v21 }
 0x96c   :  { %v4230_v39 = vadd.f32 %v3059_v22, %v1451_v48  ;;  %v4281_v48 = vld [vmem:[%s4983_s9 + $0x1] ss:$0 sm:$0xff] }
 0x96e   :  { %v1475_v4 = vsel %vm133_vm1, %v4230_v39, 0.0 }
 0x96f   :  { %1476 = vadd.xlane.f32.xlu0 %v1475_v4 }
 0x971   :  { %v1445_v44 = vpop.f32.mrf.mxu1 }
 0x972   :  { %v1452_v20 = vadd.f32 %v1445_v44, %v4093_v57 }
 0x974   :  { %v4235_v42 = vadd.f32 %v3059_v22, %v1452_v20 }
 0x976   :  { %v1478_v51 = vsel %vm146_vm2, %v4235_v42, 0.0 }
 0x977   :  { %1479 = vadd.xlane.f32.xlu1 %v1478_v51 }
 0x9c9   :  { %v1468_v40 = vpop.xlane.xlu0 %1467 }
 0x9ca   :  { %v1481_v41 = vmul.f32 %v1468_v40, %v3453_v37 }
 0x9cc   :  { %v1486_v21 = vsub.f32 %v4215_v49, %v1481_v41 }
 0x9ce   :  { %v1491_v63 = vmul.f32 %v1486_v21, %v1486_v21 }
 0x9d0   :  { %v1496_v30 = vsel %vm133_vm1, %v1491_v63, 0.0 }
 0x9d1   :  { %v1471_v0 = vpop.xlane.xlu1 %1470  ;;  %1497 = vadd.xlane.f32.xlu2 %v1496_v30 }
 0x9d2   :  { %v1482_v16 = vmul.f32 %v1471_v0, %v3453_v37 }
 0x9d4   :  { %v4244_v57 = vsub.f32 %v4220_v59, %v1482_v16 }
 0x9d6   :  { %v1492_v2 = vmul.f32 %v4244_v57, %v4244_v57 }
 0x9d8   :  { %v1499_v58 = vsel %vm133_vm1, %v1492_v2, 0.0 }
 0x9d9   :  { %1500 = vadd.xlane.f32.xlu0 %v1499_v58 }
 0x9da   :  { %v1474_v25 = vpop.xlane.xlu2 %1473 }
 0x9db   :  { %v1483_v62 = vmul.f32 %v1474_v25, %v3453_v37 }
 0x9dd   :  { %v4251_v56 = vsub.f32 %v4225_v6, %v1483_v62 }
 0x9df   :  { %v1493_v55 = vmul.f32 %v4251_v56, %v4251_v56 }
 0x9e1   :  { %v1502_v5 = vsel %vm133_vm1, %v1493_v55, 0.0 }
 0x9e2   :  { %1503 = vadd.xlane.f32.xlu1 %v1502_v5  ;;  %v1477_v13 = vpop.xlane.xlu0 %1476 }
 0x9e3   :  { %v1484_v14 = vmul.f32 %v1477_v13, %v3453_v37 }
 0x9e5   :  { %v4258_v33 = vsub.f32 %v4230_v39, %v1484_v14 }
 0x9e7   :  { %v1494_v27 = vmul.f32 %v4258_v33, %v4258_v33 }
 0x9e9   :  { %v1505_v53 = vsel %vm133_vm1, %v1494_v27, 0.0 }
 0x9ea   :  { %v1480_v60 = vpop.xlane.xlu1 %1479  ;;  %1506 = vadd.xlane.f32.xlu2 %v1505_v53 }
 0x9eb   :  { %v1485_v29 = vmul.f32 %v1480_v60, %v3453_v37 }
 0x9ed   :  { %v4265_v54 = vsub.f32 %v4235_v42, %v1485_v29 }
 0x9ef   :  { %v1495_v17 = vmul.f32 %v4265_v54, %v4265_v54 }
 0x9f1   :  { %v1508_v28 = vsel %vm146_vm2, %v1495_v17, 0.0 }
 0x9f2   :  { %1509 = vadd.xlane.f32.xlu0 %v1508_v28 }
 0xa44   :  { %v1498_v23 = vpop.xlane.xlu2 %1497 }
 0xa45   :  { %v1511_v45 = vmul.f32 %v1498_v23, %v3453_v37 }
 0xa47   :  { %v1516_v35 = vadd.f32 1e-05, %v1511_v45 }
 0xa49   :  { %3177 = vrsqrt.f32 %v1516_v35  ;;  %vm1527_vm14 = vweird.f32 %v1516_v35 }
 0xa4c   :  { %v1501_v26 = vpop.xlane.xlu0 %1500 }
 0xa4d   :  { %v1512_v36 = vmul.f32 %v1501_v26, %v3453_v37 }
 0xa4f   :  { %v3178_v43 = vpop.eup %3177  ;;  %v1517_v8 = vadd.f32 1e-05, %v1512_v36 }
 0xa50   :  { %v1522_v47 = vmul.f32 %v3178_v43, %v1516_v35  ;;  %vm1528_vm13 = vweird.f32 %v3178_v43 }
 0xa51   :  { %3179 = vrsqrt.f32 %v1517_v8  ;;  %vm1529_vm15 = vmor %vm1527_vm14, %vm1528_vm13  ;;  %vm1537_vm3 = vweird.f32 %v1517_v8 }
 0xa52   :  { %v1523_v24 = vmul.f32 %v3178_v43, %v1522_v47 }
 0xa54   :  { %v1524_v22 = vmul.f32 0.5, %v1523_v24 }
 0xa55   :  { %v1504_v50 = vpop.xlane.xlu1 %1503 }
 0xa56   :  { %v1525_v46 = vsub.f32 1.5, %v1524_v22  ;;  %v1513_v11 = vmul.f32 %v1504_v50, %v3453_v37 }
 0xa57   :  { %v3180_v61 = vpop.eup %3179 }
 0xa58   :  { %v1526_v19 = vmul.f32 %v3178_v43, %v1525_v46  ;;  %v1532_v52 = vmul.f32 %v3180_v61, %v1517_v8  ;;  %v1518_v34 = vadd.f32 1e-05, %v1513_v11  ;;  %vm1538_vm0 = vweird.f32 %v3180_v61 }
 0xa59   :  { %vm1539_vm4 = vmor %vm1537_vm3, %vm1538_vm0 }
 0xa5a   :  { %v1530_v1 = vsel %vm1529_vm15, %v3178_v43, %v1526_v19  ;;  %v1533_v32 = vmul.f32 %v3180_v61, %v1532_v52  ;;  %3181 = vrsqrt.f32 %v1518_v34  ;;  %vm1547_vm9 = vweird.f32 %v1518_v34 }
 0xa5b   :  { %v1571_v4 = vmul.f32 %v1530_v1, %v1486_v21 }
 0xa5c   :  { %v1534_v44 = vmul.f32 0.5, %v1533_v32 }
 0xa5d   :  { %v1579_v20 = vmul.f32 %v4276_v18, %v1571_v4  ;;  %v1507_v51 = vpop.xlane.xlu2 %1506 }
 0xa5e   :  { %v1535_v40 = vsub.f32 1.5, %v1534_v44  ;;  %v1514_v41 = vmul.f32 %v1507_v51, %v3453_v37 }
 0xa5f   :  { %v1587_v63 = vadd.f32 %v4281_v48, %v1579_v20 }
 0xa60   :  { %v3182_v30 = vpop.eup %3181  ;;  %v1536_v0 = vmul.f32 %v3180_v61, %v1535_v40  ;;  %v1519_v16 = vadd.f32 1e-05, %v1514_v41 }
 0xa61   :  { %v1542_v2 = vmul.f32 %v3182_v30, %v1518_v34  ;;  %2857 = vmatmul.msk.f32.vlgmr.msra.gmra.mxu0 %vm133_vm1, %v1587_v63  ;;  %vm1548_vm8 = vweird.f32 %v3182_v30 }
 0xa62   :  { %v1540_v58 = vsel %vm1539_vm4, %v3180_v61, %v1536_v0  ;;  %3183 = vrsqrt.f32 %v1519_v16  ;;  %vm1549_vm10 = vmor %vm1547_vm9, %vm1548_vm8  ;;  %vm1557_vm13 = vweird.f32 %v1519_v16 }
 0xa63   :  { %v1543_v21 = vmul.f32 %v3182_v30, %v1542_v2  ;;  %v1572_v25 = vmul.f32 %v1540_v58, %v4244_v57 }
 0xa65   :  { %v1544_v62 = vmul.f32 0.5, %v1543_v21  ;;  %v1510_v55 = vpop.xlane.xlu0 %1509  ;;  %v1580_v5 = vmul.f32 %v4276_v18, %v1572_v25 }
 0xa66   :  { %v1515_v13 = vmul.f32 %v1510_v55, %v3453_v37 }
 0xa67   :  { %v1545_v14 = vsub.f32 1.5, %v1544_v62  ;;  %v1588_v27 = vadd.f32 %v4281_v48, %v1580_v5 }
 0xa68   :  { %v3184_v53 = vpop.eup %3183  ;;  %v1520_v60 = vadd.f32 1e-05, %v1515_v13 }
 0xa69   :  { %v1546_v29 = vmul.f32 %v3182_v30, %v1545_v14  ;;  %v1552_v17 = vmul.f32 %v3184_v53, %v1519_v16  ;;  %2858 = vmatmul.msk.f32.gmra.mxu0 %vm133_vm1, %v1588_v27  ;;  %vm1558_vm11 = vweird.f32 %v3184_v53 }
 0xa6a   :  { %3185 = vrsqrt.f32 %v1520_v60  ;;  %vm1559_vm14 = vmor %vm1557_vm13, %vm1558_vm11  ;;  %vm1567_vm0 = vweird.f32 %v1520_v60 }
 0xa6b   :  { %v1550_v57 = vsel %vm1549_vm10, %v3182_v30, %v1546_v29  ;;  %v1553_v28 = vmul.f32 %v3184_v53, %v1552_v17 }
 0xa6c   :  { %v1573_v23 = vmul.f32 %v1550_v57, %v4251_v56 }
 0xa6d   :  { %v1554_v45 = vmul.f32 0.5, %v1553_v28 }
 0xa6e   :  { %v1581_v35 = vmul.f32 %v4276_v18, %v1573_v23 }
 0xa6f   :  { %v1555_v26 = vsub.f32 1.5, %v1554_v45 }
 0xa70   :  { %v3186_v36 = vpop.eup %3185  ;;  %v1589_v43 = vadd.f32 %v4281_v48, %v1581_v35 }
 0xa71   :  { %v1556_v8 = vmul.f32 %v3184_v53, %v1555_v26  ;;  %v1562_v47 = vmul.f32 %v3186_v36, %v1520_v60  ;;  %vm1568_vm15 = vweird.f32 %v3186_v36 }
 0xa72   :  { %2859 = vmatmul.msk.f32.gmra.mxu0 %vm133_vm1, %v1589_v43  ;;  %vm1569_vm3 = vmor %vm1567_vm0, %vm1568_vm15 }
 0xa73   :  { %v1560_v24 = vsel %vm1559_vm14, %v3184_v53, %v1556_v8  ;;  %v1563_v22 = vmul.f32 %v3186_v36, %v1562_v47  ;;  %v3288_v8 = vld [vmem:[%s4985_s6 + $0x1] ss:$0 sm:$0xff] }
 0xa74   :  { %v1574_v50 = vmul.f32 %v1560_v24, %v4258_v33 }
 0xa75   :  { %v1564_v46 = vmul.f32 0.5, %v1563_v22 }
 0xa76   :  { %v1582_v56 = vmul.f32 %v4276_v18, %v1574_v50 }
 0xa77   :  { %v1565_v11 = vsub.f32 1.5, %v1564_v46 }
 0xa78   :  { %v1590_v61 = vadd.f32 %v4281_v48, %v1582_v56 }
 0xa79   :  { %v1566_v19 = vmul.f32 %v3186_v36, %v1565_v11 }
 0xa7a   :  { %2860 = vmatmul.msk.f32.gmra.mxu0 %vm133_vm1, %v1590_v61 }
 0xa7b   :  { %v1570_v52 = vsel %vm1569_vm3, %v3186_v36, %v1566_v19  ;;  %v3287_v36 = vld [vmem:[%s4985_s6] ss:$0 sm:$0xff] }
 0xa7c   :  { %v1575_v34 = vmul.f32 %v1570_v52, %v4265_v54 }
 0xa7e   :  { %v1583_v1 = vmul.f32 %v4276_v18, %v1575_v34 }
 0xa80   :  { %v1591_v32 = vadd.f32 %v4281_v48, %v1583_v1 }
 0xa82   :  { %2861 = vmatmul.msk.f32.gmra.mxu0 %vm133_vm1, %v1591_v32  ;;  %v4490_v32 = vld [vmem:[%s4986_s7] sm:$0xff] }
 0xade   :  { %v4304_v33 = vpop.f32.mrf.mxu0 }
 0xadf   :  { %v4310_v44 = vmul.f32 %v4304_v33, %v3709_v15  ;;  %v4318_v54 = vmul.f32 %v4304_v33, %v3803_v38  ;;  %v4322_v18 = vmul.f32 %v4304_v33, %v3884_v7  ;;  %v4334_v40 = vmul.f32 %v4304_v33, %v3881_v3 }
 0xae0   :  { %v1639_v43 = vmul.f32 %v3287_v36, %v4304_v33  ;;  %v1776_v47 = vmul.f32 %v3288_v8, %v4304_v33 }
 0xae6   :  { %v4306_v4 = vpop.f32.mrf.mxu0 }
 0xae7   :  { %v4314_v20 = vmul.f32 %v4306_v4, %v3709_v15  ;;  %v4326_v48 = vmul.f32 %v4306_v4, %v3803_v38  ;;  %v4330_v51 = vmul.f32 %v4306_v4, %v3884_v7  ;;  %v4338_v41 = vmul.f32 %v4306_v4, %v3881_v3 }
 0xae8   :  { %v1640_v24 = vmul.f32 %v3287_v36, %v4306_v4  ;;  %v1777_v22 = vmul.f32 %v3288_v8, %v4306_v4 }
 0xae9   :  { %v3013_v63 = vpack.i.bf16 %v4310_v44, %v4314_v20  ;;  %v3023_v30 = vpack.i.bf16 %v4318_v54, %v4326_v48  ;;  %v3033_v0 = vpack.i.bf16 %v4322_v18, %v4330_v51 }
 0xaef   :  { %v4348_v2 = vpop.f32.mrf.mxu0 }
 0xaf0   :  { %1653 = vrot.lane.b32.xlu0 %v4348_v2, %s3298_s0  ;;  %v4360_v21 = vmul.f32 %v4348_v2, %v3709_v15  ;;  %v4364_v25 = vmul.f32 %v4348_v2, %v3803_v38  ;;  %v4376_v5 = vmul.f32 %v4348_v2, %v3884_v7  ;;  %v4384_v14 = vmul.f32 %v4348_v2, %v3881_v3 }
 0xaf1   :  { %v1641_v50 = vmul.f32 %v3287_v36, %v4348_v2  ;;  %v1778_v46 = vmul.f32 %v3288_v8, %v4348_v2 }
 0xaf7   :  { %v4352_v58 = vpop.f32.mrf.mxu0 }
 0xaf8   :  { %1651 = vrot.lane.b32.xlu0 %v4306_v4, %s3298_s0  ;;  %1655 = vrot.lane.b32.xlu2 %v4352_v58, %s3298_s0  ;;  %v4368_v62 = vmul.f32 %v4352_v58, %v3709_v15  ;;  %v4372_v55 = vmul.f32 %v4352_v58, %v3803_v38  ;;  %v4380_v13 = vmul.f32 %v4352_v58, %v3884_v7 }
 0xaf9   :  { %v4388_v27 = vmul.f32 %v4352_v58, %v3881_v3  ;;  %v1642_v56 = vmul.f32 %v3287_v36, %v4352_v58  ;;  %v1779_v11 = vmul.f32 %v3288_v8, %v4352_v58 }
 0xafa   :  { %v3008_v53 = vpack.i.bf16 %v4360_v21, %v4368_v62  ;;  %v3018_v60 = vpack.i.bf16 %v4364_v25, %v4372_v55  ;;  %v3028_v29 = vpack.i.bf16 %v4376_v5, %v4380_v13 }
 0xaff   :  { %v4398_v57 = vpop.f32.mrf.mxu0 }
 0xb00   :  { %1657 = vrot.lane.b32.xlu1 %v4398_v57, %s3298_s0  ;;  %v1780_v61 = vmul.f32 %v3288_v8, %v4398_v57  ;;  %v1775_v25 = vmul.f32 %v4398_v57, %v3803_v38  ;;  %v2135_v18 = vmul.f32 %v4398_v57, %v3884_v7 }
 0xb08   :  { %1649 = vrot.lane.b32.xlu1 %v4304_v33, %s3298_s0 }
 0xb52   :  { %v4412_v45 = vpop.permute.xlu2 %1655 }
 0xb62   :  { %v4410_v23 = vpop.permute.xlu0 %1653 }
 0xb6a   :  { %v4422_v35 = vpop.permute.xlu0 %1651 }
 0xb72   :  { %v4404_v28 = vpop.permute.xlu1 %1657 }
 0xb73   :  { %2862 = vmatpush.xpose.msk.msra.mxu2 %vm133_vm1, %v4404_v28  ;;  %2872 = vmatpush.xpose.msk.msrb.mxu3 %vm133_vm1, %v4404_v28 }
 0xb77   :  { %2863 = vmatpush.xpose.msk.msra.mxu2 %vm133_vm1, %v4412_v45  ;;  %2873 = vmatpush.xpose.msk.msrb.mxu3 %vm133_vm1, %v4412_v45 }
 0xb7a   :  { %v4428_v26 = vpop.permute.xlu1 %1649 }
 0xb7b   :  { %2864 = vmatpush.xpose.msk.msra.mxu2 %vm133_vm1, %v4410_v23  ;;  %2874 = vmatpush.xpose.msk.msrb.mxu3 %vm133_vm1, %v4410_v23 }
 0xb7f   :  { %2865 = vmatpush.xpose.msk.msra.mxu2 %vm133_vm1, %v4422_v35  ;;  %2875 = vmatpush.xpose.msk.msrb.mxu3 %vm133_vm1, %v4422_v35 }
 0xb83   :  { %2866 = vmatpush.xpose.msk.msra.mxu2 %vm133_vm1, %v4428_v26  ;;  %2876 = vmatpush.xpose.msk.msrb.mxu3 %vm133_vm1, %v4428_v26 }
 0xb86   :  { %2867 = vmatmul.msk.f32.vlgmr.msra.gmra.mxu2 %vm133_vm1, %v1639_v43  ;;  %2877 = vmatmul.msk.f32.vlgmr.msrb.gmra.mxu3 %vm133_vm1, %v1776_v47  ;;  %v4497_v47 = vld [vmem:[%s4986_s7 + $0x8] sm:$0xff] }
 0xb87   :  { %2894 = vmatpush.xpose.msk.msrb.mxu2 %vm133_vm1, %v4404_v28 }
 0xb8b   :  { %2895 = vmatpush.xpose.msk.msrb.mxu2 %vm133_vm1, %v4412_v45 }
 0xb8e   :  { %2868 = vmatmul.msk.f32.gmra.mxu2 %vm133_vm1, %v1640_v24  ;;  %2878 = vmatmul.msk.f32.gmra.mxu3 %vm133_vm1, %v1777_v22 }
 0xb8f   :  { %2896 = vmatpush.xpose.msk.msrb.mxu2 %vm133_vm1, %v4410_v23 }
 0xb93   :  { %2897 = vmatpush.xpose.msk.msrb.mxu2 %vm133_vm1, %v4422_v35 }
 0xb96   :  { %2869 = vmatmul.msk.f32.gmra.mxu2 %vm133_vm1, %v1641_v50  ;;  %2879 = vmatmul.msk.f32.gmra.mxu3 %vm133_vm1, %v1778_v46  ;;  %v4504_v46 = vld [vmem:[%s4986_s7 + $0x10] sm:$0xff] }
 0xb97   :  { %2898 = vmatpush.xpose.msk.msrb.mxu2 %vm133_vm1, %v4428_v26 }
 0xb9b   :  { %2421 = vmatpush.msra.mxu2 %v4038_v12  ;;  %v1643_v12 = vmul.f32 %v3287_v36, %v4398_v57 }
 0xb9d   :  { %2422 = vmatpush.msra.mxu2 %v4043_v9  ;;  %v3289_v9 = vld [vmem:[%s4985_s6 + $0x2] ss:$0 sm:$0xff] }
 0xb9e   :  { %2870 = vmatmul.msk.f32.gmra.mxu2 %vm133_vm1, %v1642_v56  ;;  %2880 = vmatmul.msk.f32.gmra.mxu3 %vm133_vm1, %v1779_v11  ;;  %v2026_v19 = vmul.f32 %v3289_v9, %v4348_v2  ;;  %v2027_v52 = vmul.f32 %v3289_v9, %v4352_v58  ;;  %v2028_v34 = vmul.f32 %v3289_v9, %v4398_v57 }
 0xb9f   :  { %2423 = vmatpush.msra.mxu2 %v4050_v10  ;;  %v2024_v10 = vmul.f32 %v3289_v9, %v4304_v33 }
 0xba1   :  { %2424 = vmatpush.msra.mxu2 %v4056_v31  ;;  %v2025_v31 = vmul.f32 %v3289_v9, %v4306_v4 }
 0xba6   :  { %2871 = vmatmul.msk.f32.gmra.mxu2 %vm133_vm1, %v1643_v12  ;;  %2881 = vmatmul.msk.f32.gmra.mxu3 %vm133_vm1, %v1780_v61  ;;  %v4511_v61 = vld [vmem:[%s4986_s7 + $0x18] sm:$0xff] }
 0xbae   :  { %2899 = vmatmul.msk.f32.vlgmr.msrb.gmra.mxu2 %vm133_vm1, %v2024_v10 }
 0xbb6   :  { %2900 = vmatmul.msk.f32.gmra.mxu2 %vm133_vm1, %v2025_v31 }
 0xbbe   :  { %2901 = vmatmul.msk.f32.gmra.mxu2 %vm133_vm1, %v2026_v19  ;;  %v4521_v19 = vld [vmem:[%s4986_s7 + $0x20] sm:$0x3] }
 0xbc6   :  { %2902 = vmatmul.msk.f32.gmra.mxu2 %vm133_vm1, %v2027_v52 }
 0xbce   :  { %2903 = vmatmul.msk.f32.gmra.mxu2 %vm133_vm1, %v2028_v34 }
 0xc09   :  { %v1813_v1 = vpop.f32.mrf.mxu3 }
 0xc0a   :  { %v1814_v36 = vadd.f32 %v4490_v32, %v1813_v1  ;;  %v1887_v1 = vmul.f32 %v4398_v57, %v3709_v15 }
 0xc0c   :  { %v1828_v43 = vsel %vm396_vm5, %v1814_v36, -inf }
 0xc0d   :  { %1829 = vmax.xlane.f32.xlu2 %v1828_v43  ;;  %v1701_v43 = vpop.f32.mrf.mxu2 }
 0xc11   :  { %v1816_v8 = vpop.f32.mrf.mxu3 }
 0xc12   :  { %v1817_v24 = vadd.f32 %v4497_v47, %v1816_v8 }
 0xc14   :  { %v1831_v22 = vsel %vm396_vm5, %v1817_v24, -inf }
 0xc15   :  { %1832 = vmax.xlane.f32.xlu0 %v1831_v22  ;;  %v4532_v8 = vpop.f32.mrf.mxu2 }
 0xc19   :  { %v1819_v50 = vpop.f32.mrf.mxu3 }
 0xc1a   :  { %v1820_v56 = vadd.f32 %v4504_v46, %v1819_v50 }
 0xc1c   :  { %v1834_v11 = vsel %vm396_vm5, %v1820_v56, -inf }
 0xc1d   :  { %1835 = vmax.xlane.f32.xlu1 %v1834_v11 }
 0xc21   :  { %v1822_v12 = vpop.f32.mrf.mxu3 }
 0xc22   :  { %v4514_v9 = vadd.f32 %v4511_v61, %v1822_v12  ;;  %v1707_v12 = vpop.f32.mrf.mxu2 }
 0xc23   :  { %v4566_v44 = vadd.f32 %v4504_v46, %v1707_v12 }
 0xc24   :  { %v1837_v10 = vsel %vm396_vm5, %v4514_v9, -inf }
 0xc25   :  { %1838 = vmax.xlane.f32.xlu2 %v1837_v10 }
 0xc29   :  { %v1825_v31 = vpop.f32.mrf.mxu3 }
 0xc2a   :  { %v1826_v52 = vadd.f32 %v4521_v19, %v1825_v31  ;;  %v1710_v21 = vpop.f32.mrf.mxu2 }
 0xc2c   :  { %v1840_v34 = vsel %vm409_vm6, %v1826_v52, -inf }
 0xc2d   :  { %1841 = vmax.xlane.f32.xlu0 %v1840_v34 }
 0xc36   :  { %1901 = vrot.lane.b32.xlu1 %v1887_v1, %s3299_s20 }
 0xc41   :  { %3009 = vrot.lane.b32.xlu0 %v3008_v53, %s3299_s20 }
 0xc80   :  { %v1830_v22 = vpop.xlane.xlu2 %1829 }
 0xc81   :  { %v1843_v50 = vsub.f32 %v1814_v36, %v1830_v22 }
 0xc83   :  { %v1848_v11 = vmul.f32 1.442695, %v1843_v50 }
 0xc85   :  { %3187 = vpow2.f32 %v1848_v11  ;;  %v4547_v11 = vadd.f32 %v4490_v32, %v1701_v43 }
 0xc88   :  { %v1833_v10 = vpop.xlane.xlu0 %1832 }
 0xc89   :  { %v1844_v31 = vsub.f32 %v1817_v24, %v1833_v10  ;;  %v1713_v24 = vpop.f32.mrf.mxu2 }
 0xc8b   :  { %v4534_v34 = vpop.eup %3187  ;;  %v1850_v15 = vmul.f32 1.442695, %v1844_v31 }
 0xc8c   :  { %v1858_v1 = vsel %vm396_vm5, %v4534_v34, 0.0 }
 0xc8d   :  { %3189 = vpow2.f32 %v1850_v15  ;;  %1859 = vadd.xlane.f32.xlu2 %v1858_v1  ;;  %v1716_v1 = vsel %vm396_vm5, %v4547_v11, -inf }
 0xc90   :  { %v1836_v62 = vpop.xlane.xlu1 %1835 }
 0xc91   :  { %v1845_v53 = vsub.f32 %v1820_v56, %v1836_v62  ;;  %v2061_v31 = vpop.f32.mrf.mxu2 }
 0xc93   :  { %v4538_v16 = vpop.eup %3189  ;;  %v1852_v17 = vmul.f32 1.442695, %v1845_v53 }
 0xc94   :  { %v1861_v36 = vsel %vm396_vm5, %v4538_v16, 0.0 }
 0xc95   :  { %3191 = vpow2.f32 %v1852_v17  ;;  %1862 = vadd.xlane.f32.xlu1 %v1861_v36  ;;  %v4556_v17 = vadd.f32 %v4511_v61, %v1710_v21 }
 0xc97   :  { %v1725_v53 = vsel %vm396_vm5, %v4556_v17, -inf }
 0xc98   :  { %v1839_v12 = vpop.xlane.xlu2 %1838 }
 0xc99   :  { %v2064_v36 = vpop.f32.mrf.mxu2 }
 0xc9a   :  { %v4569_v20 = vadd.f32 %v4497_v47, %v2064_v36 }
 0xc9b   :  { %v4542_v22 = vpop.eup %3191 }
 0xc9c   :  { %v1864_v50 = vsel %vm396_vm5, %v4542_v22, 0.0 }
 0xc9d   :  { %1865 = vadd.xlane.f32.xlu0 %v1864_v50  ;;  %v1722_v50 = vsel %vm396_vm5, %v4566_v44, -inf }
 0xca0   :  { %v1842_v10 = vpop.xlane.xlu0 %1841 }
 0xca1   :  { %v1847_v56 = vsub.f32 %v1826_v52, %v1842_v10  ;;  %v2079_v10 = vsel %vm396_vm5, %v4569_v20, -inf }
 0xca3   :  { %v1856_v15 = vmul.f32 1.442695, %v1847_v56 }
 0xca5   :  { %3193 = vpow2.f32 %v1856_v15  ;;  %3014 = vrot.lane.b32.xlu2 %v3013_v63, %s3299_s20  ;;  %1717 = vmax.xlane.f32.xlu0 %v1716_v1  ;;  %v4576_v15 = vadd.f32 %v4490_v32, %v2061_v31  ;;  %v1846_v1 = vsub.f32 %v4514_v9, %v1839_v12 }
 0xca7   :  { %v1854_v36 = vmul.f32 1.442695, %v1846_v1 }
 0xca8   :  { %v1902_v62 = vpop.permute.xlu1 %1901 }
 0xca9   :  { %2882 = vmatpush.msk.msra.mxu1 %vm615_vm7, %v1902_v62  ;;  %v2076_v62 = vsel %vm396_vm5, %v4576_v15, -inf  ;;  %3195 = vpow2.f32 %v1854_v36 }
 0xcab   :  { %v4559_v43 = vpop.eup %3193 }
 0xcac   :  { %v1870_v52 = vsel %vm409_vm6, %v4559_v43, 0.0 }
 0xcad   :  { %1871 = vadd.xlane.f32.xlu1 %v1870_v52  ;;  %1726 = vmax.xlane.f32.xlu0 %v1725_v53  ;;  %v2067_v52 = vpop.f32.mrf.mxu2 }
 0xcae   :  { %v4582_v53 = vadd.f32 %v4504_v46, %v2067_v52 }
 0xcaf   :  { %v4590_v9 = vpop.eup %3195 }
 0xcb0   :  { %v1867_v31 = vsel %vm396_vm5, %v4590_v9, 0.0 }
 0xcb3   :  { %v3010_v63 = vpop.permute.xlu0 %3009 }
 0xcb4   :  { %v3011_v21 = vunpack.i.l.bf16 %v3010_v63  ;;  %v3012_v56 = vunpack.i.h.bf16 %v3010_v63  ;;  %v2082_v63 = vsel %vm396_vm5, %v4582_v53, -inf }
 0xcb5   :  { %1723 = vmax.xlane.f32.xlu1 %v1722_v50  ;;  %2080 = vmax.xlane.f32.xlu0 %v2079_v10  ;;  %v4601_v10 = vadd.f32 %v4521_v19, %v1713_v24 }
 0xcb6   :  { %1936 = vmatpush.msra.mxu1 %v3011_v21  ;;  %v4596_v21 = vadd.f32 %v4497_v47, %v4532_v8 }
 0xcb7   :  { %v1728_v55 = vsel %vm409_vm6, %v4601_v10, -inf }
 0xcb8   :  { %1937 = vmatpush.msra.mxu1 %v3012_v56  ;;  %v1719_v50 = vsel %vm396_vm5, %v4596_v21, -inf }
 0xcbd   :  { %2077 = vmax.xlane.f32.xlu1 %v2076_v62 }
 0xcc5   :  { %2083 = vmax.xlane.f32.xlu1 %v2082_v63 }
 0xcc9   :  { %3019 = vrot.lane.b32.xlu0 %v3018_v60, %s3299_s20  ;;  %v2070_v60 = vpop.f32.mrf.mxu2 }
 0xcce   :  { %1868 = vadd.xlane.f32.xlu2 %v1867_v31 }
 0xcd1   :  { %v2073_v56 = vpop.f32.mrf.mxu2 }
 0xcd2   :  { %v4609_v12 = vadd.f32 %v4521_v19, %v2073_v56 }
 0xcd4   :  { %v2088_v24 = vsel %vm409_vm6, %v4609_v12, -inf }
 0xcd6   :  { %1720 = vmax.xlane.f32.xlu2 %v1719_v50 }
 0xcde   :  { %1969 = vrot.lane.b32.xlu1 %v1775_v25, %s3299_s20  ;;  %1729 = vmax.xlane.f32.xlu2 %v1728_v55 }
 0xd00   :  { %v1860_v8 = vpop.xlane.xlu2 %1859 }
 0xd01   :  { %3197 = vrcp.f32 %v1860_v8 }
 0xd07   :  { %v3198_v38 = vpop.eup %3197 }
 0xd08   :  { %v1863_v1 = vpop.xlane.xlu1 %1862  ;;  %v3015_v62 = vpop.permute.xlu2 %3014  ;;  %2089 = vmax.xlane.f32.xlu1 %v2088_v24  ;;  %v1878_v63 = vmul.f32 %v3198_v38, %v4534_v34 }
 0xd09   :  { %v3016_v52 = vunpack.i.l.bf16 %v3015_v62  ;;  %3199 = vrcp.f32 %v1863_v1  ;;  %v3017_v36 = vunpack.i.h.bf16 %v3015_v62 }
 0xd0b   :  { %1938 = vmatpush.msra.mxu1 %v3016_v52 }
 0xd0d   :  { %1939 = vmatpush.msra.mxu1 %v3017_v36 }
 0xd0e   :  { %2883 = vmatmul.msk.f32.vlgmr.msra.gmra.mxu1 %vm396_vm5, %v1878_v63 }
 0xd0f   :  { %2910 = vmatpush.xpose.msk.msrb.mxu1 %vm133_vm1, %v4404_v28  ;;  %v3200_v50 = vpop.eup %3199 }
 0xd10   :  { %v1866_v31 = vpop.xlane.xlu0 %1865  ;;  %v1879_v25 = vmul.f32 %v3200_v50, %v4538_v16 }
 0xd11   :  { %3201 = vrcp.f32 %v1866_v31 }
 0xd13   :  { %2911 = vmatpush.xpose.msk.msrb.mxu1 %vm133_vm1, %v4412_v45  ;;  %v4635_v45 = vadd.f32 %v4511_v61, %v2070_v60 }
 0xd16   :  { %2884 = vmatmul.msk.f32.gmra.mxu1 %vm396_vm5, %v1879_v25 }
 0xd17   :  { %2912 = vmatpush.xpose.msk.msrb.mxu1 %vm133_vm1, %v4410_v23  ;;  %v3202_v55 = vpop.eup %3201 }
 0xd18   :  { %v1718_v34 = vpop.xlane.xlu0 %1717  ;;  %v1880_v28 = vmul.f32 %v3202_v55, %v4542_v22 }
 0xd19   :  { %v1731_v56 = vsub.f32 %v4547_v11, %v1718_v34 }
 0xd1b   :  { %v1736_v8 = vmul.f32 1.442695, %v1731_v56  ;;  %2913 = vmatpush.xpose.msk.msrb.mxu1 %vm133_vm1, %v4422_v35  ;;  %v2085_v35 = vsel %vm396_vm5, %v4635_v45, -inf }
 0xd1d   :  { %3203 = vpow2.f32 %v1736_v8 }
 0xd1e   :  { %2885 = vmatmul.msk.f32.gmra.mxu1 %vm396_vm5, %v1880_v28 }
 0xd1f   :  { %2914 = vmatpush.xpose.msk.msrb.mxu1 %vm133_vm1, %v4428_v26 }
 0xd20   :  { %v1872_v11 = vpop.xlane.xlu1 %1871  ;;  %v1727_v24 = vpop.xlane.xlu0 %1726 }
 0xd23   :  { %v4630_v16 = vpop.eup %3203 }
 0xd24   :  { %v1746_v23 = vsel %vm396_vm5, %v4630_v16, 0.0 }
 0xd25   :  { %1747 = vadd.xlane.f32.xlu2 %v1746_v23 }
 0xd28   :  { %v1724_v22 = vpop.xlane.xlu1 %1723  ;;  %v4643_v26 = vpop.xlane.xlu0 %2080 }
 0xd29   :  { %v1733_v31 = vsub.f32 %v4566_v44, %v1724_v22  ;;  %v1734_v44 = vsub.f32 %v4556_v17, %v1727_v24 }
 0xd2b   :  { %v1740_v54 = vmul.f32 1.442695, %v1733_v31 }
 0xd2d   :  { %2086 = vmax.xlane.f32.xlu2 %v2085_v35 }
 0xd30   :  { %v2078_v1 = vpop.xlane.xlu1 %2077 }
 0xd31   :  { %v2091_v17 = vsub.f32 %v4576_v15, %v2078_v1 }
 0xd38   :  { %v4645_v60 = vpop.xlane.xlu1 %2083 }
 0xd39   :  { %v2093_v7 = vsub.f32 %v4582_v53, %v4645_v60 }
 0xd3b   :  { %v3020_v34 = vpop.permute.xlu0 %3019 }
 0xd3c   :  { %v3022_v8 = vunpack.i.h.bf16 %v3020_v34 }
 0xd41   :  { %v1869_v62 = vpop.xlane.xlu2 %1868 }
 0xd42   :  { %3205 = vrcp.f32 %v1869_v62 }
 0xd43   :  { %3207 = vrcp.f32 %v1872_v11  ;;  %v1742_v11 = vmul.f32 1.442695, %v1734_v44 }
 0xd45   :  { %3024 = vrot.lane.b32.xlu2 %v3023_v30, %s3299_s20  ;;  %v3021_v30 = vunpack.i.l.bf16 %v3020_v34 }
 0xd48   :  { %v3206_v38 = vpop.eup %3205 }
 0xd49   :  { %v1721_v52 = vpop.xlane.xlu2 %1720  ;;  %v1881_v36 = vmul.f32 %v3206_v38, %v4590_v9  ;;  %v3208_v25 = vpop.eup %3207  ;;  %v2096_v38 = vmul.f32 1.442695, %v2091_v17 }
 0xd4a   :  { %v1732_v63 = vsub.f32 %v4596_v21, %v1721_v52  ;;  %v1882_v56 = vmul.f32 %v3208_v25, %v4559_v43  ;;  %v3295_v43 = vld [vmem:[%s4985_s6 + $0x3] ss:$0 sm:$0xff] }
 0xd4b   :  { %2886 = vmatmul.msk.f32.gmra.mxu1 %vm396_vm5, %v1881_v36  ;;  %v2210_v52 = vmul.f32 %v3295_v43, %v4306_v4  ;;  %v2212_v31 = vmul.f32 %v3295_v43, %v4352_v58  ;;  %v2213_v4 = vmul.f32 %v3295_v43, %v4398_v57 }
 0xd4c   :  { %v1738_v50 = vmul.f32 1.442695, %v1732_v63  ;;  %v2211_v63 = vmul.f32 %v3295_v43, %v4348_v2 }
 0xd4e   :  { %3209 = vpow2.f32 %v1738_v50 }
 0xd4f   :  { %3211 = vpow2.f32 %v1740_v54 }
 0xd50   :  { %v1970_v48 = vpop.permute.xlu1 %1969 }
 0xd51   :  { %2888 = vmatpush.msk.msrb.mxu0 %vm615_vm7, %v1970_v48  ;;  %v1730_v55 = vpop.xlane.xlu2 %1729 }
 0xd52   :  { %v1735_v9 = vsub.f32 %v4601_v10, %v1730_v55  ;;  %v2209_v10 = vmul.f32 %v3295_v43, %v4304_v33 }
 0xd53   :  { %2887 = vmatmul.msk.f32.gmra.mxu1 %vm396_vm5, %v1882_v56  ;;  %2004 = vmatpush.msrb.mxu0 %v3021_v30 }
 0xd54   :  { %v3210_v21 = vpop.eup %3209  ;;  %v1744_v28 = vmul.f32 1.442695, %v1735_v9 }
 0xd55   :  { %2005 = vmatpush.msrb.mxu0 %v3022_v8  ;;  %v1749_v23 = vsel %vm396_vm5, %v3210_v21, 0.0  ;;  %v3212_v35 = vpop.eup %3211 }
 0xd56   :  { %3213 = vpow2.f32 %v1744_v28  ;;  %1750 = vadd.xlane.f32.xlu0 %v1749_v23  ;;  %v1752_v62 = vsel %vm396_vm5, %v3212_v35, 0.0 }
 0xd57   :  { %3215 = vpow2.f32 %v1742_v11 }
 0xd58   :  { %3217 = vpow2.f32 %v2096_v38 }
 0xd5b   :  { %2915 = vmatmul.msk.f32.vlgmr.msrb.gmra.mxu1 %vm133_vm1, %v2209_v10 }
 0xd5c   :  { %v4662_v22 = vpop.eup %3213 }
 0xd5d   :  { %v1758_v24 = vsel %vm409_vm6, %v4662_v22, 0.0  ;;  %v3216_v36 = vpop.eup %3215 }
 0xd5e   :  { %1759 = vadd.xlane.f32.xlu1 %v1758_v24  ;;  %1753 = vadd.xlane.f32.xlu0 %v1752_v62  ;;  %v1755_v33 = vsel %vm396_vm5, %v3216_v36, 0.0  ;;  %v4672_v15 = vpop.eup %3217 }
 0xd5f   :  { %v2106_v1 = vsel %vm396_vm5, %v4672_v15, 0.0 }
 0xd63   :  { %2916 = vmatmul.msk.f32.gmra.mxu1 %vm133_vm1, %v2210_v52 }
 0xd66   :  { %1756 = vadd.xlane.f32.xlu0 %v1755_v33 }
 0xd6b   :  { %2917 = vmatmul.msk.f32.gmra.mxu1 %vm133_vm1, %v2211_v63 }
 0xd6e   :  { %2107 = vadd.xlane.f32.xlu0 %v2106_v1 }
 0xd73   :  { %2918 = vmatmul.msk.f32.gmra.mxu1 %vm133_vm1, %v2212_v31 }
 0xd7b   :  { %2919 = vmatmul.msk.f32.gmra.mxu1 %vm133_vm1, %v2213_v4 }
 0xd8b   :  { %v4683_v30 = vpop.f32.mrf.mxu1 }
 0xd93   :  { %v4687_v58 = vpop.f32.mrf.mxu1 }
 0xd98   :  { %v1748_v50 = vpop.xlane.xlu2 %1747 }
 0xd99   :  { %3219 = vrcp.f32 %v1748_v50 }
 0xd9b   :  { %v4689_v56 = vpop.f32.mrf.mxu1 }
 0xd9f   :  { %v3220_v34 = vpop.eup %3219 }
 0xda0   :  { %v4681_v25 = vpop.xlane.xlu2 %2086  ;;  %v1766_v55 = vmul.f32 %v3220_v34, %v4630_v16  ;;  %v4696_v16 = vpop.xlane.xlu1 %2089 }
 0xda1   :  { %v2095_v60 = vsub.f32 %v4609_v12, %v4696_v16 }
 0xda8   :  { %v3025_v2 = vpop.permute.xlu2 %3024 }
 0xda9   :  { %v3026_v54 = vunpack.i.l.bf16 %v3025_v2  ;;  %v3027_v48 = vunpack.i.h.bf16 %v3025_v2 }
 0xdab   :  { %2006 = vmatpush.msrb.mxu0 %v3026_v54 }
 0xdad   :  { %2007 = vmatpush.msrb.mxu0 %v3027_v48  ;;  %v2320_v48 = vmul.f32 %v4398_v57, %v3881_v3  ;;  %v5000_v3 = vpack.i.bf16 %v4334_v40, %v4338_v41 }
 0xdae   :  { %2889 = vmatmul.msk.f32.vlgmr.msrb.gmra.mxu0 %vm396_vm5, %v1766_v55 }
 0xdc8   :  { %v4691_v9 = vpop.f32.mrf.mxu1 }
 0xdc9   :  { %v1751_v8 = vpop.xlane.xlu0 %1750 }
 0xdca   :  { %3221 = vrcp.f32 %v1751_v8 }
 0xdd0   :  { %v3222_v44 = vpop.eup %3221  ;;  %v4693_v28 = vpop.f32.mrf.mxu1 }
 0xdd1   :  { %v1754_v23 = vpop.xlane.xlu0 %1753  ;;  %v1767_v11 = vmul.f32 %v3222_v44, %v3210_v21  ;;  %v1760_v52 = vpop.xlane.xlu1 %1759 }
 0xdd2   :  { %3223 = vrcp.f32 %v1754_v23 }
 0xdd3   :  { %2890 = vmatmul.msk.f32.gmra.mxu0 %vm396_vm5, %v1767_v11  ;;  %v2104_v11 = vmul.f32 1.442695, %v2095_v60 }
 0xdd8   :  { %v2246_v43 = vpop.f32.mrf.mxu1  ;;  %v3224_v10 = vpop.eup %3223 }
 0xdd9   :  { %v2247_v17 = vadd.f32 %v4490_v32, %v2246_v43  ;;  %v1757_v24 = vpop.xlane.xlu0 %1756  ;;  %v1768_v62 = vmul.f32 %v3224_v10, %v3212_v35 }
 0xdda   :  { %3225 = vrcp.f32 %v1757_v24 }
 0xddb   :  { %v2261_v38 = vsel %vm396_vm5, %v2247_v17, -inf  ;;  %2891 = vmatmul.msk.f32.gmra.mxu0 %vm396_vm5, %v1768_v62  ;;  %3227 = vrcp.f32 %v1760_v52 }
 0xddc   :  { %2262 = vmax.xlane.f32.xlu2 %v2261_v38 }
 0xde0   :  { %v3226_v33 = vpop.eup %3225  ;;  %v2249_v21 = vpop.f32.mrf.mxu1 }
 0xde1   :  { %v2250_v63 = vadd.f32 %v4497_v47, %v2249_v21  ;;  %v1769_v1 = vmul.f32 %v3226_v33, %v3216_v36  ;;  %v3228_v32 = vpop.eup %3227 }
 0xde2   :  { %v1770_v50 = vmul.f32 %v3228_v32, %v4662_v22 }
 0xde3   :  { %v2264_v31 = vsel %vm396_vm5, %v2250_v63, -inf  ;;  %2892 = vmatmul.msk.f32.gmra.mxu0 %vm396_vm5, %v1769_v1 }
 0xde4   :  { %2265 = vmax.xlane.f32.xlu0 %v2264_v31 }
 0xde8   :  { %v2252_v4 = vpop.f32.mrf.mxu1 }
 0xde9   :  { %v2253_v35 = vadd.f32 %v4504_v46, %v2252_v4 }
 0xdeb   :  { %v2267_v2 = vsel %vm396_vm5, %v2253_v35, -inf  ;;  %2893 = vmatmul.msk.f32.gmra.mxu0 %vm396_vm5, %v1770_v50 }
 0xdec   :  { %2268 = vmax.xlane.f32.xlu2 %v2267_v2 }
 0xdf0   :  { %v2255_v34 = vpop.f32.mrf.mxu1 }
 0xdf1   :  { %v2256_v47 = vadd.f32 %v4511_v61, %v2255_v34  ;;  %v2092_v61 = vsub.f32 %v4569_v20, %v4643_v26  ;;  %v2094_v26 = vsub.f32 %v4635_v45, %v4681_v25 }
 0xdf3   :  { %v2270_v36 = vsel %vm396_vm5, %v2256_v47, -inf  ;;  %v2098_v51 = vmul.f32 1.442695, %v2092_v61  ;;  %v2102_v40 = vmul.f32 1.442695, %v2094_v26 }
 0xdf4   :  { %2271 = vmax.xlane.f32.xlu2 %v2270_v36 }
 0xdf5   :  { %3229 = vpow2.f32 %v2098_v51 }
 0xdf8   :  { %v2258_v54 = vpop.f32.mrf.mxu1  ;;  %3034 = vrot.lane.b32.xlu0 %v3033_v0, %s3299_s20  ;;  %v4999_v0 = vpack.i.bf16 %v4384_v14, %v4388_v27  ;;  %v2108_v27 = vpop.xlane.xlu0 %2107 }
 0xdf9   :  { %v4715_v46 = vadd.f32 %v4521_v19, %v2258_v54 }
 0xdfb   :  { %v2273_v22 = vsel %vm409_vm6, %v4715_v46, -inf  ;;  %v4735_v5 = vpop.eup %3229 }
 0xdfc   :  { %2274 = vmax.xlane.f32.xlu1 %v2273_v22  ;;  %v2109_v13 = vsel %vm396_vm5, %v4735_v5, 0.0 }
 0xe0c   :  { %3029 = vrot.lane.b32.xlu2 %v3028_v29, %s3299_s20  ;;  %v2100_v29 = vmul.f32 1.442695, %v2093_v7 }
 0xe0e   :  { %3231 = vpow2.f32 %v2100_v29 }
 0xe14   :  { %2334 = vrot.lane.b32.xlu2 %v2320_v48, %s3299_s20  ;;  %v4745_v57 = vpop.eup %3231 }
 0xe15   :  { %2149 = vrot.lane.b32.xlu1 %v2135_v18, %s3299_s20  ;;  %v2112_v14 = vsel %vm396_vm5, %v4745_v57, 0.0 }
 0xe1c   :  { %3039 = vrot.lane.b32.xlu2 %v4999_v0, %s3299_s20 }
 0xe22   :  { %2110 = vadd.xlane.f32.xlu0 %v2109_v13 }
 0xe24   :  { %3044 = vrot.lane.b32.xlu2 %v5000_v3, %s3299_s20 }
 0xe4d   :  { %2113 = vadd.xlane.f32.xlu2 %v2112_v14 }
 0xe4f   :  { %v2263_v19 = vpop.xlane.xlu2 %2262 }
 0xe50   :  { %v2276_v20 = vsub.f32 %v2247_v17, %v2263_v19 }
 0xe52   :  { %v2281_v55 = vmul.f32 1.442695, %v2276_v20 }
 0xe54   :  { %3233 = vpow2.f32 %v2281_v55 }
 0xe55   :  { %3235 = vpow2.f32 %v2102_v40 }
 0xe57   :  { %v2266_v41 = vpop.xlane.xlu0 %2265 }
 0xe58   :  { %v2277_v8 = vsub.f32 %v2250_v63, %v2266_v41 }
 0xe5a   :  { %v4751_v53 = vpop.eup %3233  ;;  %v2283_v44 = vmul.f32 1.442695, %v2277_v8 }
 0xe5b   :  { %v2291_v23 = vsel %vm396_vm5, %v4751_v53, 0.0  ;;  %v4757_v45 = vpop.eup %3235 }
 0xe5c   :  { %3237 = vpow2.f32 %v2283_v44  ;;  %2292 = vadd.xlane.f32.xlu1 %v2291_v23  ;;  %v2115_v24 = vsel %vm396_vm5, %v4757_v45, 0.0 }
 0xe5d   :  { %3239 = vpow2.f32 %v2104_v11 }
 0xe5f   :  { %v2269_v43 = vpop.xlane.xlu2 %2268 }
 0xe60   :  { %v2278_v25 = vsub.f32 %v2253_v35, %v2269_v43 }
 0xe62   :  { %v4759_v10 = vpop.eup %3237  ;;  %v2285_v17 = vmul.f32 1.442695, %v2278_v25 }
 0xe63   :  { %v2294_v12 = vsel %vm396_vm5, %v4759_v10, 0.0  ;;  %v4765_v62 = vpop.eup %3239 }
 0xe64   :  { %3241 = vpow2.f32 %v2285_v17  ;;  %2116 = vadd.xlane.f32.xlu1 %v2115_v24  ;;  %2295 = vadd.xlane.f32.xlu0 %v2294_v12  ;;  %v2118_v21 = vsel %vm409_vm6, %v4765_v62, 0.0 }
 0xe67   :  { %v2272_v16 = vpop.xlane.xlu2 %2271 }
 0xe68   :  { %v2279_v38 = vsub.f32 %v2256_v47, %v2272_v16 }
 0xe6a   :  { %v4767_v52 = vpop.eup %3241  ;;  %v2287_v33 = vmul.f32 1.442695, %v2279_v38  ;;  %v3035_v51 = vpop.permute.xlu0 %3034 }
 0xe6b   :  { %v2297_v63 = vsel %vm396_vm5, %v4767_v52, 0.0  ;;  %v3036_v7 = vunpack.i.l.bf16 %v3035_v51  ;;  %v3037_v29 = vunpack.i.h.bf16 %v3035_v51 }
 0xe6c   :  { %3243 = vpow2.f32 %v2287_v33  ;;  %2119 = vadd.xlane.f32.xlu1 %v2118_v21  ;;  %2298 = vadd.xlane.f32.xlu0 %v2297_v63 }
 0xe6f   :  { %v2275_v1 = vpop.xlane.xlu1 %2274  ;;  %v3030_v31 = vpop.permute.xlu2 %3029 }
 0xe70   :  { %v2280_v32 = vsub.f32 %v4715_v46, %v2275_v1  ;;  %v3031_v48 = vunpack.i.l.bf16 %v3030_v31  ;;  %v3032_v0 = vunpack.i.h.bf16 %v3030_v31 }
 0xe72   :  { %v4774_v4 = vpop.eup %3243  ;;  %v2289_v35 = vmul.f32 1.442695, %v2280_v32 }
 0xe73   :  { %v2300_v50 = vsel %vm396_vm5, %v4774_v4, 0.0 }
 0xe74   :  { %3245 = vpow2.f32 %v2289_v35  ;;  %2301 = vadd.xlane.f32.xlu0 %v2300_v50 }
 0xe75   :  { %3247 = vrcp.f32 %v2108_v27 }
 0xe77   :  { %v2335_v2 = vpop.permute.xlu2 %2334 }
 0xe78   :  { %2920 = vmatpush.msk.msra.mxu0 %vm615_vm7, %v2335_v2 }
 0xe7a   :  { %v4779_v34 = vpop.eup %3245 }
 0xe7b   :  { %v2303_v47 = vsel %vm409_vm6, %v4779_v34, 0.0  ;;  %v3248_v3 = vpop.eup %3247 }
 0xe7c   :  { %2304 = vadd.xlane.f32.xlu1 %v2303_v47  ;;  %v2126_v14 = vmul.f32 %v3248_v3, %v4672_v15 }
 0xe7f   :  { %v3040_v36 = vpop.permute.xlu2 %3039 }
 0xe80   :  { %v3041_v54 = vunpack.i.l.bf16 %v3040_v36  ;;  %v3042_v46 = vunpack.i.h.bf16 %v3040_v36 }
 0xe82   :  { %2369 = vmatpush.msra.mxu0 %v3041_v54 }
 0xe84   :  { %2370 = vmatpush.msra.mxu0 %v3042_v46 }
 0xe87   :  { %v2150_v22 = vpop.permute.xlu1 %2149  ;;  %v3045_v61 = vpop.permute.xlu2 %3044 }
 0xe88   :  { %v3046_v18 = vunpack.i.l.bf16 %v3045_v61  ;;  %2904 = vmatpush.msk.msra.mxu3 %vm615_vm7, %v2150_v22  ;;  %v3047_v13 = vunpack.i.h.bf16 %v3045_v61 }
 0xe8a   :  { %2184 = vmatpush.msra.mxu3 %v3031_v48  ;;  %2371 = vmatpush.msra.mxu0 %v3046_v18 }
 0xe8c   :  { %2185 = vmatpush.msra.mxu3 %v3032_v0  ;;  %2372 = vmatpush.msra.mxu0 %v3047_v13 }
 0xe8e   :  { %2186 = vmatpush.msra.mxu3 %v3036_v7 }
 0xe90   :  { %2187 = vmatpush.msra.mxu3 %v3037_v29 }
 0xe91   :  { %2905 = vmatmul.msk.f32.vlgmr.msra.gmra.mxu3 %vm396_vm5, %v2126_v14 }
 0xe95   :  { %v2111_v27 = vpop.xlane.xlu0 %2110 }
 0xe96   :  { %3249 = vrcp.f32 %v2111_v27 }
 0xe9c   :  { %v3250_v19 = vpop.eup %3249 }
 0xe9d   :  { %v2127_v20 = vmul.f32 %v3250_v19, %v4735_v5 }
 0xe9f   :  { %2906 = vmatmul.msk.f32.gmra.mxu3 %vm396_vm5, %v2127_v20 }
 0xec0   :  { %v2114_v26 = vpop.xlane.xlu2 %2113 }
 0xec1   :  { %3251 = vrcp.f32 %v2114_v26 }
 0xec7   :  { %v3252_v55 = vpop.eup %3251 }
 0xec8   :  { %v2128_v40 = vmul.f32 %v3252_v55, %v4745_v57 }
 0xeca   :  { %2907 = vmatmul.msk.f32.gmra.mxu3 %vm396_vm5, %v2128_v40 }
 0xecf   :  { %v2293_v41 = vpop.xlane.xlu1 %2292 }
 0xed0   :  { %3253 = vrcp.f32 %v2293_v41 }
 0xed6   :  { %v3254_v15 = vpop.eup %3253 }
 0xed7   :  { %v2311_v8 = vmul.f32 %v3254_v15, %v4751_v53  ;;  %v2117_v60 = vpop.xlane.xlu1 %2116  ;;  %v2296_v44 = vpop.xlane.xlu0 %2295 }
 0xed8   :  { %3255 = vrcp.f32 %v2117_v60 }
 0xed9   :  { %3257 = vrcp.f32 %v2296_v44  ;;  %2921 = vmatmul.msk.f32.vlgmr.msra.gmra.mxu0 %vm396_vm5, %v2311_v8 }
 0xede   :  { %v3256_v5 = vpop.eup %3255 }
 0xedf   :  { %v3258_v23 = vpop.eup %3257  ;;  %v2120_v11 = vpop.xlane.xlu1 %2119  ;;  %v2129_v25 = vmul.f32 %v3256_v5, %v4757_v45 }
 0xee0   :  { %v2299_v43 = vpop.xlane.xlu0 %2298  ;;  %3259 = vrcp.f32 %v2120_v11  ;;  %v2312_v57 = vmul.f32 %v3258_v23, %v4759_v10 }
 0xee1   :  { %3261 = vrcp.f32 %v2299_v43  ;;  %2908 = vmatmul.msk.f32.gmra.mxu3 %vm396_vm5, %v2129_v25 }
 0xee2   :  { %2922 = vmatmul.msk.f32.gmra.mxu0 %vm396_vm5, %v2312_v57 }
 0xee6   :  { %v3260_v53 = vpop.eup %3259 }
 0xee7   :  { %v3262_v17 = vpop.eup %3261  ;;  %v2130_v12 = vmul.f32 %v3260_v53, %v4765_v62  ;;  %v2009_v62 = vpop.f32.mrf.mxu0 }
 0xee8   :  { %v2302_v24 = vpop.xlane.xlu0 %2301  ;;  %v2313_v16 = vmul.f32 %v3262_v17, %v4767_v52  ;;  %v2010_v35 = vadd.f32 %v2009_v62, %v4683_v30 }
 0xee9   :  { %3263 = vrcp.f32 %v2302_v24  ;;  %2909 = vmatmul.msk.f32.gmra.mxu3 %vm396_vm5, %v2130_v12 }
 0xeea   :  { %2923 = vmatmul.msk.f32.gmra.mxu0 %vm396_vm5, %v2313_v16 }
 0xeef   :  { %v3264_v45 = vpop.eup %3263  ;;  %v2305_v38 = vpop.xlane.xlu1 %2304 }
 0xef0   :  { %v2314_v10 = vmul.f32 %v3264_v45, %v4774_v4  ;;  %3265 = vrcp.f32 %v2305_v38  ;;  %v2012_v63 = vpop.f32.mrf.mxu0 }
 0xef1   :  { %v2013_v36 = vadd.f32 %v2012_v63, %v4687_v58 }
 0xef2   :  { %2924 = vmatmul.msk.f32.gmra.mxu0 %vm396_vm5, %v2314_v10 }
 0xef6   :  { %v3266_v33 = vpop.eup %3265 }
 0xef7   :  { %v2315_v21 = vmul.f32 %v3266_v33, %v4779_v34 }
 0xef8   :  { %v2015_v1 = vpop.f32.mrf.mxu0 }
 0xef9   :  { %v2016_v61 = vadd.f32 %v2015_v1, %v4689_v56 }
 0xefa   :  { %2925 = vmatmul.msk.f32.gmra.mxu0 %vm396_vm5, %v2315_v21 }
 0xf00   :  { %v2018_v52 = vpop.f32.mrf.mxu0 }
 0xf01   :  { %v2019_v0 = vadd.f32 %v2018_v52, %v4691_v9  ;;  %v3296_v9 = vld [vmem:[%s4987_s5] ss:$0 sm:$0xff] }
 0xf08   :  { %v2021_v31 = vpop.f32.mrf.mxu0 }
 0xf09   :  { %v2022_v29 = vadd.f32 %v2021_v31, %v4693_v28 }
 0xf14   :  { %v2189_v32 = vpop.f32.mrf.mxu3 }
 0xf15   :  { %v2204_v50 = vadd.f32 %v2189_v32, %v2010_v35 }
 0xf22   :  { %v2192_v4 = vpop.f32.mrf.mxu3 }
 0xf23   :  { %v2205_v54 = vadd.f32 %v2192_v4, %v2013_v36 }
 0xf4d   :  { %v2195_v22 = vpop.f32.mrf.mxu3 }
 0xf4e   :  { %v2206_v48 = vadd.f32 %v2195_v22, %v2016_v61  ;;  %v2934_v22 = vld [vmem:[%s4992_s12 + $0x28] sm:$0xff]  ;;  %v2933_v61 = vld [vmem:[%s4992_s12 + $0x20] sm:$0xff] }
 0xf56   :  { %v2374_v2 = vpop.f32.mrf.mxu0 }
 0xf57   :  { %v2389_v47 = vadd.f32 %v2374_v2, %v2204_v50 }
 0xf59   :  { %2926 = vmatmul.msk.f32.vlgmr.msra.gmra.mxu2 %vm133_vm1, %v2389_v47 }
 0xf5f   :  { %v2377_v34 = vpop.f32.mrf.mxu0 }
 0xf60   :  { %v2390_v46 = vadd.f32 %v2377_v34, %v2205_v54  ;;  %v2936_v34 = vld [vmem:[%s4992_s12 + $0x38] sm:$0xff] }
 0xf61   :  { %2618 = vmatpush.msrb.mxu3 %v2936_v34 }
 0xf62   :  { %2927 = vmatmul.msk.f32.gmra.mxu2 %vm133_vm1, %v2390_v46  ;;  %v2935_v46 = vld [vmem:[%s4992_s12 + $0x30] sm:$0xff] }
 0xf63   :  { %2619 = vmatpush.msrb.mxu3 %v2935_v46 }
 0xf64   :  { %v2198_v30 = vpop.f32.mrf.mxu3 }
 0xf65   :  { %v2207_v13 = vadd.f32 %v2198_v30, %v2019_v0  ;;  %2620 = vmatpush.msrb.mxu3 %v2934_v22 }
 0xf67   :  { %v2380_v18 = vpop.f32.mrf.mxu0  ;;  %2621 = vmatpush.msrb.mxu3 %v2933_v61 }
 0xf68   :  { %v2391_v51 = vadd.f32 %v2380_v18, %v2206_v48 }
 0xf6a   :  { %2928 = vmatmul.msk.f32.gmra.mxu2 %vm133_vm1, %v2391_v51 }
 0xf6c   :  { %v2201_v58 = vpop.f32.mrf.mxu3 }
 0xf6d   :  { %v2208_v14 = vadd.f32 %v2201_v58, %v2022_v29 }
 0xf6f   :  { %v2383_v3 = vpop.f32.mrf.mxu0 }
 0xf70   :  { %v2392_v7 = vadd.f32 %v2383_v3, %v2207_v13 }
 0xf72   :  { %2929 = vmatmul.msk.f32.gmra.mxu2 %vm133_vm1, %v2392_v7 }
 0xf77   :  { %v2386_v27 = vpop.f32.mrf.mxu0 }
 0xf78   :  { %v2393_v19 = vadd.f32 %v2386_v27, %v2208_v14 }
 0xf7a   :  { %2930 = vmatmul.msk.f32.gmra.mxu2 %vm133_vm1, %v2393_v19 }
 0xfdc   :  { %v2426_v56 = vpop.f32.mrf.mxu2 }
 0xfdd   :  { %v2441_v20 = vadd.f32 %v2426_v56, %v4215_v49 }
 0xfdf   :  { %v4818_v26 = vadd.f32 %v3296_v9, %v2441_v20 }
 0xfe1   :  { %v2455_v55 = vsel %vm133_vm1, %v4818_v26, 0.0 }
 0xfe2   :  { %2456 = vadd.xlane.f32.xlu0 %v2455_v55  ;;  %v4891_v55 = vld [vmem:[%s4989_s10 + $0x1] ss:$0 sm:$0xff] }
 0xfe5   :  { %v2429_v40 = vpop.f32.mrf.mxu2 }
 0xfe6   :  { %v2442_v28 = vadd.f32 %v2429_v40, %v4220_v59 }
 0xfe8   :  { %v4823_v41 = vadd.f32 %v3296_v9, %v2442_v28 }
 0xfea   :  { %v2458_v15 = vsel %vm133_vm1, %v4823_v41, 0.0 }
 0xfeb   :  { %2459 = vadd.xlane.f32.xlu1 %v2458_v15  ;;  %v4896_v15 = vld [vmem:[%s4990_s11 + $0x1] ss:$0 sm:$0xff] }
 0xfed   :  { %v2432_v49 = vpop.f32.mrf.mxu2 }
 0xfee   :  { %v2443_v8 = vadd.f32 %v2432_v49, %v4225_v6 }
 0xff0   :  { %v4828_v60 = vadd.f32 %v3296_v9, %v2443_v8 }
 0xff2   :  { %v2461_v44 = vsel %vm133_vm1, %v4828_v60, 0.0 }
 0xff3   :  { %2462 = vadd.xlane.f32.xlu2 %v2461_v44 }
 0xff5   :  { %v2435_v5 = vpop.f32.mrf.mxu2 }
 0xff6   :  { %v2444_v23 = vadd.f32 %v2435_v5, %v4230_v39 }
 0xff8   :  { %v4833_v11 = vadd.f32 %v3296_v9, %v2444_v23 }
 0xffa   :  { %v2464_v59 = vsel %vm133_vm1, %v4833_v11, 0.0 }
 0xffb   :  { %2465 = vadd.xlane.f32.xlu0 %v2464_v59 }
 0xffd   :  { %v2438_v43 = vpop.f32.mrf.mxu2 }
 0xffe   :  { %v2445_v25 = vadd.f32 %v2438_v43, %v4235_v42 }
0x1000   :  { %v4838_v57 = vadd.f32 %v3296_v9, %v2445_v25 }
0x1002   :  { %v2467_v6 = vsel %vm146_vm2, %v4838_v57, 0.0 }
0x1003   :  { %2468 = vadd.xlane.f32.xlu1 %v2467_v6 }
0x1055   :  { %v2457_v53 = vpop.xlane.xlu0 %2456 }
0x1056   :  { %v2470_v17 = vmul.f32 %v2457_v53, %v3453_v37 }
0x1058   :  { %v2475_v39 = vsub.f32 %v4818_v26, %v2470_v17 }
0x105a   :  { %v2480_v24 = vmul.f32 %v2475_v39, %v2475_v39 }
0x105c   :  { %v2485_v12 = vsel %vm133_vm1, %v2480_v24, 0.0 }
0x105d   :  { %2486 = vadd.xlane.f32.xlu2 %v2485_v12 }
0x105e   :  { %v2460_v16 = vpop.xlane.xlu1 %2459 }
0x105f   :  { %v2471_v45 = vmul.f32 %v2460_v16, %v3453_v37 }
0x1061   :  { %v4847_v42 = vsub.f32 %v4823_v41, %v2471_v45 }
0x1063   :  { %v2481_v38 = vmul.f32 %v4847_v42, %v4847_v42 }
0x1065   :  { %v2488_v10 = vsel %vm133_vm1, %v2481_v38, 0.0 }
0x1066   :  { %v2463_v33 = vpop.xlane.xlu2 %2462  ;;  %2489 = vadd.xlane.f32.xlu0 %v2488_v10 }
0x1067   :  { %v2472_v21 = vmul.f32 %v2463_v33, %v3453_v37 }
0x1069   :  { %v4854_v62 = vsub.f32 %v4828_v60, %v2472_v21 }
0x106b   :  { %v2482_v63 = vmul.f32 %v4854_v62, %v4854_v62 }
0x106d   :  { %v2491_v1 = vsel %vm133_vm1, %v2482_v63, 0.0 }
0x106e   :  { %v2466_v52 = vpop.xlane.xlu0 %2465  ;;  %2492 = vadd.xlane.f32.xlu1 %v2491_v1 }
0x106f   :  { %v2473_v31 = vmul.f32 %v2466_v52, %v3453_v37 }
0x1071   :  { %v4861_v32 = vsub.f32 %v4833_v11, %v2473_v31 }
0x1073   :  { %v2483_v35 = vmul.f32 %v4861_v32, %v4861_v32 }
0x1075   :  { %v2494_v50 = vsel %vm133_vm1, %v2483_v35, 0.0 }
0x1076   :  { %2495 = vadd.xlane.f32.xlu2 %v2494_v50  ;;  %v2469_v2 = vpop.xlane.xlu1 %2468 }
0x1077   :  { %v2474_v47 = vmul.f32 %v2469_v2, %v3453_v37 }
0x1079   :  { %v4868_v4 = vsub.f32 %v4838_v57, %v2474_v47 }
0x107b   :  { %v2484_v36 = vmul.f32 %v4868_v4, %v4868_v4 }
0x107d   :  { %v2497_v54 = vsel %vm146_vm2, %v2484_v36, 0.0 }
0x107e   :  { %2498 = vadd.xlane.f32.xlu0 %v2497_v54 }
0x10d0   :  { %v2487_v48 = vpop.xlane.xlu2 %2486 }
0x10d1   :  { %v2500_v18 = vmul.f32 %v2487_v48, %v3453_v37 }
0x10d3   :  { %v2505_v51 = vadd.f32 1e-05, %v2500_v18 }
0x10d5   :  { %3267 = vrsqrt.f32 %v2505_v51  ;;  %vm2516_vm6 = vweird.f32 %v2505_v51 }
0x10d9   :  { %v2490_v30 = vpop.xlane.xlu0 %2489 }
0x10da   :  { %v2501_v0 = vmul.f32 %v2490_v30, %v3453_v37 }
0x10db   :  { %v3268_v13 = vpop.eup %3267 }
0x10dc   :  { %v2511_v3 = vmul.f32 %v3268_v13, %v2505_v51  ;;  %v2506_v7 = vadd.f32 1e-05, %v2501_v0  ;;  %vm2517_vm5 = vweird.f32 %v3268_v13 }
0x10dd   :  { %vm2518_vm7 = vmor %vm2516_vm6, %vm2517_vm5 }
0x10de   :  { %v2512_v58 = vmul.f32 %v3268_v13, %v2511_v3  ;;  %3269 = vrsqrt.f32 %v2506_v7  ;;  %vm2526_vm8 = vweird.f32 %v2506_v7 }
0x10e0   :  { %v2513_v29 = vmul.f32 0.5, %v2512_v58 }
0x10e1   :  { %v2493_v14 = vpop.xlane.xlu1 %2492 }
0x10e2   :  { %v2514_v27 = vsub.f32 1.5, %v2513_v29  ;;  %v2502_v19 = vmul.f32 %v2493_v14, %v3453_v37  ;;  %v2949_v14 = vld [vmem:[%s4994_s14 + $0x70] sm:$0xff] }
0x10e4   :  { %v3270_v56 = vpop.eup %3269  ;;  %v2515_v20 = vmul.f32 %v3268_v13, %v2514_v27  ;;  %v2507_v9 = vadd.f32 1e-05, %v2502_v19  ;;  %v2947_v27 = vld [vmem:[%s4994_s14 + $0x60] sm:$0xff]  ;;  %v2946_v19 = vld [vmem:[%s4994_s14 + $0x58] sm:$0xff] }
0x10e5   :  { %v2521_v40 = vmul.f32 %v3270_v56, %v2506_v7  ;;  %vm2527_vm4 = vweird.f32 %v3270_v56 }
0x10e6   :  { %v2519_v28 = vsel %vm2518_vm7, %v3268_v13, %v2515_v20  ;;  %3271 = vrsqrt.f32 %v2507_v9  ;;  %vm2528_vm9 = vmor %vm2526_vm8, %vm2527_vm4  ;;  %vm2536_vm11 = vweird.f32 %v2507_v9  ;;  %v2944_v20 = vld [vmem:[%s4994_s14 + $0x48] sm:$0xff] }
0x10e7   :  { %v2560_v49 = vmul.f32 %v2519_v28, %v2475_v39  ;;  %v2522_v8 = vmul.f32 %v3270_v56, %v2521_v40 }
0x10e9   :  { %v2568_v44 = vmul.f32 %v4891_v55, %v2560_v49  ;;  %v2523_v5 = vmul.f32 0.5, %v2522_v8  ;;  %v2496_v23 = vpop.xlane.xlu2 %2495 }
0x10ea   :  { %v2503_v59 = vmul.f32 %v2496_v23, %v3453_v37 }
0x10eb   :  { %v2576_v43 = vadd.f32 %v4896_v15, %v2568_v44  ;;  %v2524_v25 = vsub.f32 1.5, %v2523_v5 }
0x10ec   :  { %v3272_v6 = vpop.eup %3271  ;;  %v2508_v53 = vadd.f32 1e-05, %v2503_v59 }
0x10ed   :  { %v2525_v17 = vmul.f32 %v3270_v56, %v2524_v25  ;;  %v2531_v24 = vmul.f32 %v3272_v6, %v2507_v9  ;;  %2938 = vmatmul.msk.f32.vlgmr.msrb.gmra.mxu3 %vm133_vm1, %v2576_v43  ;;  %vm2537_vm10 = vweird.f32 %v3272_v6  ;;  %v2943_v9 = vld [vmem:[%s4994_s14 + $0x40] sm:$0xff] }
0x10ee   :  { %3273 = vrsqrt.f32 %v2508_v53  ;;  %vm2538_vm13 = vmor %vm2536_vm11, %vm2537_vm10  ;;  %vm2546_vm15 = vweird.f32 %v2508_v53 }
0x10ef   :  { %v2529_v39 = vsel %vm2528_vm9, %v3270_v56, %v2525_v17  ;;  %v2532_v12 = vmul.f32 %v3272_v6, %v2531_v24  ;;  %v2945_v56 = vld [vmem:[%s4994_s14 + $0x50] sm:$0xff] }
0x10f0   :  { %v2561_v16 = vmul.f32 %v2529_v39, %v4847_v42 }
0x10f1   :  { %v2533_v45 = vmul.f32 0.5, %v2532_v12  ;;  %v2499_v38 = vpop.xlane.xlu0 %2498 }
0x10f2   :  { %v2504_v10 = vmul.f32 %v2499_v38, %v3453_v37  ;;  %v2569_v33 = vmul.f32 %v4891_v55, %v2561_v16 }
0x10f3   :  { %v2534_v21 = vsub.f32 1.5, %v2533_v45 }
0x10f4   :  { %v3274_v63 = vpop.eup %3273  ;;  %v2509_v1 = vadd.f32 1e-05, %v2504_v10  ;;  %v2577_v52 = vadd.f32 %v4896_v15, %v2569_v33 }
0x10f5   :  { %v2535_v31 = vmul.f32 %v3272_v6, %v2534_v21  ;;  %v2541_v35 = vmul.f32 %v3274_v63, %v2508_v53  ;;  %vm2547_vm14 = vweird.f32 %v3274_v63 }
0x10f6   :  { %3275 = vrsqrt.f32 %v2509_v1  ;;  %2939 = vmatmul.msk.f32.gmra.mxu3 %vm133_vm1, %v2577_v52  ;;  %vm2548_vm0 = vmor %vm2546_vm15, %vm2547_vm14  ;;  %vm2556_vm5 = vweird.f32 %v2509_v1 }
0x10f7   :  { %v2539_v42 = vsel %vm2538_vm13, %v3272_v6, %v2535_v31  ;;  %v2542_v50 = vmul.f32 %v3274_v63, %v2541_v35 }
0x10f8   :  { %v2562_v2 = vmul.f32 %v2539_v42, %v4854_v62 }
0x10f9   :  { %v2543_v37 = vmul.f32 0.5, %v2542_v50 }
0x10fa   :  { %v2570_v47 = vmul.f32 %v4891_v55, %v2562_v2 }
0x10fb   :  { %v2544_v36 = vsub.f32 1.5, %v2543_v37 }
0x10fc   :  { %v3276_v54 = vpop.eup %3275  ;;  %v2578_v34 = vadd.f32 %v4896_v15, %v2570_v47 }
0x10fd   :  { %v2545_v46 = vmul.f32 %v3274_v63, %v2544_v36  ;;  %v2551_v22 = vmul.f32 %v3276_v54, %v2509_v1  ;;  %vm2557_vm3 = vweird.f32 %v3276_v54 }
0x10fe   :  { %2940 = vmatmul.msk.f32.gmra.mxu3 %vm133_vm1, %v2578_v34  ;;  %vm2558_vm6 = vmor %vm2556_vm5, %vm2557_vm3 }
0x10ff   :  { %v2549_v61 = vsel %vm2548_vm0, %v3274_v63, %v2545_v46  ;;  %v2552_v48 = vmul.f32 %v3276_v54, %v2551_v22 }
0x1100   :  { %v2563_v18 = vmul.f32 %v2549_v61, %v4861_v32  ;;  %v2950_v32 = vld [vmem:[%s4994_s14 + $0x78] sm:$0xff] }
0x1101   :  { %v2553_v51 = vmul.f32 0.5, %v2552_v48  ;;  %2715 = vmatpush.msra.mxu1 %v2950_v32 }
0x1102   :  { %v2571_v62 = vmul.f32 %v4891_v55, %v2563_v18 }
0x1103   :  { %v2554_v30 = vsub.f32 1.5, %v2553_v51  ;;  %2716 = vmatpush.msra.mxu1 %v2949_v14 }
0x1104   :  { %v2579_v0 = vadd.f32 %v4896_v15, %v2571_v62 }
0x1105   :  { %v2555_v13 = vmul.f32 %v3276_v54, %v2554_v30 }
0x1106   :  { %2941 = vmatmul.msk.f32.gmra.mxu3 %vm133_vm1, %v2579_v0 }
0x1107   :  { %v2559_v3 = vsel %vm2558_vm6, %v3276_v54, %v2555_v13 }
0x1108   :  { %v2564_v7 = vmul.f32 %v2559_v3, %v4868_v4  ;;  %v2948_v4 = vld [vmem:[%s4994_s14 + $0x68] sm:$0xff] }
0x1109   :  { %2717 = vmatpush.msra.mxu1 %v2948_v4 }
0x110a   :  { %v2572_v58 = vmul.f32 %v4891_v55, %v2564_v7  ;;  %v3063_v55 = vld [vmem:[%s4991_s13 + $0x1] ss:$0 sm:$0xff] }
0x110b   :  { %2718 = vmatpush.msra.mxu1 %v2947_v27 }
0x110c   :  { %v2580_v29 = vadd.f32 %v4896_v15, %v2572_v58 }
0x110d   :  { %2719 = vmatpush.msra.mxu1 %v2946_v19 }
0x110e   :  { %2942 = vmatmul.msk.f32.gmra.mxu3 %vm133_vm1, %v2580_v29 }
0x110f   :  { %2720 = vmatpush.msra.mxu1 %v2945_v56  ;;  %v3064_v56 = vld [vmem:[%s4993_s15 + $0x1] ss:$0 sm:$0xff] }
0x1111   :  { %2721 = vmatpush.msra.mxu1 %v2944_v20 }
0x1113   :  { %2722 = vmatpush.msra.mxu1 %v2943_v9 }
0x1170   :  { %v2623_v40 = vpop.f32.mrf.mxu3 }
0x1171   :  { %v2624_v28 = vadd.f32 %v3063_v55, %v2623_v40 }
0x1173   :  { %v2638_v15 = vmul.f32 %v2624_v28, %v2624_v28 }
0x1175   :  { %v2643_v49 = vmul.f32 %v2638_v15, %v2624_v28 }
0x1177   :  { %v2648_v8 = vmul.f32 0.044715, %v2643_v49 }
0x1179   :  { %v2653_v44 = vadd.f32 %v2648_v8, %v2624_v28  ;;  %v2626_v5 = vpop.f32.mrf.mxu3 }
0x117a   :  { %v2627_v23 = vadd.f32 %v3063_v55, %v2626_v5 }
0x117b   :  { %v2658_v59 = vmul.f32 0.7978846, %v2653_v44 }
0x117c   :  { %v2639_v43 = vmul.f32 %v2627_v23, %v2627_v23 }
0x117d   :  { %3277 = vtanh.f32 %v2658_v59 }
0x117e   :  { %v2644_v25 = vmul.f32 %v2639_v43, %v2627_v23 }
0x1180   :  { %v2649_v6 = vmul.f32 0.044715, %v2644_v25 }
0x1181   :  { %v2629_v53 = vpop.f32.mrf.mxu3 }
0x1182   :  { %v2654_v17 = vadd.f32 %v2649_v6, %v2627_v23  ;;  %v2630_v24 = vadd.f32 %v3063_v55, %v2629_v53 }
0x1183   :  { %v3278_v39 = vpop.eup %3277 }
0x1184   :  { %v2668_v12 = vadd.f32 1.0, %v3278_v39  ;;  %v2659_v16 = vmul.f32 0.7978846, %v2654_v17  ;;  %v2640_v45 = vmul.f32 %v2630_v24, %v2630_v24 }
0x1186   :  { %v2673_v38 = vmul.f32 0.5, %v2668_v12  ;;  %3279 = vtanh.f32 %v2659_v16  ;;  %v2645_v10 = vmul.f32 %v2640_v45, %v2630_v24 }
0x1188   :  { %v2678_v33 = vmul.f32 %v2673_v38, %v2624_v28  ;;  %v2650_v21 = vmul.f32 0.044715, %v2645_v10 }
0x1189   :  { %v2632_v63 = vpop.f32.mrf.mxu3 }
0x118a   :  { %v2655_v1 = vadd.f32 %v2650_v21, %v2630_v24  ;;  %v2633_v52 = vadd.f32 %v3063_v55, %v2632_v63  ;;  %2951 = vmatmul.msk.f32.vlgmr.msra.gmra.mxu1 %vm1400_vm12, %v2678_v33 }
0x118c   :  { %v3280_v31 = vpop.eup %3279  ;;  %v2660_v35 = vmul.f32 0.7978846, %v2655_v1  ;;  %v2641_v42 = vmul.f32 %v2633_v52, %v2633_v52 }
0x118d   :  { %v2669_v50 = vadd.f32 1.0, %v3280_v31 }
0x118e   :  { %3281 = vtanh.f32 %v2660_v35  ;;  %v2646_v2 = vmul.f32 %v2641_v42, %v2633_v52 }
0x118f   :  { %v2674_v37 = vmul.f32 0.5, %v2669_v50 }
0x1190   :  { %v2651_v47 = vmul.f32 0.044715, %v2646_v2 }
0x1191   :  { %v2635_v36 = vpop.f32.mrf.mxu3  ;;  %v2679_v54 = vmul.f32 %v2674_v37, %v2627_v23 }
0x1192   :  { %v2656_v34 = vadd.f32 %v2651_v47, %v2633_v52  ;;  %v2636_v46 = vadd.f32 %v3063_v55, %v2635_v36 }
0x1193   :  { %2952 = vmatmul.msk.f32.gmra.mxu1 %vm1400_vm12, %v2679_v54 }
0x1194   :  { %v3282_v22 = vpop.eup %3281  ;;  %v2661_v61 = vmul.f32 0.7978846, %v2656_v34  ;;  %v2642_v48 = vmul.f32 %v2636_v46, %v2636_v46 }
0x1195   :  { %v2670_v18 = vadd.f32 1.0, %v3282_v22 }
0x1196   :  { %3283 = vtanh.f32 %v2661_v61  ;;  %v2647_v51 = vmul.f32 %v2642_v48, %v2636_v46 }
0x1197   :  { %v2675_v62 = vmul.f32 0.5, %v2670_v18 }
0x1198   :  { %v2652_v30 = vmul.f32 0.044715, %v2647_v51 }
0x1199   :  { %v2680_v0 = vmul.f32 %v2675_v62, %v2630_v24 }
0x119a   :  { %v2657_v13 = vadd.f32 %v2652_v30, %v2636_v46 }
0x119b   :  { %2953 = vmatmul.msk.f32.gmra.mxu1 %vm1400_vm12, %v2680_v0 }
0x119c   :  { %v3284_v3 = vpop.eup %3283  ;;  %v2662_v7 = vmul.f32 0.7978846, %v2657_v13 }
0x119d   :  { %v2671_v58 = vadd.f32 1.0, %v3284_v3 }
0x119e   :  { %3285 = vtanh.f32 %v2662_v7 }
0x119f   :  { %v2676_v29 = vmul.f32 0.5, %v2671_v58 }
0x11a1   :  { %v2681_v32 = vmul.f32 %v2676_v29, %v2633_v52 }
0x11a3   :  { %2954 = vmatmul.msk.f32.gmra.mxu1 %vm1400_vm12, %v2681_v32 }
0x11a4   :  { %v3286_v14 = vpop.eup %3285 }
0x11a5   :  { %v2672_v4 = vadd.f32 1.0, %v3286_v14 }
0x11a7   :  { %v2677_v27 = vmul.f32 0.5, %v2672_v4 }
0x11a9   :  { %v2682_v19 = vmul.f32 %v2677_v27, %v2636_v46 }
0x11ab   :  { %2955 = vmatmul.msk.f32.gmra.mxu1 %vm1400_vm12, %v2682_v19 }
0x1207   :  { %v2724_v20 = vpop.f32.mrf.mxu1 }
0x1208   :  { %v2739_v9 = vadd.f32 %v2724_v20, %v4818_v26 }
0x120a   :  { %v2749_v55 = vadd.f32 %v3064_v56, %v2739_v9 }
0x120c   :  { %2754 = vst.msk [vmem:[%s4995_s16] sm:$0xff] %vm133_vm1, %v2749_v55 }
0x1210   :  { %v2727_v40 = vpop.f32.mrf.mxu1 }
0x1211   :  { %v2740_v28 = vadd.f32 %v2727_v40, %v4823_v41 }
0x1213   :  { %v2750_v15 = vadd.f32 %v3064_v56, %v2740_v28 }
0x1215   :  { %2755 = vst.msk [vmem:[%s4995_s16 + $0x8] sm:$0xff] %vm133_vm1, %v2750_v15 }
0x1218   :  { %v2730_v49 = vpop.f32.mrf.mxu1 }
0x1219   :  { %v2741_v8 = vadd.f32 %v2730_v49, %v4828_v60 }
0x121b   :  { %v2751_v44 = vadd.f32 %v3064_v56, %v2741_v8 }
0x121d   :  { %2756 = vst.msk [vmem:[%s4995_s16 + $0x10] sm:$0xff] %vm133_vm1, %v2751_v44 }
0x1220   :  { %v2733_v26 = vpop.f32.mrf.mxu1 }
0x1221   :  { %v2742_v5 = vadd.f32 %v2733_v26, %v4833_v11 }
0x1223   :  { %v2752_v23 = vadd.f32 %v3064_v56, %v2742_v5 }
0x1225   :  { %2757 = vst.msk [vmem:[%s4995_s16 + $0x18] sm:$0xff] %vm133_vm1, %v2752_v23 }
0x1228   :  { %v2736_v41 = vpop.f32.mrf.mxu1 }
0x1229   :  { %v2743_v59 = vadd.f32 %v2736_v41, %v4838_v57 }
0x122b   :  { %v2753_v43 = vadd.f32 %v3064_v56, %v2743_v59 }
0x122d   :  { %2758 = vst.msk [vmem:[%s4995_s16 + $0x20] sm:$0x3] %vm146_vm2, %v2753_v43 }

</bundles_post_ra>
